<compile_context>
chip_gen: v5e
topology: v5e:2x2
jax: 0.10.0
libtpu: 0.0.40
codegen_flags: <defaults>
</compile_context>

<pallas_src>
import jax
import jax.numpy as jnp
from jax import lax
from jax.experimental import pallas as pl
from jax.experimental.pallas import tpu as pltpu


def _round_up(n, m):
    return ((n + m - 1) // m) * m


# ---------------------------------------------------------------------------
# Pallas kernel
# ---------------------------------------------------------------------------
def qst_encoder_kernel(x_ref,                        # (T, Bt, E)   embedded tokens (pre-tanh)
                       wih0_ref, whh0_ref, b0_ref,   # (E, 8H)   (2, H, 4H)  (1, 8H)
                       wih1_ref, whh1_ref, b1_ref,   # (2H, 8H)  (2, H, 4H)  (1, 8H)
                       wfc_ref, bfc_ref,             # (4H, embed), (1, embed)
                       out_ref,                      # (Bt, embed)
                       gx_ref,                       # scratch (T, Bt, 8H): hoisted gate projections
                       seq_ref):                     # scratch (T, Bt, 2H): layer-0 bidir outputs
    T, B, _E = x_ref.shape
    H = whh0_ref.shape[1]
    H4 = 4 * H

    def gates_to_hc(g, c):
        # PyTorch LSTM gate order: i, f, g, o.
        # TODO(synk): at production H, realign so each H-wide gate slice starts on a
        #             128-lane boundary; at H=32 these are in-vreg lane extractions.
        i = jax.nn.sigmoid(g[:, 0 * H:1 * H])
        f = jax.nn.sigmoid(g[:, 1 * H:2 * H])
        gg = jnp.tanh(g[:, 2 * H:3 * H])
        o = jax.nn.sigmoid(g[:, 3 * H:4 * H])
        c_new = f * c + i * gg
        h_new = o * jnp.tanh(c_new)
        return h_new, c_new

    # ---- tanh(word2vec(q)) once + hoisted layer-0 input projection (bias folded in) ----
    xt = jnp.tanh(x_ref[...].astype(jnp.float32)).reshape(T * B, -1)
    gx_ref[...] = (jnp.dot(xt, wih0_ref[...], preferred_element_type=jnp.float32)
                   + b0_ref[...]).reshape(T, B, 8 * H)

    whh0f = whh0_ref[0]
    whh0b = whh0_ref[1]
    zeros = jnp.zeros((B, H), jnp.float32)
    hf = cf = hb = cb = zeros

    # ---- layer 0: fused fwd/bwd recurrence, fully unrolled (T static & small) ----
    for i in range(T):
        tf = i
        tb = T - 1 - i
        gf = gx_ref[tf][:, :H4] + jnp.dot(hf, whh0f, preferred_element_type=jnp.float32)
        gb = gx_ref[tb][:, H4:] + jnp.dot(hb, whh0b, preferred_element_type=jnp.float32)
        hf, cf = gates_to_hc(gf, cf)
        hb, cb = gates_to_hc(gb, cb)
        seq_ref[tf, :, 0:H] = hf          # fwd hidden  -> lanes [0, H)
        seq_ref[tb, :, H:2 * H] = hb      # bwd hidden  -> lanes [H, 2H)
    h0f, c0f, h0b, c0b = hf, cf, hb, cb

    # ---- hoisted layer-1 input projection over the whole sequence (reuses gx scratch) ----
    seq = seq_ref[...].reshape(T * B, 2 * H)
    gx_ref[...] = (jnp.dot(seq, wih1_ref[...], preferred_element_type=jnp.float32)
                   + b1_ref[...]).reshape(T, B, 8 * H)

    whh1f = whh1_ref[0]
    whh1b = whh1_ref[1]
    hf = cf = hb = cb = zeros

    # ---- layer 1: fused fwd/bwd recurrence ----
    for i in range(T):
        tf = i
        tb = T - 1 - i
        gf = gx_ref[tf][:, :H4] + jnp.dot(hf, whh1f, preferred_element_type=jnp.float32)
        gb = gx_ref[tb][:, H4:] + jnp.dot(hb, whh1b, preferred_element_type=jnp.float32)
        hf, cf = gates_to_hc(gf, cf)
        hb, cb = gates_to_hc(gb, cb)
    h1f, c1f, h1b, c1b = hf, cf, hb, cb

    # stack/cat/transpose/reshape in PyTorch == per-row concat [h0sum, c0sum, h1sum, c1sum]
    feat = jnp.tanh(jnp.concatenate([h0f + h0b, c0f + c0b, h1f + h1b, c1f + c1b], axis=-1))
    out = jnp.dot(feat, wfc_ref[...], preferred_element_type=jnp.float32) + bfc_ref[...]
    out_ref[...] = out.astype(out_ref.dtype)


# ---------------------------------------------------------------------------
# Wrapper (glue)
# ---------------------------------------------------------------------------
def qst_encoder(question, params):
    """question: (B, T) int32 token ids."""
    B, T = question.shape
    H = params["whh0"].shape[-2]
    E = params["wih0"].shape[-2]
    embed_size = params["wfc"].shape[-1]

    # TODO(synk): embedding gather is data-dependent; done in plain JAX glue, not in-kernel.
    emb = jnp.take(params["emb"], question, axis=0)               # (B, T, E)
    x = jnp.transpose(emb, (1, 0, 2)).astype(jnp.float32)         # (T, B, E) time-major

    # Pad batch to a sublane-friendly multiple of 8 and pick a batch tile (grid axis).
    B_tile = 128 if B >= 128 else _round_up(B, 8)
    B_pad = _round_up(B, B_tile)
    if B_pad != B:
        x = jnp.pad(x, ((0, 0), (0, B_pad - B), (0, 0)))

    # Stack fwd+bwd gate weights/biases so the hoisted projection has N = 8H (fills MXU).
    wih0c = jnp.concatenate([params["wih0"][0], params["wih0"][1]], axis=-1)   # (E, 8H)
    b0c = jnp.concatenate([params["b0"][0], params["b0"][1]], axis=-1)         # (1, 8H)
    wih1c = jnp.concatenate([params["wih1"][0], params["wih1"][1]], axis=-1)   # (2H, 8H)
    b1c = jnp.concatenate([params["b1"][0], params["b1"][1]], axis=-1)         # (1, 8H)

    grid = (B_pad // B_tile,)
    out = pl.pallas_call(
        qst_encoder_kernel,
        out_shape=jax.ShapeDtypeStruct((B_pad, embed_size), jnp.float32),
        grid=grid,
        in_specs=[
            pl.BlockSpec((T, B_tile, E), lambda b: (0, b, 0)),        # x: tiled over batch
            pl.BlockSpec((E, 8 * H), lambda b: (0, 0)),               # wih0 (fwd|bwd)
            pl.BlockSpec((2, H, 4 * H), lambda b: (0, 0, 0)),         # whh0
            pl.BlockSpec((1, 8 * H), lambda b: (0, 0)),               # b0 (fwd|bwd)
            pl.BlockSpec((2 * H, 8 * H), lambda b: (0, 0)),           # wih1 (fwd|bwd)
            pl.BlockSpec((2, H, 4 * H), lambda b: (0, 0, 0)),         # whh1
            pl.BlockSpec((1, 8 * H), lambda b: (0, 0)),               # b1 (fwd|bwd)
            pl.BlockSpec((4 * H, embed_size), lambda b: (0, 0)),      # fc weight
            pl.BlockSpec((1, embed_size), lambda b: (0, 0)),          # fc bias
        ],
        out_specs=pl.BlockSpec((B_tile, embed_size), lambda b: (b, 0)),
        scratch_shapes=[
            pltpu.VMEM((T, B_tile, 8 * H), jnp.float32),   # hoisted input-gate projections
            pltpu.VMEM((T, B_tile, 2 * H), jnp.float32),   # layer-0 bidirectional outputs
        ],
        compiler_params=pltpu.CompilerParams(
            dimension_semantics=("parallel",),             # batch tiles independent (v7x 2 TCs)
            vmem_limit_bytes=48 * 1024 * 1024,             # stay under v7x's 64 MiB VMEM
        ),
    )(x, wih0c, params["whh0"], b0c, wih1c, params["whh1"], b1c,
      params["wfc"], params["bfc"])
    return out[:B]


# ---------------------------------------------------------------------------
# Deterministic synthetic parameters (shapes implied by nn.Module __init__)
# ---------------------------------------------------------------------------
def init_params(key, vocab, word_embed, hidden, embed_size):
    ks = jax.random.split(key, 9)
    u = lambda k, s: jax.random.uniform(k, s, jnp.float32, -0.1, 0.1)
    H = hidden
    return dict(
        emb=u(ks[0], (vocab, word_embed)),          # nn.Embedding
        # layer 0 (fwd, bwd): W_ih^T (E,4H), W_hh^T (H,4H), b_ih+b_hh (1,4H)
        wih0=u(ks[1], (2, word_embed, 4 * H)),
        whh0=u(ks[2], (2, H, 4 * H)),
        b0=u(ks[3], (2, 1, 4 * H)),
        # layer 1 (fwd, bwd): input is 2H (bidirectional concat)
        wih1=u(ks[4], (2, 2 * H, 4 * H)),
        whh1=u(ks[5], (2, H, 4 * H)),
        b1=u(ks[6], (2, 1, 4 * H)),
        # fc: Linear(2*num_layers*hidden = 4H, embed_size), stored transposed
        wfc=u(ks[7], (4 * H, embed_size)),
        bfc=u(ks[8], (1, embed_size)),
    )


# ---------------------------------------------------------------------------
# Pure-JAX reference (same semantics as the PyTorch forward)
# ---------------------------------------------------------------------------
def reference(question, params):
    emb = jnp.take(params["emb"], question, axis=0)
    x = jnp.tanh(jnp.transpose(emb, (1, 0, 2)).astype(jnp.float32))
    T, B, _ = x.shape
    H = params["whh0"].shape[-2]

    def cell(x_t, h, c, wih, whh, b):
        g = x_t @ wih + h @ whh + b
        i = jax.nn.sigmoid(g[:, :H]); f = jax.nn.sigmoid(g[:, H:2 * H])
        gg = jnp.tanh(g[:, 2 * H:3 * H]); o = jax.nn.sigmoid(g[:, 3 * H:])
        c = f * c + i * gg
        return o * jnp.tanh(c), c

    def run(seq, wih, whh, b, reverse):
        h = jnp.zeros((B, H), jnp.float32)
        c = jnp.zeros((B, H), jnp.float32)
        outs = [None] * T
        order = range(T - 1, -1, -1) if reverse else range(T)
        for t in order:
            h, c = cell(seq[t], h, c, wih, whh, b)
            outs[t] = h
        return jnp.stack(outs), h, c

    s0f, h0f, c0f = run(x, params["wih0"][0], params["whh0"][0], params["b0"][0], False)
    s0b, h0b, c0b = run(x, params["wih0"][1], params["whh0"][1], params["b0"][1], True)
    s1 = jnp.concatenate([s0f, s0b], axis=-1)
    _, h1f, c1f = run(s1, params["wih1"][0], params["whh1"][0], params["b1"][0], False)
    _, h1b, c1b = run(s1, params["wih1"][1], params["whh1"][1], params["b1"][1], True)
    feat = jnp.tanh(jnp.concatenate([h0f + h0b, c0f + c0b, h1f + h1b, c1f + c1b], axis=-1))
    return feat @ params["wfc"] + params["bfc"]


# ---------------------------------------------------------------------------
if __name__ == "__main__":
    key = jax.random.PRNGKey(0)
    pkey, qkey = jax.random.split(key)

    # small shapes: qst_vocab_size=20, word_embed_size=16, embed_size=32,
    # num_layers=2 (required by the forward), hidden_size=32, batch=2, seq=8
    VOCAB, WORD_E, EMBED, HIDDEN = 20, 16, 32, 32
    B, T = 2, 8

    params = init_params(pkey, VOCAB, WORD_E, HIDDEN, EMBED)
    question = jax.random.randint(qkey, (B, T), 0, VOCAB, dtype=jnp.int32)

    out = qst_encoder(question, params)
    out = jax.block_until_ready(out)
    assert out.shape == (B, EMBED)

    ref = reference(question, params)
    assert bool(jnp.allclose(out, ref, atol=1e-2, rtol=1e-2)), "mismatch vs reference"

    print("KERNEL_OK")
</pallas_src>

<mosaic_0001>
module attributes {stable_mosaic.version = 11 : i64} {
  func.func @qst_encoder_kernel(%arg0: i32, %arg1: memref<8x8x16xf32, #tpu.memory_space<vmem>>, %arg2: memref<16x256xf32, #tpu.memory_space<vmem>>, %arg3: memref<2x32x128xf32, #tpu.memory_space<vmem>>, %arg4: memref<1x256xf32, #tpu.memory_space<vmem>>, %arg5: memref<64x256xf32, #tpu.memory_space<vmem>>, %arg6: memref<2x32x128xf32, #tpu.memory_space<vmem>>, %arg7: memref<1x256xf32, #tpu.memory_space<vmem>>, %arg8: memref<128x32xf32, #tpu.memory_space<vmem>>, %arg9: memref<1x32xf32, #tpu.memory_space<vmem>>, %arg10: memref<8x32xf32, #tpu.memory_space<vmem>>, %arg11: memref<8x8x256xf32, #tpu.memory_space<vmem>>, %arg12: memref<8x8x64xf32, #tpu.memory_space<vmem>>) attributes {dimension_semantics = [#tpu.dimension_semantics<parallel>], iteration_bounds = array<i64: 1>, scalar_prefetch = 0 : i64, scratch_operands = 2 : i64, tpu.core_type = #tpu.core_type<tc>, window_params = [{transform_indices = @transform_0, window_bounds = array<i64: 8, 8, 16>}, {pipeline_mode = #tpu.pipeline_mode<synchronous>, transform_indices = @transform_1, window_bounds = array<i64: 16, 256>}, {pipeline_mode = #tpu.pipeline_mode<synchronous>, transform_indices = @transform_2, window_bounds = array<i64: 2, 32, 128>}, {pipeline_mode = #tpu.pipeline_mode<synchronous>, transform_indices = @transform_3, window_bounds = array<i64: 1, 256>}, {pipeline_mode = #tpu.pipeline_mode<synchronous>, transform_indices = @transform_4, window_bounds = array<i64: 64, 256>}, {pipeline_mode = #tpu.pipeline_mode<synchronous>, transform_indices = @transform_5, window_bounds = array<i64: 2, 32, 128>}, {pipeline_mode = #tpu.pipeline_mode<synchronous>, transform_indices = @transform_6, window_bounds = array<i64: 1, 256>}, {pipeline_mode = #tpu.pipeline_mode<synchronous>, transform_indices = @transform_7, window_bounds = array<i64: 128, 32>}, {pipeline_mode = #tpu.pipeline_mode<synchronous>, transform_indices = @transform_8, window_bounds = array<i64: 1, 32>}, {transform_indices = @transform_9, window_bounds = array<i64: 8, 32>}]} {
    %c0 = arith.constant 0 : index
    %c0_0 = arith.constant 0 : index
    %c0_1 = arith.constant 0 : index
    %0 = vector.load %arg1[%c0, %c0_0, %c0_1] : memref<8x8x16xf32, #tpu.memory_space<vmem>>, vector<8x8x16xf32>
    %1 = math.tanh %0 : vector<8x8x16xf32>
    %2 = vector.shape_cast %1 : vector<8x8x16xf32> to vector<64x16xf32>
    %c0_2 = arith.constant 0 : index
    %c0_3 = arith.constant 0 : index
    %3 = vector.load %arg2[%c0_2, %c0_3] : memref<16x256xf32, #tpu.memory_space<vmem>>, vector<16x256xf32>
    %cst = arith.constant dense<0.000000e+00> : vector<64x256xf32>
    %4 = tpu.matmul %2, %3, %cst {dimension_numbers = #tpu.dot_dimension_numbers<[1], [0], [0], [1], [0, 0, 1, 1], [], []>} : vector<64x16xf32>, vector<16x256xf32>, vector<64x256xf32> -> vector<64x256xf32>
    %c0_4 = arith.constant 0 : index
    %c0_5 = arith.constant 0 : index
    %5 = vector.load %arg4[%c0_4, %c0_5] : memref<1x256xf32, #tpu.memory_space<vmem>>, vector<1x256xf32>
    %6 = vector.broadcast %5 : vector<1x256xf32> to vector<64x256xf32>
    %7 = arith.addf %4, %6 : vector<64x256xf32>
    %8 = vector.shape_cast %7 : vector<64x256xf32> to vector<8x8x256xf32>
    %c0_6 = arith.constant 0 : index
    %c0_7 = arith.constant 0 : index
    %c0_8 = arith.constant 0 : index
    %9 = vector.load %arg11[%c0_6, %c0_7, %c0_8] : memref<8x8x256xf32, #tpu.memory_space<vmem>>, vector<8x8x256xf32>
    tpu.vector_store %arg11[%c0_6, %c0_7, %c0_8], %8 {strides = array<i32>} : memref<8x8x256xf32, #tpu.memory_space<vmem>>, vector<8x8x256xf32>,
    %c0_9 = arith.constant 0 : index
    %c0_10 = arith.constant 0 : index
    %c0_11 = arith.constant 0 : index
    %10 = vector.load %arg3[%c0_9, %c0_10, %c0_11] : memref<2x32x128xf32, #tpu.memory_space<vmem>>, vector<1x32x128xf32>
    %11 = vector.shape_cast %10 : vector<1x32x128xf32> to vector<32x128xf32>
    %c1 = arith.constant 1 : index
    %c0_12 = arith.constant 0 : index
    %c0_13 = arith.constant 0 : index
    %12 = vector.load %arg3[%c1, %c0_12, %c0_13] : memref<2x32x128xf32, #tpu.memory_space<vmem>>, vector<1x32x128xf32>
    %13 = vector.shape_cast %12 : vector<1x32x128xf32> to vector<32x128xf32>
    %cst_14 = arith.constant 0.000000e+00 : f32
    %14 = vector.broadcast %cst_14 : f32 to vector<8x32xf32>
    %c0_15 = arith.constant 0 : index
    %c0_16 = arith.constant 0 : index
    %c0_17 = arith.constant 0 : index
    %15 = vector.load %arg11[%c0_15, %c0_16, %c0_17] : memref<8x8x256xf32, #tpu.memory_space<vmem>>, vector<1x8x256xf32>
    %16 = vector.shape_cast %15 : vector<1x8x256xf32> to vector<8x256xf32>
    %17 = vector.extract_strided_slice %16 {offsets = [0, 0], sizes = [8, 128], strides = [1, 1]} : vector<8x256xf32> to vector<8x128xf32>
    %cst_18 = arith.constant dense<0.000000e+00> : vector<8x128xf32>
    %18 = tpu.matmul %14, %11, %cst_18 {dimension_numbers = #tpu.dot_dimension_numbers<[1], [0], [0], [1], [0, 0, 1, 1], [], []>} : vector<8x32xf32>, vector<32x128xf32>, vector<8x128xf32> -> vector<8x128xf32>
    %19 = arith.addf %17, %18 : vector<8x128xf32>
    %c7 = arith.constant 7 : index
    %c0_19 = arith.constant 0 : index
    %c0_20 = arith.constant 0 : index
    %20 = vector.load %arg11[%c7, %c0_19, %c0_20] : memref<8x8x256xf32, #tpu.memory_space<vmem>>, vector<1x8x256xf32>
    %21 = vector.shape_cast %20 : vector<1x8x256xf32> to vector<8x256xf32>
    %22 = vector.extract_strided_slice %21 {offsets = [0, 128], sizes = [8, 128], strides = [1, 1]} : vector<8x256xf32> to vector<8x128xf32>
    %cst_21 = arith.constant dense<0.000000e+00> : vector<8x128xf32>
    %23 = tpu.matmul %14, %13, %cst_21 {dimension_numbers = #tpu.dot_dimension_numbers<[1], [0], [0], [1], [0, 0, 1, 1], [], []>} : vector<8x32xf32>, vector<32x128xf32>, vector<8x128xf32> -> vector<8x128xf32>
    %24 = arith.addf %22, %23 : vector<8x128xf32>
    %25 = vector.extract_strided_slice %19 {offsets = [0, 0], sizes = [8, 32], strides = [1, 1]} : vector<8x128xf32> to vector<8x32xf32>
    %26 = arith.negf %25 : vector<8x32xf32>
    %27 = math.exp %26 : vector<8x32xf32>
    %cst_22 = arith.constant 1.000000e+00 : f32
    %28 = vector.broadcast %cst_22 : f32 to vector<8x32xf32>
    %29 = arith.addf %28, %27 : vector<8x32xf32>
    %30 = arith.divf %28, %29 : vector<8x32xf32>
    %31 = vector.extract_strided_slice %19 {offsets = [0, 32], sizes = [8, 32], strides = [1, 1]} : vector<8x128xf32> to vector<8x32xf32>
    %32 = arith.negf %31 : vector<8x32xf32>
    %33 = math.exp %32 : vector<8x32xf32>
    %cst_23 = arith.constant 1.000000e+00 : f32
    %34 = vector.broadcast %cst_23 : f32 to vector<8x32xf32>
    %35 = arith.addf %34, %33 : vector<8x32xf32>
    %36 = arith.divf %34, %35 : vector<8x32xf32>
    %37 = vector.extract_strided_slice %19 {offsets = [0, 64], sizes = [8, 32], strides = [1, 1]} : vector<8x128xf32> to vector<8x32xf32>
    %38 = math.tanh %37 : vector<8x32xf32>
    %39 = vector.extract_strided_slice %19 {offsets = [0, 96], sizes = [8, 32], strides = [1, 1]} : vector<8x128xf32> to vector<8x32xf32>
    %40 = arith.negf %39 : vector<8x32xf32>
    %41 = math.exp %40 : vector<8x32xf32>
    %cst_24 = arith.constant 1.000000e+00 : f32
    %42 = vector.broadcast %cst_24 : f32 to vector<8x32xf32>
    %43 = arith.addf %42, %41 : vector<8x32xf32>
    %44 = arith.divf %42, %43 : vector<8x32xf32>
    %45 = arith.mulf %36, %14 : vector<8x32xf32>
    %46 = arith.mulf %30, %38 : vector<8x32xf32>
    %47 = arith.addf %45, %46 : vector<8x32xf32>
    %48 = math.tanh %47 : vector<8x32xf32>
    %49 = arith.mulf %44, %48 : vector<8x32xf32>
    %50 = vector.extract_strided_slice %24 {offsets = [0, 0], sizes = [8, 32], strides = [1, 1]} : vector<8x128xf32> to vector<8x32xf32>
    %51 = arith.negf %50 : vector<8x32xf32>
    %52 = math.exp %51 : vector<8x32xf32>
    %cst_25 = arith.constant 1.000000e+00 : f32
    %53 = vector.broadcast %cst_25 : f32 to vector<8x32xf32>
    %54 = arith.addf %53, %52 : vector<8x32xf32>
    %55 = arith.divf %53, %54 : vector<8x32xf32>
    %56 = vector.extract_strided_slice %24 {offsets = [0, 32], sizes = [8, 32], strides = [1, 1]} : vector<8x128xf32> to vector<8x32xf32>
    %57 = arith.negf %56 : vector<8x32xf32>
    %58 = math.exp %57 : vector<8x32xf32>
    %cst_26 = arith.constant 1.000000e+00 : f32
    %59 = vector.broadcast %cst_26 : f32 to vector<8x32xf32>
    %60 = arith.addf %59, %58 : vector<8x32xf32>
    %61 = arith.divf %59, %60 : vector<8x32xf32>
    %62 = vector.extract_strided_slice %24 {offsets = [0, 64], sizes = [8, 32], strides = [1, 1]} : vector<8x128xf32> to vector<8x32xf32>
    %63 = math.tanh %62 : vector<8x32xf32>
    %64 = vector.extract_strided_slice %24 {offsets = [0, 96], sizes = [8, 32], strides = [1, 1]} : vector<8x128xf32> to vector<8x32xf32>
    %65 = arith.negf %64 : vector<8x32xf32>
    %66 = math.exp %65 : vector<8x32xf32>
    %cst_27 = arith.constant 1.000000e+00 : f32
    %67 = vector.broadcast %cst_27 : f32 to vector<8x32xf32>
    %68 = arith.addf %67, %66 : vector<8x32xf32>
    %69 = arith.divf %67, %68 : vector<8x32xf32>
    %70 = arith.mulf %61, %14 : vector<8x32xf32>
    %71 = arith.mulf %55, %63 : vector<8x32xf32>
    %72 = arith.addf %70, %71 : vector<8x32xf32>
    %73 = math.tanh %72 : vector<8x32xf32>
    %74 = arith.mulf %69, %73 : vector<8x32xf32>
    %c0_28 = arith.constant 0 : index
    %c0_29 = arith.constant 0 : index
    %c0_30 = arith.constant 0 : index
    %75 = vector.load %arg12[%c0_28, %c0_29, %c0_30] : memref<8x8x64xf32, #tpu.memory_space<vmem>>, vector<1x8x32xf32>
    %76 = vector.shape_cast %75 : vector<1x8x32xf32> to vector<8x32xf32>
    %77 = vector.shape_cast %49 : vector<8x32xf32> to vector<1x8x32xf32>
    tpu.vector_store %arg12[%c0_28, %c0_29, %c0_30], %77 {strides = array<i32>} : memref<8x8x64xf32, #tpu.memory_space<vmem>>, vector<1x8x32xf32>,
    %c7_31 = arith.constant 7 : index
    %c0_32 = arith.constant 0 : index
    %c32 = arith.constant 32 : index
    %78 = vector.load %arg12[%c7_31, %c0_32, %c32] : memref<8x8x64xf32, #tpu.memory_space<vmem>>, vector<1x8x32xf32>
    %79 = vector.shape_cast %78 : vector<1x8x32xf32> to vector<8x32xf32>
    %80 = vector.shape_cast %74 : vector<8x32xf32> to vector<1x8x32xf32>
    tpu.vector_store %arg12[%c7_31, %c0_32, %c32], %80 {strides = array<i32>} : memref<8x8x64xf32, #tpu.memory_space<vmem>>, vector<1x8x32xf32>,
    %c1_33 = arith.constant 1 : index
    %c0_34 = arith.constant 0 : index
    %c0_35 = arith.constant 0 : index
    %81 = vector.load %arg11[%c1_33, %c0_34, %c0_35] : memref<8x8x256xf32, #tpu.memory_space<vmem>>, vector<1x8x256xf32>
    %82 = vector.shape_cast %81 : vector<1x8x256xf32> to vector<8x256xf32>
    %83 = vector.extract_strided_slice %82 {offsets = [0, 0], sizes = [8, 128], strides = [1, 1]} : vector<8x256xf32> to vector<8x128xf32>
    %cst_36 = arith.constant dense<0.000000e+00> : vector<8x128xf32>
    %84 = tpu.matmul %49, %11, %cst_36 {dimension_numbers = #tpu.dot_dimension_numbers<[1], [0], [0], [1], [0, 0, 1, 1], [], []>} : vector<8x32xf32>, vector<32x128xf32>, vector<8x128xf32> -> vector<8x128xf32>
    %85 = arith.addf %83, %84 : vector<8x128xf32>
    %c6 = arith.constant 6 : index
    %c0_37 = arith.constant 0 : index
    %c0_38 = arith.constant 0 : index
    %86 = vector.load %arg11[%c6, %c0_37, %c0_38] : memref<8x8x256xf32, #tpu.memory_space<vmem>>, vector<1x8x256xf32>
    %87 = vector.shape_cast %86 : vector<1x8x256xf32> to vector<8x256xf32>
    %88 = vector.extract_strided_slice %87 {offsets = [0, 128], sizes = [8, 128], strides = [1, 1]} : vector<8x256xf32> to vector<8x128xf32>
    %cst_39 = arith.constant dense<0.000000e+00> : vector<8x128xf32>
    %89 = tpu.matmul %74, %13, %cst_39 {dimension_numbers = #tpu.dot_dimension_numbers<[1], [0], [0], [1], [0, 0, 1, 1], [], []>} : vector<8x32xf32>, vector<32x128xf32>, vector<8x128xf32> -> vector<8x128xf32>
    %90 = arith.addf %88, %89 : vector<8x128xf32>
    %91 = vector.extract_strided_slice %85 {offsets = [0, 0], sizes = [8, 32], strides = [1, 1]} : vector<8x128xf32> to vector<8x32xf32>
    %92 = arith.negf %91 : vector<8x32xf32>
    %93 = math.exp %92 : vector<8x32xf32>
    %cst_40 = arith.constant 1.000000e+00 : f32
    %94 = vector.broadcast %cst_40 : f32 to vector<8x32xf32>
    %95 = arith.addf %94, %93 : vector<8x32xf32>
    %96 = arith.divf %94, %95 : vector<8x32xf32>
    %97 = vector.extract_strided_slice %85 {offsets = [0, 32], sizes = [8, 32], strides = [1, 1]} : vector<8x128xf32> to vector<8x32xf32>
    %98 = arith.negf %97 : vector<8x32xf32>
    %99 = math.exp %98 : vector<8x32xf32>
    %cst_41 = arith.constant 1.000000e+00 : f32
    %100 = vector.broadcast %cst_41 : f32 to vector<8x32xf32>
    %101 = arith.addf %100, %99 : vector<8x32xf32>
    %102 = arith.divf %100, %101 : vector<8x32xf32>
    %103 = vector.extract_strided_slice %85 {offsets = [0, 64], sizes = [8, 32], strides = [1, 1]} : vector<8x128xf32> to vector<8x32xf32>
    %104 = math.tanh %103 : vector<8x32xf32>
    %105 = vector.extract_strided_slice %85 {offsets = [0, 96], sizes = [8, 32], strides = [1, 1]} : vector<8x128xf32> to vector<8x32xf32>
    %106 = arith.negf %105 : vector<8x32xf32>
    %107 = math.exp %106 : vector<8x32xf32>
    %cst_42 = arith.constant 1.000000e+00 : f32
    %108 = vector.broadcast %cst_42 : f32 to vector<8x32xf32>
    %109 = arith.addf %108, %107 : vector<8x32xf32>
    %110 = arith.divf %108, %109 : vector<8x32xf32>
    %111 = arith.mulf %102, %47 : vector<8x32xf32>
    %112 = arith.mulf %96, %104 : vector<8x32xf32>
    %113 = arith.addf %111, %112 : vector<8x32xf32>
    %114 = math.tanh %113 : vector<8x32xf32>
    %115 = arith.mulf %110, %114 : vector<8x32xf32>
    %116 = vector.extract_strided_slice %90 {offsets = [0, 0], sizes = [8, 32], strides = [1, 1]} : vector<8x128xf32> to vector<8x32xf32>
    %117 = arith.negf %116 : vector<8x32xf32>
    %118 = math.exp %117 : vector<8x32xf32>
    %cst_43 = arith.constant 1.000000e+00 : f32
    %119 = vector.broadcast %cst_43 : f32 to vector<8x32xf32>
    %120 = arith.addf %119, %118 : vector<8x32xf32>
    %121 = arith.divf %119, %120 : vector<8x32xf32>
    %122 = vector.extract_strided_slice %90 {offsets = [0, 32], sizes = [8, 32], strides = [1, 1]} : vector<8x128xf32> to vector<8x32xf32>
    %123 = arith.negf %122 : vector<8x32xf32>
    %124 = math.exp %123 : vector<8x32xf32>
    %cst_44 = arith.constant 1.000000e+00 : f32
    %125 = vector.broadcast %cst_44 : f32 to vector<8x32xf32>
    %126 = arith.addf %125, %124 : vector<8x32xf32>
    %127 = arith.divf %125, %126 : vector<8x32xf32>
    %128 = vector.extract_strided_slice %90 {offsets = [0, 64], sizes = [8, 32], strides = [1, 1]} : vector<8x128xf32> to vector<8x32xf32>
    %129 = math.tanh %128 : vector<8x32xf32>
    %130 = vector.extract_strided_slice %90 {offsets = [0, 96], sizes = [8, 32], strides = [1, 1]} : vector<8x128xf32> to vector<8x32xf32>
    %131 = arith.negf %130 : vector<8x32xf32>
    %132 = math.exp %131 : vector<8x32xf32>
    %cst_45 = arith.constant 1.000000e+00 : f32
    %133 = vector.broadcast %cst_45 : f32 to vector<8x32xf32>
    %134 = arith.addf %133, %132 : vector<8x32xf32>
    %135 = arith.divf %133, %134 : vector<8x32xf32>
    %136 = arith.mulf %127, %72 : vector<8x32xf32>
    %137 = arith.mulf %121, %129 : vector<8x32xf32>
    %138 = arith.addf %136, %137 : vector<8x32xf32>
    %139 = math.tanh %138 : vector<8x32xf32>
    %140 = arith.mulf %135, %139 : vector<8x32xf32>
    %c1_46 = arith.constant 1 : index
    %c0_47 = arith.constant 0 : index
    %c0_48 = arith.constant 0 : index
    %141 = vector.load %arg12[%c1_46, %c0_47, %c0_48] : memref<8x8x64xf32, #tpu.memory_space<vmem>>, vector<1x8x32xf32>
    %142 = vector.shape_cast %141 : vector<1x8x32xf32> to vector<8x32xf32>
    %143 = vector.shape_cast %115 : vector<8x32xf32> to vector<1x8x32xf32>
    tpu.vector_store %arg12[%c1_46, %c0_47, %c0_48], %143 {strides = array<i32>} : memref<8x8x64xf32, #tpu.memory_space<vmem>>, vector<1x8x32xf32>,
    %c6_49 = arith.constant 6 : index
    %c0_50 = arith.constant 0 : index
    %c32_51 = arith.constant 32 : index
    %144 = vector.load %arg12[%c6_49, %c0_50, %c32_51] : memref<8x8x64xf32, #tpu.memory_space<vmem>>, vector<1x8x32xf32>
    %145 = vector.shape_cast %144 : vector<1x8x32xf32> to vector<8x32xf32>
    %146 = vector.shape_cast %140 : vector<8x32xf32> to vector<1x8x32xf32>
    tpu.vector_store %arg12[%c6_49, %c0_50, %c32_51], %146 {strides = array<i32>} : memref<8x8x64xf32, #tpu.memory_space<vmem>>, vector<1x8x32xf32>,
    %c2 = arith.constant 2 : index
    %c0_52 = arith.constant 0 : index
    %c0_53 = arith.constant 0 : index
    %147 = vector.load %arg11[%c2, %c0_52, %c0_53] : memref<8x8x256xf32, #tpu.memory_space<vmem>>, vector<1x8x256xf32>
    %148 = vector.shape_cast %147 : vector<1x8x256xf32> to vector<8x256xf32>
    %149 = vector.extract_strided_slice %148 {offsets = [0, 0], sizes = [8, 128], strides = [1, 1]} : vector<8x256xf32> to vector<8x128xf32>
    %cst_54 = arith.constant dense<0.000000e+00> : vector<8x128xf32>
    %150 = tpu.matmul %115, %11, %cst_54 {dimension_numbers = #tpu.dot_dimension_numbers<[1], [0], [0], [1], [0, 0, 1, 1], [], []>} : vector<8x32xf32>, vector<32x128xf32>, vector<8x128xf32> -> vector<8x128xf32>
    %151 = arith.addf %149, %150 : vector<8x128xf32>
    %c5 = arith.constant 5 : index
    %c0_55 = arith.constant 0 : index
    %c0_56 = arith.constant 0 : index
    %152 = vector.load %arg11[%c5, %c0_55, %c0_56] : memref<8x8x256xf32, #tpu.memory_space<vmem>>, vector<1x8x256xf32>
    %153 = vector.shape_cast %152 : vector<1x8x256xf32> to vector<8x256xf32>
    %154 = vector.extract_strided_slice %153 {offsets = [0, 128], sizes = [8, 128], strides = [1, 1]} : vector<8x256xf32> to vector<8x128xf32>
    %cst_57 = arith.constant dense<0.000000e+00> : vector<8x128xf32>
    %155 = tpu.matmul %140, %13, %cst_57 {dimension_numbers = #tpu.dot_dimension_numbers<[1], [0], [0], [1], [0, 0, 1, 1], [], []>} : vector<8x32xf32>, vector<32x128xf32>, vector<8x128xf32> -> vector<8x128xf32>
    %156 = arith.addf %154, %155 : vector<8x128xf32>
    %157 = vector.extract_strided_slice %151 {offsets = [0, 0], sizes = [8, 32], strides = [1, 1]} : vector<8x128xf32> to vector<8x32xf32>
    %158 = arith.negf %157 : vector<8x32xf32>
    %159 = math.exp %158 : vector<8x32xf32>
    %cst_58 = arith.constant 1.000000e+00 : f32
    %160 = vector.broadcast %cst_58 : f32 to vector<8x32xf32>
    %161 = arith.addf %160, %159 : vector<8x32xf32>
    %162 = arith.divf %160, %161 : vector<8x32xf32>
    %163 = vector.extract_strided_slice %151 {offsets = [0, 32], sizes = [8, 32], strides = [1, 1]} : vector<8x128xf32> to vector<8x32xf32>
    %164 = arith.negf %163 : vector<8x32xf32>
    %165 = math.exp %164 : vector<8x32xf32>
    %cst_59 = arith.constant 1.000000e+00 : f32
    %166 = vector.broadcast %cst_59 : f32 to vector<8x32xf32>
    %167 = arith.addf %166, %165 : vector<8x32xf32>
    %168 = arith.divf %166, %167 : vector<8x32xf32>
    %169 = vector.extract_strided_slice %151 {offsets = [0, 64], sizes = [8, 32], strides = [1, 1]} : vector<8x128xf32> to vector<8x32xf32>
    %170 = math.tanh %169 : vector<8x32xf32>
    %171 = vector.extract_strided_slice %151 {offsets = [0, 96], sizes = [8, 32], strides = [1, 1]} : vector<8x128xf32> to vector<8x32xf32>
    %172 = arith.negf %171 : vector<8x32xf32>
    %173 = math.exp %172 : vector<8x32xf32>
    %cst_60 = arith.constant 1.000000e+00 : f32
    %174 = vector.broadcast %cst_60 : f32 to vector<8x32xf32>
    %175 = arith.addf %174, %173 : vector<8x32xf32>
    %176 = arith.divf %174, %175 : vector<8x32xf32>
    %177 = arith.mulf %168, %113 : vector<8x32xf32>
    %178 = arith.mulf %162, %170 : vector<8x32xf32>
    %179 = arith.addf %177, %178 : vector<8x32xf32>
    %180 = math.tanh %179 : vector<8x32xf32>
    %181 = arith.mulf %176, %180 : vector<8x32xf32>
    %182 = vector.extract_strided_slice %156 {offsets = [0, 0], sizes = [8, 32], strides = [1, 1]} : vector<8x128xf32> to vector<8x32xf32>
    %183 = arith.negf %182 : vector<8x32xf32>
    %184 = math.exp %183 : vector<8x32xf32>
    %cst_61 = arith.constant 1.000000e+00 : f32
    %185 = vector.broadcast %cst_61 : f32 to vector<8x32xf32>
    %186 = arith.addf %185, %184 : vector<8x32xf32>
    %187 = arith.divf %185, %186 : vector<8x32xf32>
    %188 = vector.extract_strided_slice %156 {offsets = [0, 32], sizes = [8, 32], strides = [1, 1]} : vector<8x128xf32> to vector<8x32xf32>
    %189 = arith.negf %188 : vector<8x32xf32>
    %190 = math.exp %189 : vector<8x32xf32>
    %cst_62 = arith.constant 1.000000e+00 : f32
    %191 = vector.broadcast %cst_62 : f32 to vector<8x32xf32>
    %192 = arith.addf %191, %190 : vector<8x32xf32>
    %193 = arith.divf %191, %192 : vector<8x32xf32>
    %194 = vector.extract_strided_slice %156 {offsets = [0, 64], sizes = [8, 32], strides = [1, 1]} : vector<8x128xf32> to vector<8x32xf32>
    %195 = math.tanh %194 : vector<8x32xf32>
    %196 = vector.extract_strided_slice %156 {offsets = [0, 96], sizes = [8, 32], strides = [1, 1]} : vector<8x128xf32> to vector<8x32xf32>
    %197 = arith.negf %196 : vector<8x32xf32>
    %198 = math.exp %197 : vector<8x32xf32>
    %cst_63 = arith.constant 1.000000e+00 : f32
    %199 = vector.broadcast %cst_63 : f32 to vector<8x32xf32>
    %200 = arith.addf %199, %198 : vector<8x32xf32>
    %201 = arith.divf %199, %200 : vector<8x32xf32>
    %202 = arith.mulf %193, %138 : vector<8x32xf32>
    %203 = arith.mulf %187, %195 : vector<8x32xf32>
    %204 = arith.addf %202, %203 : vector<8x32xf32>
    %205 = math.tanh %204 : vector<8x32xf32>
    %206 = arith.mulf %201, %205 : vector<8x32xf32>
    %c2_64 = arith.constant 2 : index
    %c0_65 = arith.constant 0 : index
    %c0_66 = arith.constant 0 : index
    %207 = vector.load %arg12[%c2_64, %c0_65, %c0_66] : memref<8x8x64xf32, #tpu.memory_space<vmem>>, vector<1x8x32xf32>
    %208 = vector.shape_cast %207 : vector<1x8x32xf32> to vector<8x32xf32>
    %209 = vector.shape_cast %181 : vector<8x32xf32> to vector<1x8x32xf32>
    tpu.vector_store %arg12[%c2_64, %c0_65, %c0_66], %209 {strides = array<i32>} : memref<8x8x64xf32, #tpu.memory_space<vmem>>, vector<1x8x32xf32>,
    %c5_67 = arith.constant 5 : index
    %c0_68 = arith.constant 0 : index
    %c32_69 = arith.constant 32 : index
    %210 = vector.load %arg12[%c5_67, %c0_68, %c32_69] : memref<8x8x64xf32, #tpu.memory_space<vmem>>, vector<1x8x32xf32>
    %211 = vector.shape_cast %210 : vector<1x8x32xf32> to vector<8x32xf32>
    %212 = vector.shape_cast %206 : vector<8x32xf32> to vector<1x8x32xf32>
    tpu.vector_store %arg12[%c5_67, %c0_68, %c32_69], %212 {strides = array<i32>} : memref<8x8x64xf32, #tpu.memory_space<vmem>>, vector<1x8x32xf32>,
    %c3 = arith.constant 3 : index
    %c0_70 = arith.constant 0 : index
    %c0_71 = arith.constant 0 : index
    %213 = vector.load %arg11[%c3, %c0_70, %c0_71] : memref<8x8x256xf32, #tpu.memory_space<vmem>>, vector<1x8x256xf32>
    %214 = vector.shape_cast %213 : vector<1x8x256xf32> to vector<8x256xf32>
    %215 = vector.extract_strided_slice %214 {offsets = [0, 0], sizes = [8, 128], strides = [1, 1]} : vector<8x256xf32> to vector<8x128xf32>
    %cst_72 = arith.constant dense<0.000000e+00> : vector<8x128xf32>
    %216 = tpu.matmul %181, %11, %cst_72 {dimension_numbers = #tpu.dot_dimension_numbers<[1], [0], [0], [1], [0, 0, 1, 1], [], []>} : vector<8x32xf32>, vector<32x128xf32>, vector<8x128xf32> -> vector<8x128xf32>
    %217 = arith.addf %215, %216 : vector<8x128xf32>
    %c4 = arith.constant 4 : index
    %c0_73 = arith.constant 0 : index
    %c0_74 = arith.constant 0 : index
    %218 = vector.load %arg11[%c4, %c0_73, %c0_74] : memref<8x8x256xf32, #tpu.memory_space<vmem>>, vector<1x8x256xf32>
    %219 = vector.shape_cast %218 : vector<1x8x256xf32> to vector<8x256xf32>
    %220 = vector.extract_strided_slice %219 {offsets = [0, 128], sizes = [8, 128], strides = [1, 1]} : vector<8x256xf32> to vector<8x128xf32>
    %cst_75 = arith.constant dense<0.000000e+00> : vector<8x128xf32>
    %221 = tpu.matmul %206, %13, %cst_75 {dimension_numbers = #tpu.dot_dimension_numbers<[1], [0], [0], [1], [0, 0, 1, 1], [], []>} : vector<8x32xf32>, vector<32x128xf32>, vector<8x128xf32> -> vector<8x128xf32>
    %222 = arith.addf %220, %221 : vector<8x128xf32>
    %223 = vector.extract_strided_slice %217 {offsets = [0, 0], sizes = [8, 32], strides = [1, 1]} : vector<8x128xf32> to vector<8x32xf32>
    %224 = arith.negf %223 : vector<8x32xf32>
    %225 = math.exp %224 : vector<8x32xf32>
    %cst_76 = arith.constant 1.000000e+00 : f32
    %226 = vector.broadcast %cst_76 : f32 to vector<8x32xf32>
    %227 = arith.addf %226, %225 : vector<8x32xf32>
    %228 = arith.divf %226, %227 : vector<8x32xf32>
    %229 = vector.extract_strided_slice %217 {offsets = [0, 32], sizes = [8, 32], strides = [1, 1]} : vector<8x128xf32> to vector<8x32xf32>
    %230 = arith.negf %229 : vector<8x32xf32>
    %231 = math.exp %230 : vector<8x32xf32>
    %cst_77 = arith.constant 1.000000e+00 : f32
    %232 = vector.broadcast %cst_77 : f32 to vector<8x32xf32>
    %233 = arith.addf %232, %231 : vector<8x32xf32>
    %234 = arith.divf %232, %233 : vector<8x32xf32>
    %235 = vector.extract_strided_slice %217 {offsets = [0, 64], sizes = [8, 32], strides = [1, 1]} : vector<8x128xf32> to vector<8x32xf32>
    %236 = math.tanh %235 : vector<8x32xf32>
    %237 = vector.extract_strided_slice %217 {offsets = [0, 96], sizes = [8, 32], strides = [1, 1]} : vector<8x128xf32> to vector<8x32xf32>
    %238 = arith.negf %237 : vector<8x32xf32>
    %239 = math.exp %238 : vector<8x32xf32>
    %cst_78 = arith.constant 1.000000e+00 : f32
    %240 = vector.broadcast %cst_78 : f32 to vector<8x32xf32>
    %241 = arith.addf %240, %239 : vector<8x32xf32>
    %242 = arith.divf %240, %241 : vector<8x32xf32>
    %243 = arith.mulf %234, %179 : vector<8x32xf32>
    %244 = arith.mulf %228, %236 : vector<8x32xf32>
    %245 = arith.addf %243, %244 : vector<8x32xf32>
    %246 = math.tanh %245 : vector<8x32xf32>
    %247 = arith.mulf %242, %246 : vector<8x32xf32>
    %248 = vector.extract_strided_slice %222 {offsets = [0, 0], sizes = [8, 32], strides = [1, 1]} : vector<8x128xf32> to vector<8x32xf32>
    %249 = arith.negf %248 : vector<8x32xf32>
    %250 = math.exp %249 : vector<8x32xf32>
    %cst_79 = arith.constant 1.000000e+00 : f32
    %251 = vector.broadcast %cst_79 : f32 to vector<8x32xf32>
    %252 = arith.addf %251, %250 : vector<8x32xf32>
    %253 = arith.divf %251, %252 : vector<8x32xf32>
    %254 = vector.extract_strided_slice %222 {offsets = [0, 32], sizes = [8, 32], strides = [1, 1]} : vector<8x128xf32> to vector<8x32xf32>
    %255 = arith.negf %254 : vector<8x32xf32>
    %256 = math.exp %255 : vector<8x32xf32>
    %cst_80 = arith.constant 1.000000e+00 : f32
    %257 = vector.broadcast %cst_80 : f32 to vector<8x32xf32>
    %258 = arith.addf %257, %256 : vector<8x32xf32>
    %259 = arith.divf %257, %258 : vector<8x32xf32>
    %260 = vector.extract_strided_slice %222 {offsets = [0, 64], sizes = [8, 32], strides = [1, 1]} : vector<8x128xf32> to vector<8x32xf32>
    %261 = math.tanh %260 : vector<8x32xf32>
    %262 = vector.extract_strided_slice %222 {offsets = [0, 96], sizes = [8, 32], strides = [1, 1]} : vector<8x128xf32> to vector<8x32xf32>
    %263 = arith.negf %262 : vector<8x32xf32>
    %264 = math.exp %263 : vector<8x32xf32>
    %cst_81 = arith.constant 1.000000e+00 : f32
    %265 = vector.broadcast %cst_81 : f32 to vector<8x32xf32>
    %266 = arith.addf %265, %264 : vector<8x32xf32>
    %267 = arith.divf %265, %266 : vector<8x32xf32>
    %268 = arith.mulf %259, %204 : vector<8x32xf32>
    %269 = arith.mulf %253, %261 : vector<8x32xf32>
    %270 = arith.addf %268, %269 : vector<8x32xf32>
    %271 = math.tanh %270 : vector<8x32xf32>
    %272 = arith.mulf %267, %271 : vector<8x32xf32>
    %c3_82 = arith.constant 3 : index
    %c0_83 = arith.constant 0 : index
    %c0_84 = arith.constant 0 : index
    %273 = vector.load %arg12[%c3_82, %c0_83, %c0_84] : memref<8x8x64xf32, #tpu.memory_space<vmem>>, vector<1x8x32xf32>
    %274 = vector.shape_cast %273 : vector<1x8x32xf32> to vector<8x32xf32>
    %275 = vector.shape_cast %247 : vector<8x32xf32> to vector<1x8x32xf32>
    tpu.vector_store %arg12[%c3_82, %c0_83, %c0_84], %275 {strides = array<i32>} : memref<8x8x64xf32, #tpu.memory_space<vmem>>, vector<1x8x32xf32>,
    %c4_85 = arith.constant 4 : index
    %c0_86 = arith.constant 0 : index
    %c32_87 = arith.constant 32 : index
    %276 = vector.load %arg12[%c4_85, %c0_86, %c32_87] : memref<8x8x64xf32, #tpu.memory_space<vmem>>, vector<1x8x32xf32>
    %277 = vector.shape_cast %276 : vector<1x8x32xf32> to vector<8x32xf32>
    %278 = vector.shape_cast %272 : vector<8x32xf32> to vector<1x8x32xf32>
    tpu.vector_store %arg12[%c4_85, %c0_86, %c32_87], %278 {strides = array<i32>} : memref<8x8x64xf32, #tpu.memory_space<vmem>>, vector<1x8x32xf32>,
    %c4_88 = arith.constant 4 : index
    %c0_89 = arith.constant 0 : index
    %c0_90 = arith.constant 0 : index
    %279 = vector.load %arg11[%c4_88, %c0_89, %c0_90] : memref<8x8x256xf32, #tpu.memory_space<vmem>>, vector<1x8x256xf32>
    %280 = vector.shape_cast %279 : vector<1x8x256xf32> to vector<8x256xf32>
    %281 = vector.extract_strided_slice %280 {offsets = [0, 0], sizes = [8, 128], strides = [1, 1]} : vector<8x256xf32> to vector<8x128xf32>
    %cst_91 = arith.constant dense<0.000000e+00> : vector<8x128xf32>
    %282 = tpu.matmul %247, %11, %cst_91 {dimension_numbers = #tpu.dot_dimension_numbers<[1], [0], [0], [1], [0, 0, 1, 1], [], []>} : vector<8x32xf32>, vector<32x128xf32>, vector<8x128xf32> -> vector<8x128xf32>
    %283 = arith.addf %281, %282 : vector<8x128xf32>
    %c3_92 = arith.constant 3 : index
    %c0_93 = arith.constant 0 : index
    %c0_94 = arith.constant 0 : index
    %284 = vector.load %arg11[%c3_92, %c0_93, %c0_94] : memref<8x8x256xf32, #tpu.memory_space<vmem>>, vector<1x8x256xf32>
    %285 = vector.shape_cast %284 : vector<1x8x256xf32> to vector<8x256xf32>
    %286 = vector.extract_strided_slice %285 {offsets = [0, 128], sizes = [8, 128], strides = [1, 1]} : vector<8x256xf32> to vector<8x128xf32>
    %cst_95 = arith.constant dense<0.000000e+00> : vector<8x128xf32>
    %287 = tpu.matmul %272, %13, %cst_95 {dimension_numbers = #tpu.dot_dimension_numbers<[1], [0], [0], [1], [0, 0, 1, 1], [], []>} : vector<8x32xf32>, vector<32x128xf32>, vector<8x128xf32> -> vector<8x128xf32>
    %288 = arith.addf %286, %287 : vector<8x128xf32>
    %289 = vector.extract_strided_slice %283 {offsets = [0, 0], sizes = [8, 32], strides = [1, 1]} : vector<8x128xf32> to vector<8x32xf32>
    %290 = arith.negf %289 : vector<8x32xf32>
    %291 = math.exp %290 : vector<8x32xf32>
    %cst_96 = arith.constant 1.000000e+00 : f32
    %292 = vector.broadcast %cst_96 : f32 to vector<8x32xf32>
    %293 = arith.addf %292, %291 : vector<8x32xf32>
    %294 = arith.divf %292, %293 : vector<8x32xf32>
    %295 = vector.extract_strided_slice %283 {offsets = [0, 32], sizes = [8, 32], strides = [1, 1]} : vector<8x128xf32> to vector<8x32xf32>
    %296 = arith.negf %295 : vector<8x32xf32>
    %297 = math.exp %296 : vector<8x32xf32>
    %cst_97 = arith.constant 1.000000e+00 : f32
    %298 = vector.broadcast %cst_97 : f32 to vector<8x32xf32>
    %299 = arith.addf %298, %297 : vector<8x32xf32>
    %300 = arith.divf %298, %299 : vector<8x32xf32>
    %301 = vector.extract_strided_slice %283 {offsets = [0, 64], sizes = [8, 32], strides = [1, 1]} : vector<8x128xf32> to vector<8x32xf32>
    %302 = math.tanh %301 : vector<8x32xf32>
    %303 = vector.extract_strided_slice %283 {offsets = [0, 96], sizes = [8, 32], strides = [1, 1]} : vector<8x128xf32> to vector<8x32xf32>
    %304 = arith.negf %303 : vector<8x32xf32>
    %305 = math.exp %304 : vector<8x32xf32>
    %cst_98 = arith.constant 1.000000e+00 : f32
    %306 = vector.broadcast %cst_98 : f32 to vector<8x32xf32>
    %307 = arith.addf %306, %305 : vector<8x32xf32>
    %308 = arith.divf %306, %307 : vector<8x32xf32>
    %309 = arith.mulf %300, %245 : vector<8x32xf32>
    %310 = arith.mulf %294, %302 : vector<8x32xf32>
    %311 = arith.addf %309, %310 : vector<8x32xf32>
    %312 = math.tanh %311 : vector<8x32xf32>
    %313 = arith.mulf %308, %312 : vector<8x32xf32>
    %314 = vector.extract_strided_slice %288 {offsets = [0, 0], sizes = [8, 32], strides = [1, 1]} : vector<8x128xf32> to vector<8x32xf32>
    %315 = arith.negf %314 : vector<8x32xf32>
    %316 = math.exp %315 : vector<8x32xf32>
    %cst_99 = arith.constant 1.000000e+00 : f32
    %317 = vector.broadcast %cst_99 : f32 to vector<8x32xf32>
    %318 = arith.addf %317, %316 : vector<8x32xf32>
    %319 = arith.divf %317, %318 : vector<8x32xf32>
    %320 = vector.extract_strided_slice %288 {offsets = [0, 32], sizes = [8, 32], strides = [1, 1]} : vector<8x128xf32> to vector<8x32xf32>
    %321 = arith.negf %320 : vector<8x32xf32>
    %322 = math.exp %321 : vector<8x32xf32>
    %cst_100 = arith.constant 1.000000e+00 : f32
    %323 = vector.broadcast %cst_100 : f32 to vector<8x32xf32>
    %324 = arith.addf %323, %322 : vector<8x32xf32>
    %325 = arith.divf %323, %324 : vector<8x32xf32>
    %326 = vector.extract_strided_slice %288 {offsets = [0, 64], sizes = [8, 32], strides = [1, 1]} : vector<8x128xf32> to vector<8x32xf32>
    %327 = math.tanh %326 : vector<8x32xf32>
    %328 = vector.extract_strided_slice %288 {offsets = [0, 96], sizes = [8, 32], strides = [1, 1]} : vector<8x128xf32> to vector<8x32xf32>
    %329 = arith.negf %328 : vector<8x32xf32>
    %330 = math.exp %329 : vector<8x32xf32>
    %cst_101 = arith.constant 1.000000e+00 : f32
    %331 = vector.broadcast %cst_101 : f32 to vector<8x32xf32>
    %332 = arith.addf %331, %330 : vector<8x32xf32>
    %333 = arith.divf %331, %332 : vector<8x32xf32>
    %334 = arith.mulf %325, %270 : vector<8x32xf32>
    %335 = arith.mulf %319, %327 : vector<8x32xf32>
    %336 = arith.addf %334, %335 : vector<8x32xf32>
    %337 = math.tanh %336 : vector<8x32xf32>
    %338 = arith.mulf %333, %337 : vector<8x32xf32>
    %c4_102 = arith.constant 4 : index
    %c0_103 = arith.constant 0 : index
    %c0_104 = arith.constant 0 : index
    %339 = vector.load %arg12[%c4_102, %c0_103, %c0_104] : memref<8x8x64xf32, #tpu.memory_space<vmem>>, vector<1x8x32xf32>
    %340 = vector.shape_cast %339 : vector<1x8x32xf32> to vector<8x32xf32>
    %341 = vector.shape_cast %313 : vector<8x32xf32> to vector<1x8x32xf32>
    tpu.vector_store %arg12[%c4_102, %c0_103, %c0_104], %341 {strides = array<i32>} : memref<8x8x64xf32, #tpu.memory_space<vmem>>, vector<1x8x32xf32>,
    %c3_105 = arith.constant 3 : index
    %c0_106 = arith.constant 0 : index
    %c32_107 = arith.constant 32 : index
    %342 = vector.load %arg12[%c3_105, %c0_106, %c32_107] : memref<8x8x64xf32, #tpu.memory_space<vmem>>, vector<1x8x32xf32>
    %343 = vector.shape_cast %342 : vector<1x8x32xf32> to vector<8x32xf32>
    %344 = vector.shape_cast %338 : vector<8x32xf32> to vector<1x8x32xf32>
    tpu.vector_store %arg12[%c3_105, %c0_106, %c32_107], %344 {strides = array<i32>} : memref<8x8x64xf32, #tpu.memory_space<vmem>>, vector<1x8x32xf32>,
    %c5_108 = arith.constant 5 : index
    %c0_109 = arith.constant 0 : index
    %c0_110 = arith.constant 0 : index
    %345 = vector.load %arg11[%c5_108, %c0_109, %c0_110] : memref<8x8x256xf32, #tpu.memory_space<vmem>>, vector<1x8x256xf32>
    %346 = vector.shape_cast %345 : vector<1x8x256xf32> to vector<8x256xf32>
    %347 = vector.extract_strided_slice %346 {offsets = [0, 0], sizes = [8, 128], strides = [1, 1]} : vector<8x256xf32> to vector<8x128xf32>
    %cst_111 = arith.constant dense<0.000000e+00> : vector<8x128xf32>
    %348 = tpu.matmul %313, %11, %cst_111 {dimension_numbers = #tpu.dot_dimension_numbers<[1], [0], [0], [1], [0, 0, 1, 1], [], []>} : vector<8x32xf32>, vector<32x128xf32>, vector<8x128xf32> -> vector<8x128xf32>
    %349 = arith.addf %347, %348 : vector<8x128xf32>
    %c2_112 = arith.constant 2 : index
    %c0_113 = arith.constant 0 : index
    %c0_114 = arith.constant 0 : index
    %350 = vector.load %arg11[%c2_112, %c0_113, %c0_114] : memref<8x8x256xf32, #tpu.memory_space<vmem>>, vector<1x8x256xf32>
    %351 = vector.shape_cast %350 : vector<1x8x256xf32> to vector<8x256xf32>
    %352 = vector.extract_strided_slice %351 {offsets = [0, 128], sizes = [8, 128], strides = [1, 1]} : vector<8x256xf32> to vector<8x128xf32>
    %cst_115 = arith.constant dense<0.000000e+00> : vector<8x128xf32>
    %353 = tpu.matmul %338, %13, %cst_115 {dimension_numbers = #tpu.dot_dimension_numbers<[1], [0], [0], [1], [0, 0, 1, 1], [], []>} : vector<8x32xf32>, vector<32x128xf32>, vector<8x128xf32> -> vector<8x128xf32>
    %354 = arith.addf %352, %353 : vector<8x128xf32>
    %355 = vector.extract_strided_slice %349 {offsets = [0, 0], sizes = [8, 32], strides = [1, 1]} : vector<8x128xf32> to vector<8x32xf32>
    %356 = arith.negf %355 : vector<8x32xf32>
    %357 = math.exp %356 : vector<8x32xf32>
    %cst_116 = arith.constant 1.000000e+00 : f32
    %358 = vector.broadcast %cst_116 : f32 to vector<8x32xf32>
    %359 = arith.addf %358, %357 : vector<8x32xf32>
    %360 = arith.divf %358, %359 : vector<8x32xf32>
    %361 = vector.extract_strided_slice %349 {offsets = [0, 32], sizes = [8, 32], strides = [1, 1]} : vector<8x128xf32> to vector<8x32xf32>
    %362 = arith.negf %361 : vector<8x32xf32>
    %363 = math.exp %362 : vector<8x32xf32>
    %cst_117 = arith.constant 1.000000e+00 : f32
    %364 = vector.broadcast %cst_117 : f32 to vector<8x32xf32>
    %365 = arith.addf %364, %363 : vector<8x32xf32>
    %366 = arith.divf %364, %365 : vector<8x32xf32>
    %367 = vector.extract_strided_slice %349 {offsets = [0, 64], sizes = [8, 32], strides = [1, 1]} : vector<8x128xf32> to vector<8x32xf32>
    %368 = math.tanh %367 : vector<8x32xf32>
    %369 = vector.extract_strided_slice %349 {offsets = [0, 96], sizes = [8, 32], strides = [1, 1]} : vector<8x128xf32> to vector<8x32xf32>
    %370 = arith.negf %369 : vector<8x32xf32>
    %371 = math.exp %370 : vector<8x32xf32>
    %cst_118 = arith.constant 1.000000e+00 : f32
    %372 = vector.broadcast %cst_118 : f32 to vector<8x32xf32>
    %373 = arith.addf %372, %371 : vector<8x32xf32>
    %374 = arith.divf %372, %373 : vector<8x32xf32>
    %375 = arith.mulf %366, %311 : vector<8x32xf32>
    %376 = arith.mulf %360, %368 : vector<8x32xf32>
    %377 = arith.addf %375, %376 : vector<8x32xf32>
    %378 = math.tanh %377 : vector<8x32xf32>
    %379 = arith.mulf %374, %378 : vector<8x32xf32>
    %380 = vector.extract_strided_slice %354 {offsets = [0, 0], sizes = [8, 32], strides = [1, 1]} : vector<8x128xf32> to vector<8x32xf32>
    %381 = arith.negf %380 : vector<8x32xf32>
    %382 = math.exp %381 : vector<8x32xf32>
    %cst_119 = arith.constant 1.000000e+00 : f32
    %383 = vector.broadcast %cst_119 : f32 to vector<8x32xf32>
    %384 = arith.addf %383, %382 : vector<8x32xf32>
    %385 = arith.divf %383, %384 : vector<8x32xf32>
    %386 = vector.extract_strided_slice %354 {offsets = [0, 32], sizes = [8, 32], strides = [1, 1]} : vector<8x128xf32> to vector<8x32xf32>
    %387 = arith.negf %386 : vector<8x32xf32>
    %388 = math.exp %387 : vector<8x32xf32>
    %cst_120 = arith.constant 1.000000e+00 : f32
    %389 = vector.broadcast %cst_120 : f32 to vector<8x32xf32>
    %390 = arith.addf %389, %388 : vector<8x32xf32>
    %391 = arith.divf %389, %390 : vector<8x32xf32>
    %392 = vector.extract_strided_slice %354 {offsets = [0, 64], sizes = [8, 32], strides = [1, 1]} : vector<8x128xf32> to vector<8x32xf32>
    %393 = math.tanh %392 : vector<8x32xf32>
    %394 = vector.extract_strided_slice %354 {offsets = [0, 96], sizes = [8, 32], strides = [1, 1]} : vector<8x128xf32> to vector<8x32xf32>
    %395 = arith.negf %394 : vector<8x32xf32>
    %396 = math.exp %395 : vector<8x32xf32>
    %cst_121 = arith.constant 1.000000e+00 : f32
    %397 = vector.broadcast %cst_121 : f32 to vector<8x32xf32>
    %398 = arith.addf %397, %396 : vector<8x32xf32>
    %399 = arith.divf %397, %398 : vector<8x32xf32>
    %400 = arith.mulf %391, %336 : vector<8x32xf32>
    %401 = arith.mulf %385, %393 : vector<8x32xf32>
    %402 = arith.addf %400, %401 : vector<8x32xf32>
    %403 = math.tanh %402 : vector<8x32xf32>
    %404 = arith.mulf %399, %403 : vector<8x32xf32>
    %c5_122 = arith.constant 5 : index
    %c0_123 = arith.constant 0 : index
    %c0_124 = arith.constant 0 : index
    %405 = vector.load %arg12[%c5_122, %c0_123, %c0_124] : memref<8x8x64xf32, #tpu.memory_space<vmem>>, vector<1x8x32xf32>
    %406 = vector.shape_cast %405 : vector<1x8x32xf32> to vector<8x32xf32>
    %407 = vector.shape_cast %379 : vector<8x32xf32> to vector<1x8x32xf32>
    tpu.vector_store %arg12[%c5_122, %c0_123, %c0_124], %407 {strides = array<i32>} : memref<8x8x64xf32, #tpu.memory_space<vmem>>, vector<1x8x32xf32>,
    %c2_125 = arith.constant 2 : index
    %c0_126 = arith.constant 0 : index
    %c32_127 = arith.constant 32 : index
    %408 = vector.load %arg12[%c2_125, %c0_126, %c32_127] : memref<8x8x64xf32, #tpu.memory_space<vmem>>, vector<1x8x32xf32>
    %409 = vector.shape_cast %408 : vector<1x8x32xf32> to vector<8x32xf32>
    %410 = vector.shape_cast %404 : vector<8x32xf32> to vector<1x8x32xf32>
    tpu.vector_store %arg12[%c2_125, %c0_126, %c32_127], %410 {strides = array<i32>} : memref<8x8x64xf32, #tpu.memory_space<vmem>>, vector<1x8x32xf32>,
    %c6_128 = arith.constant 6 : index
    %c0_129 = arith.constant 0 : index
    %c0_130 = arith.constant 0 : index
    %411 = vector.load %arg11[%c6_128, %c0_129, %c0_130] : memref<8x8x256xf32, #tpu.memory_space<vmem>>, vector<1x8x256xf32>
    %412 = vector.shape_cast %411 : vector<1x8x256xf32> to vector<8x256xf32>
    %413 = vector.extract_strided_slice %412 {offsets = [0, 0], sizes = [8, 128], strides = [1, 1]} : vector<8x256xf32> to vector<8x128xf32>
    %cst_131 = arith.constant dense<0.000000e+00> : vector<8x128xf32>
    %414 = tpu.matmul %379, %11, %cst_131 {dimension_numbers = #tpu.dot_dimension_numbers<[1], [0], [0], [1], [0, 0, 1, 1], [], []>} : vector<8x32xf32>, vector<32x128xf32>, vector<8x128xf32> -> vector<8x128xf32>
    %415 = arith.addf %413, %414 : vector<8x128xf32>
    %c1_132 = arith.constant 1 : index
    %c0_133 = arith.constant 0 : index
    %c0_134 = arith.constant 0 : index
    %416 = vector.load %arg11[%c1_132, %c0_133, %c0_134] : memref<8x8x256xf32, #tpu.memory_space<vmem>>, vector<1x8x256xf32>
    %417 = vector.shape_cast %416 : vector<1x8x256xf32> to vector<8x256xf32>
    %418 = vector.extract_strided_slice %417 {offsets = [0, 128], sizes = [8, 128], strides = [1, 1]} : vector<8x256xf32> to vector<8x128xf32>
    %cst_135 = arith.constant dense<0.000000e+00> : vector<8x128xf32>
    %419 = tpu.matmul %404, %13, %cst_135 {dimension_numbers = #tpu.dot_dimension_numbers<[1], [0], [0], [1], [0, 0, 1, 1], [], []>} : vector<8x32xf32>, vector<32x128xf32>, vector<8x128xf32> -> vector<8x128xf32>
    %420 = arith.addf %418, %419 : vector<8x128xf32>
    %421 = vector.extract_strided_slice %415 {offsets = [0, 0], sizes = [8, 32], strides = [1, 1]} : vector<8x128xf32> to vector<8x32xf32>
    %422 = arith.negf %421 : vector<8x32xf32>
    %423 = math.exp %422 : vector<8x32xf32>
    %cst_136 = arith.constant 1.000000e+00 : f32
    %424 = vector.broadcast %cst_136 : f32 to vector<8x32xf32>
    %425 = arith.addf %424, %423 : vector<8x32xf32>
    %426 = arith.divf %424, %425 : vector<8x32xf32>
    %427 = vector.extract_strided_slice %415 {offsets = [0, 32], sizes = [8, 32], strides = [1, 1]} : vector<8x128xf32> to vector<8x32xf32>
    %428 = arith.negf %427 : vector<8x32xf32>
    %429 = math.exp %428 : vector<8x32xf32>
    %cst_137 = arith.constant 1.000000e+00 : f32
    %430 = vector.broadcast %cst_137 : f32 to vector<8x32xf32>
    %431 = arith.addf %430, %429 : vector<8x32xf32>
    %432 = arith.divf %430, %431 : vector<8x32xf32>
    %433 = vector.extract_strided_slice %415 {offsets = [0, 64], sizes = [8, 32], strides = [1, 1]} : vector<8x128xf32> to vector<8x32xf32>
    %434 = math.tanh %433 : vector<8x32xf32>
    %435 = vector.extract_strided_slice %415 {offsets = [0, 96], sizes = [8, 32], strides = [1, 1]} : vector<8x128xf32> to vector<8x32xf32>
    %436 = arith.negf %435 : vector<8x32xf32>
    %437 = math.exp %436 : vector<8x32xf32>
    %cst_138 = arith.constant 1.000000e+00 : f32
    %438 = vector.broadcast %cst_138 : f32 to vector<8x32xf32>
    %439 = arith.addf %438, %437 : vector<8x32xf32>
    %440 = arith.divf %438, %439 : vector<8x32xf32>
    %441 = arith.mulf %432, %377 : vector<8x32xf32>
    %442 = arith.mulf %426, %434 : vector<8x32xf32>
    %443 = arith.addf %441, %442 : vector<8x32xf32>
    %444 = math.tanh %443 : vector<8x32xf32>
    %445 = arith.mulf %440, %444 : vector<8x32xf32>
    %446 = vector.extract_strided_slice %420 {offsets = [0, 0], sizes = [8, 32], strides = [1, 1]} : vector<8x128xf32> to vector<8x32xf32>
    %447 = arith.negf %446 : vector<8x32xf32>
    %448 = math.exp %447 : vector<8x32xf32>
    %cst_139 = arith.constant 1.000000e+00 : f32
    %449 = vector.broadcast %cst_139 : f32 to vector<8x32xf32>
    %450 = arith.addf %449, %448 : vector<8x32xf32>
    %451 = arith.divf %449, %450 : vector<8x32xf32>
    %452 = vector.extract_strided_slice %420 {offsets = [0, 32], sizes = [8, 32], strides = [1, 1]} : vector<8x128xf32> to vector<8x32xf32>
    %453 = arith.negf %452 : vector<8x32xf32>
    %454 = math.exp %453 : vector<8x32xf32>
    %cst_140 = arith.constant 1.000000e+00 : f32
    %455 = vector.broadcast %cst_140 : f32 to vector<8x32xf32>
    %456 = arith.addf %455, %454 : vector<8x32xf32>
    %457 = arith.divf %455, %456 : vector<8x32xf32>
    %458 = vector.extract_strided_slice %420 {offsets = [0, 64], sizes = [8, 32], strides = [1, 1]} : vector<8x128xf32> to vector<8x32xf32>
    %459 = math.tanh %458 : vector<8x32xf32>
    %460 = vector.extract_strided_slice %420 {offsets = [0, 96], sizes = [8, 32], strides = [1, 1]} : vector<8x128xf32> to vector<8x32xf32>
    %461 = arith.negf %460 : vector<8x32xf32>
    %462 = math.exp %461 : vector<8x32xf32>
    %cst_141 = arith.constant 1.000000e+00 : f32
    %463 = vector.broadcast %cst_141 : f32 to vector<8x32xf32>
    %464 = arith.addf %463, %462 : vector<8x32xf32>
    %465 = arith.divf %463, %464 : vector<8x32xf32>
    %466 = arith.mulf %457, %402 : vector<8x32xf32>
    %467 = arith.mulf %451, %459 : vector<8x32xf32>
    %468 = arith.addf %466, %467 : vector<8x32xf32>
    %469 = math.tanh %468 : vector<8x32xf32>
    %470 = arith.mulf %465, %469 : vector<8x32xf32>
    %c6_142 = arith.constant 6 : index
    %c0_143 = arith.constant 0 : index
    %c0_144 = arith.constant 0 : index
    %471 = vector.load %arg12[%c6_142, %c0_143, %c0_144] : memref<8x8x64xf32, #tpu.memory_space<vmem>>, vector<1x8x32xf32>
    %472 = vector.shape_cast %471 : vector<1x8x32xf32> to vector<8x32xf32>
    %473 = vector.shape_cast %445 : vector<8x32xf32> to vector<1x8x32xf32>
    tpu.vector_store %arg12[%c6_142, %c0_143, %c0_144], %473 {strides = array<i32>} : memref<8x8x64xf32, #tpu.memory_space<vmem>>, vector<1x8x32xf32>,
    %c1_145 = arith.constant 1 : index
    %c0_146 = arith.constant 0 : index
    %c32_147 = arith.constant 32 : index
    %474 = vector.load %arg12[%c1_145, %c0_146, %c32_147] : memref<8x8x64xf32, #tpu.memory_space<vmem>>, vector<1x8x32xf32>
    %475 = vector.shape_cast %474 : vector<1x8x32xf32> to vector<8x32xf32>
    %476 = vector.shape_cast %470 : vector<8x32xf32> to vector<1x8x32xf32>
    tpu.vector_store %arg12[%c1_145, %c0_146, %c32_147], %476 {strides = array<i32>} : memref<8x8x64xf32, #tpu.memory_space<vmem>>, vector<1x8x32xf32>,
    %c7_148 = arith.constant 7 : index
    %c0_149 = arith.constant 0 : index
    %c0_150 = arith.constant 0 : index
    %477 = vector.load %arg11[%c7_148, %c0_149, %c0_150] : memref<8x8x256xf32, #tpu.memory_space<vmem>>, vector<1x8x256xf32>
    %478 = vector.shape_cast %477 : vector<1x8x256xf32> to vector<8x256xf32>
    %479 = vector.extract_strided_slice %478 {offsets = [0, 0], sizes = [8, 128], strides = [1, 1]} : vector<8x256xf32> to vector<8x128xf32>
    %cst_151 = arith.constant dense<0.000000e+00> : vector<8x128xf32>
    %480 = tpu.matmul %445, %11, %cst_151 {dimension_numbers = #tpu.dot_dimension_numbers<[1], [0], [0], [1], [0, 0, 1, 1], [], []>} : vector<8x32xf32>, vector<32x128xf32>, vector<8x128xf32> -> vector<8x128xf32>
    %481 = arith.addf %479, %480 : vector<8x128xf32>
    %c0_152 = arith.constant 0 : index
    %c0_153 = arith.constant 0 : index
    %c0_154 = arith.constant 0 : index
    %482 = vector.load %arg11[%c0_152, %c0_153, %c0_154] : memref<8x8x256xf32, #tpu.memory_space<vmem>>, vector<1x8x256xf32>
    %483 = vector.shape_cast %482 : vector<1x8x256xf32> to vector<8x256xf32>
    %484 = vector.extract_strided_slice %483 {offsets = [0, 128], sizes = [8, 128], strides = [1, 1]} : vector<8x256xf32> to vector<8x128xf32>
    %cst_155 = arith.constant dense<0.000000e+00> : vector<8x128xf32>
    %485 = tpu.matmul %470, %13, %cst_155 {dimension_numbers = #tpu.dot_dimension_numbers<[1], [0], [0], [1], [0, 0, 1, 1], [], []>} : vector<8x32xf32>, vector<32x128xf32>, vector<8x128xf32> -> vector<8x128xf32>
    %486 = arith.addf %484, %485 : vector<8x128xf32>
    %487 = vector.extract_strided_slice %481 {offsets = [0, 0], sizes = [8, 32], strides = [1, 1]} : vector<8x128xf32> to vector<8x32xf32>
    %488 = arith.negf %487 : vector<8x32xf32>
    %489 = math.exp %488 : vector<8x32xf32>
    %cst_156 = arith.constant 1.000000e+00 : f32
    %490 = vector.broadcast %cst_156 : f32 to vector<8x32xf32>
    %491 = arith.addf %490, %489 : vector<8x32xf32>
    %492 = arith.divf %490, %491 : vector<8x32xf32>
    %493 = vector.extract_strided_slice %481 {offsets = [0, 32], sizes = [8, 32], strides = [1, 1]} : vector<8x128xf32> to vector<8x32xf32>
    %494 = arith.negf %493 : vector<8x32xf32>
    %495 = math.exp %494 : vector<8x32xf32>
    %cst_157 = arith.constant 1.000000e+00 : f32
    %496 = vector.broadcast %cst_157 : f32 to vector<8x32xf32>
    %497 = arith.addf %496, %495 : vector<8x32xf32>
    %498 = arith.divf %496, %497 : vector<8x32xf32>
    %499 = vector.extract_strided_slice %481 {offsets = [0, 64], sizes = [8, 32], strides = [1, 1]} : vector<8x128xf32> to vector<8x32xf32>
    %500 = math.tanh %499 : vector<8x32xf32>
    %501 = vector.extract_strided_slice %481 {offsets = [0, 96], sizes = [8, 32], strides = [1, 1]} : vector<8x128xf32> to vector<8x32xf32>
    %502 = arith.negf %501 : vector<8x32xf32>
    %503 = math.exp %502 : vector<8x32xf32>
    %cst_158 = arith.constant 1.000000e+00 : f32
    %504 = vector.broadcast %cst_158 : f32 to vector<8x32xf32>
    %505 = arith.addf %504, %503 : vector<8x32xf32>
    %506 = arith.divf %504, %505 : vector<8x32xf32>
    %507 = arith.mulf %498, %443 : vector<8x32xf32>
    %508 = arith.mulf %492, %500 : vector<8x32xf32>
    %509 = arith.addf %507, %508 : vector<8x32xf32>
    %510 = math.tanh %509 : vector<8x32xf32>
    %511 = arith.mulf %506, %510 : vector<8x32xf32>
    %512 = vector.extract_strided_slice %486 {offsets = [0, 0], sizes = [8, 32], strides = [1, 1]} : vector<8x128xf32> to vector<8x32xf32>
    %513 = arith.negf %512 : vector<8x32xf32>
    %514 = math.exp %513 : vector<8x32xf32>
    %cst_159 = arith.constant 1.000000e+00 : f32
    %515 = vector.broadcast %cst_159 : f32 to vector<8x32xf32>
    %516 = arith.addf %515, %514 : vector<8x32xf32>
    %517 = arith.divf %515, %516 : vector<8x32xf32>
    %518 = vector.extract_strided_slice %486 {offsets = [0, 32], sizes = [8, 32], strides = [1, 1]} : vector<8x128xf32> to vector<8x32xf32>
    %519 = arith.negf %518 : vector<8x32xf32>
    %520 = math.exp %519 : vector<8x32xf32>
    %cst_160 = arith.constant 1.000000e+00 : f32
    %521 = vector.broadcast %cst_160 : f32 to vector<8x32xf32>
    %522 = arith.addf %521, %520 : vector<8x32xf32>
    %523 = arith.divf %521, %522 : vector<8x32xf32>
    %524 = vector.extract_strided_slice %486 {offsets = [0, 64], sizes = [8, 32], strides = [1, 1]} : vector<8x128xf32> to vector<8x32xf32>
    %525 = math.tanh %524 : vector<8x32xf32>
    %526 = vector.extract_strided_slice %486 {offsets = [0, 96], sizes = [8, 32], strides = [1, 1]} : vector<8x128xf32> to vector<8x32xf32>
    %527 = arith.negf %526 : vector<8x32xf32>
    %528 = math.exp %527 : vector<8x32xf32>
    %cst_161 = arith.constant 1.000000e+00 : f32
    %529 = vector.broadcast %cst_161 : f32 to vector<8x32xf32>
    %530 = arith.addf %529, %528 : vector<8x32xf32>
    %531 = arith.divf %529, %530 : vector<8x32xf32>
    %532 = arith.mulf %523, %468 : vector<8x32xf32>
    %533 = arith.mulf %517, %525 : vector<8x32xf32>
    %534 = arith.addf %532, %533 : vector<8x32xf32>
    %535 = math.tanh %534 : vector<8x32xf32>
    %536 = arith.mulf %531, %535 : vector<8x32xf32>
    %c7_162 = arith.constant 7 : index
    %c0_163 = arith.constant 0 : index
    %c0_164 = arith.constant 0 : index
    %537 = vector.load %arg12[%c7_162, %c0_163, %c0_164] : memref<8x8x64xf32, #tpu.memory_space<vmem>>, vector<1x8x32xf32>
    %538 = vector.shape_cast %537 : vector<1x8x32xf32> to vector<8x32xf32>
    %539 = vector.shape_cast %511 : vector<8x32xf32> to vector<1x8x32xf32>
    tpu.vector_store %arg12[%c7_162, %c0_163, %c0_164], %539 {strides = array<i32>} : memref<8x8x64xf32, #tpu.memory_space<vmem>>, vector<1x8x32xf32>,
    %c0_165 = arith.constant 0 : index
    %c0_166 = arith.constant 0 : index
    %c32_167 = arith.constant 32 : index
    %540 = vector.load %arg12[%c0_165, %c0_166, %c32_167] : memref<8x8x64xf32, #tpu.memory_space<vmem>>, vector<1x8x32xf32>
    %541 = vector.shape_cast %540 : vector<1x8x32xf32> to vector<8x32xf32>
    %542 = vector.shape_cast %536 : vector<8x32xf32> to vector<1x8x32xf32>
    tpu.vector_store %arg12[%c0_165, %c0_166, %c32_167], %542 {strides = array<i32>} : memref<8x8x64xf32, #tpu.memory_space<vmem>>, vector<1x8x32xf32>,
    %c0_168 = arith.constant 0 : index
    %c0_169 = arith.constant 0 : index
    %c0_170 = arith.constant 0 : index
    %543 = vector.load %arg12[%c0_168, %c0_169, %c0_170] : memref<8x8x64xf32, #tpu.memory_space<vmem>>, vector<8x8x64xf32>
    %544 = vector.shape_cast %543 : vector<8x8x64xf32> to vector<64x64xf32>
    %c0_171 = arith.constant 0 : index
    %c0_172 = arith.constant 0 : index
    %545 = vector.load %arg5[%c0_171, %c0_172] : memref<64x256xf32, #tpu.memory_space<vmem>>, vector<64x256xf32>
    %cst_173 = arith.constant dense<0.000000e+00> : vector<64x256xf32>
    %546 = tpu.matmul %544, %545, %cst_173 {dimension_numbers = #tpu.dot_dimension_numbers<[1], [0], [0], [1], [0, 0, 1, 1], [], []>} : vector<64x64xf32>, vector<64x256xf32>, vector<64x256xf32> -> vector<64x256xf32>
    %c0_174 = arith.constant 0 : index
    %c0_175 = arith.constant 0 : index
    %547 = vector.load %arg7[%c0_174, %c0_175] : memref<1x256xf32, #tpu.memory_space<vmem>>, vector<1x256xf32>
    %548 = vector.broadcast %547 : vector<1x256xf32> to vector<64x256xf32>
    %549 = arith.addf %546, %548 : vector<64x256xf32>
    %550 = vector.shape_cast %549 : vector<64x256xf32> to vector<8x8x256xf32>
    %c0_176 = arith.constant 0 : index
    %c0_177 = arith.constant 0 : index
    %c0_178 = arith.constant 0 : index
    %551 = vector.load %arg11[%c0_176, %c0_177, %c0_178] : memref<8x8x256xf32, #tpu.memory_space<vmem>>, vector<8x8x256xf32>
    tpu.vector_store %arg11[%c0_176, %c0_177, %c0_178], %550 {strides = array<i32>} : memref<8x8x256xf32, #tpu.memory_space<vmem>>, vector<8x8x256xf32>,
    %c0_179 = arith.constant 0 : index
    %c0_180 = arith.constant 0 : index
    %c0_181 = arith.constant 0 : index
    %552 = vector.load %arg6[%c0_179, %c0_180, %c0_181] : memref<2x32x128xf32, #tpu.memory_space<vmem>>, vector<1x32x128xf32>
    %553 = vector.shape_cast %552 : vector<1x32x128xf32> to vector<32x128xf32>
    %c1_182 = arith.constant 1 : index
    %c0_183 = arith.constant 0 : index
    %c0_184 = arith.constant 0 : index
    %554 = vector.load %arg6[%c1_182, %c0_183, %c0_184] : memref<2x32x128xf32, #tpu.memory_space<vmem>>, vector<1x32x128xf32>
    %555 = vector.shape_cast %554 : vector<1x32x128xf32> to vector<32x128xf32>
    %c0_185 = arith.constant 0 : index
    %c0_186 = arith.constant 0 : index
    %c0_187 = arith.constant 0 : index
    %556 = vector.load %arg11[%c0_185, %c0_186, %c0_187] : memref<8x8x256xf32, #tpu.memory_space<vmem>>, vector<1x8x256xf32>
    %557 = vector.shape_cast %556 : vector<1x8x256xf32> to vector<8x256xf32>
    %558 = vector.extract_strided_slice %557 {offsets = [0, 0], sizes = [8, 128], strides = [1, 1]} : vector<8x256xf32> to vector<8x128xf32>
    %cst_188 = arith.constant dense<0.000000e+00> : vector<8x128xf32>
    %559 = tpu.matmul %14, %553, %cst_188 {dimension_numbers = #tpu.dot_dimension_numbers<[1], [0], [0], [1], [0, 0, 1, 1], [], []>} : vector<8x32xf32>, vector<32x128xf32>, vector<8x128xf32> -> vector<8x128xf32>
    %560 = arith.addf %558, %559 : vector<8x128xf32>
    %c7_189 = arith.constant 7 : index
    %c0_190 = arith.constant 0 : index
    %c0_191 = arith.constant 0 : index
    %561 = vector.load %arg11[%c7_189, %c0_190, %c0_191] : memref<8x8x256xf32, #tpu.memory_space<vmem>>, vector<1x8x256xf32>
    %562 = vector.shape_cast %561 : vector<1x8x256xf32> to vector<8x256xf32>
    %563 = vector.extract_strided_slice %562 {offsets = [0, 128], sizes = [8, 128], strides = [1, 1]} : vector<8x256xf32> to vector<8x128xf32>
    %cst_192 = arith.constant dense<0.000000e+00> : vector<8x128xf32>
    %564 = tpu.matmul %14, %555, %cst_192 {dimension_numbers = #tpu.dot_dimension_numbers<[1], [0], [0], [1], [0, 0, 1, 1], [], []>} : vector<8x32xf32>, vector<32x128xf32>, vector<8x128xf32> -> vector<8x128xf32>
    %565 = arith.addf %563, %564 : vector<8x128xf32>
    %566 = vector.extract_strided_slice %560 {offsets = [0, 0], sizes = [8, 32], strides = [1, 1]} : vector<8x128xf32> to vector<8x32xf32>
    %567 = arith.negf %566 : vector<8x32xf32>
    %568 = math.exp %567 : vector<8x32xf32>
    %cst_193 = arith.constant 1.000000e+00 : f32
    %569 = vector.broadcast %cst_193 : f32 to vector<8x32xf32>
    %570 = arith.addf %569, %568 : vector<8x32xf32>
    %571 = arith.divf %569, %570 : vector<8x32xf32>
    %572 = vector.extract_strided_slice %560 {offsets = [0, 32], sizes = [8, 32], strides = [1, 1]} : vector<8x128xf32> to vector<8x32xf32>
    %573 = arith.negf %572 : vector<8x32xf32>
    %574 = math.exp %573 : vector<8x32xf32>
    %cst_194 = arith.constant 1.000000e+00 : f32
    %575 = vector.broadcast %cst_194 : f32 to vector<8x32xf32>
    %576 = arith.addf %575, %574 : vector<8x32xf32>
    %577 = arith.divf %575, %576 : vector<8x32xf32>
    %578 = vector.extract_strided_slice %560 {offsets = [0, 64], sizes = [8, 32], strides = [1, 1]} : vector<8x128xf32> to vector<8x32xf32>
    %579 = math.tanh %578 : vector<8x32xf32>
    %580 = vector.extract_strided_slice %560 {offsets = [0, 96], sizes = [8, 32], strides = [1, 1]} : vector<8x128xf32> to vector<8x32xf32>
    %581 = arith.negf %580 : vector<8x32xf32>
    %582 = math.exp %581 : vector<8x32xf32>
    %cst_195 = arith.constant 1.000000e+00 : f32
    %583 = vector.broadcast %cst_195 : f32 to vector<8x32xf32>
    %584 = arith.addf %583, %582 : vector<8x32xf32>
    %585 = arith.divf %583, %584 : vector<8x32xf32>
    %586 = arith.mulf %577, %14 : vector<8x32xf32>
    %587 = arith.mulf %571, %579 : vector<8x32xf32>
    %588 = arith.addf %586, %587 : vector<8x32xf32>
    %589 = math.tanh %588 : vector<8x32xf32>
    %590 = arith.mulf %585, %589 : vector<8x32xf32>
    %591 = vector.extract_strided_slice %565 {offsets = [0, 0], sizes = [8, 32], strides = [1, 1]} : vector<8x128xf32> to vector<8x32xf32>
    %592 = arith.negf %591 : vector<8x32xf32>
    %593 = math.exp %592 : vector<8x32xf32>
    %cst_196 = arith.constant 1.000000e+00 : f32
    %594 = vector.broadcast %cst_196 : f32 to vector<8x32xf32>
    %595 = arith.addf %594, %593 : vector<8x32xf32>
    %596 = arith.divf %594, %595 : vector<8x32xf32>
    %597 = vector.extract_strided_slice %565 {offsets = [0, 32], sizes = [8, 32], strides = [1, 1]} : vector<8x128xf32> to vector<8x32xf32>
    %598 = arith.negf %597 : vector<8x32xf32>
    %599 = math.exp %598 : vector<8x32xf32>
    %cst_197 = arith.constant 1.000000e+00 : f32
    %600 = vector.broadcast %cst_197 : f32 to vector<8x32xf32>
    %601 = arith.addf %600, %599 : vector<8x32xf32>
    %602 = arith.divf %600, %601 : vector<8x32xf32>
    %603 = vector.extract_strided_slice %565 {offsets = [0, 64], sizes = [8, 32], strides = [1, 1]} : vector<8x128xf32> to vector<8x32xf32>
    %604 = math.tanh %603 : vector<8x32xf32>
    %605 = vector.extract_strided_slice %565 {offsets = [0, 96], sizes = [8, 32], strides = [1, 1]} : vector<8x128xf32> to vector<8x32xf32>
    %606 = arith.negf %605 : vector<8x32xf32>
    %607 = math.exp %606 : vector<8x32xf32>
    %cst_198 = arith.constant 1.000000e+00 : f32
    %608 = vector.broadcast %cst_198 : f32 to vector<8x32xf32>
    %609 = arith.addf %608, %607 : vector<8x32xf32>
    %610 = arith.divf %608, %609 : vector<8x32xf32>
    %611 = arith.mulf %602, %14 : vector<8x32xf32>
    %612 = arith.mulf %596, %604 : vector<8x32xf32>
    %613 = arith.addf %611, %612 : vector<8x32xf32>
    %614 = math.tanh %613 : vector<8x32xf32>
    %615 = arith.mulf %610, %614 : vector<8x32xf32>
    %c1_199 = arith.constant 1 : index
    %c0_200 = arith.constant 0 : index
    %c0_201 = arith.constant 0 : index
    %616 = vector.load %arg11[%c1_199, %c0_200, %c0_201] : memref<8x8x256xf32, #tpu.memory_space<vmem>>, vector<1x8x256xf32>
    %617 = vector.shape_cast %616 : vector<1x8x256xf32> to vector<8x256xf32>
    %618 = vector.extract_strided_slice %617 {offsets = [0, 0], sizes = [8, 128], strides = [1, 1]} : vector<8x256xf32> to vector<8x128xf32>
    %cst_202 = arith.constant dense<0.000000e+00> : vector<8x128xf32>
    %619 = tpu.matmul %590, %553, %cst_202 {dimension_numbers = #tpu.dot_dimension_numbers<[1], [0], [0], [1], [0, 0, 1, 1], [], []>} : vector<8x32xf32>, vector<32x128xf32>, vector<8x128xf32> -> vector<8x128xf32>
    %620 = arith.addf %618, %619 : vector<8x128xf32>
    %c6_203 = arith.constant 6 : index
    %c0_204 = arith.constant 0 : index
    %c0_205 = arith.constant 0 : index
    %621 = vector.load %arg11[%c6_203, %c0_204, %c0_205] : memref<8x8x256xf32, #tpu.memory_space<vmem>>, vector<1x8x256xf32>
    %622 = vector.shape_cast %621 : vector<1x8x256xf32> to vector<8x256xf32>
    %623 = vector.extract_strided_slice %622 {offsets = [0, 128], sizes = [8, 128], strides = [1, 1]} : vector<8x256xf32> to vector<8x128xf32>
    %cst_206 = arith.constant dense<0.000000e+00> : vector<8x128xf32>
    %624 = tpu.matmul %615, %555, %cst_206 {dimension_numbers = #tpu.dot_dimension_numbers<[1], [0], [0], [1], [0, 0, 1, 1], [], []>} : vector<8x32xf32>, vector<32x128xf32>, vector<8x128xf32> -> vector<8x128xf32>
    %625 = arith.addf %623, %624 : vector<8x128xf32>
    %626 = vector.extract_strided_slice %620 {offsets = [0, 0], sizes = [8, 32], strides = [1, 1]} : vector<8x128xf32> to vector<8x32xf32>
    %627 = arith.negf %626 : vector<8x32xf32>
    %628 = math.exp %627 : vector<8x32xf32>
    %cst_207 = arith.constant 1.000000e+00 : f32
    %629 = vector.broadcast %cst_207 : f32 to vector<8x32xf32>
    %630 = arith.addf %629, %628 : vector<8x32xf32>
    %631 = arith.divf %629, %630 : vector<8x32xf32>
    %632 = vector.extract_strided_slice %620 {offsets = [0, 32], sizes = [8, 32], strides = [1, 1]} : vector<8x128xf32> to vector<8x32xf32>
    %633 = arith.negf %632 : vector<8x32xf32>
    %634 = math.exp %633 : vector<8x32xf32>
    %cst_208 = arith.constant 1.000000e+00 : f32
    %635 = vector.broadcast %cst_208 : f32 to vector<8x32xf32>
    %636 = arith.addf %635, %634 : vector<8x32xf32>
    %637 = arith.divf %635, %636 : vector<8x32xf32>
    %638 = vector.extract_strided_slice %620 {offsets = [0, 64], sizes = [8, 32], strides = [1, 1]} : vector<8x128xf32> to vector<8x32xf32>
    %639 = math.tanh %638 : vector<8x32xf32>
    %640 = vector.extract_strided_slice %620 {offsets = [0, 96], sizes = [8, 32], strides = [1, 1]} : vector<8x128xf32> to vector<8x32xf32>
    %641 = arith.negf %640 : vector<8x32xf32>
    %642 = math.exp %641 : vector<8x32xf32>
    %cst_209 = arith.constant 1.000000e+00 : f32
    %643 = vector.broadcast %cst_209 : f32 to vector<8x32xf32>
    %644 = arith.addf %643, %642 : vector<8x32xf32>
    %645 = arith.divf %643, %644 : vector<8x32xf32>
    %646 = arith.mulf %637, %588 : vector<8x32xf32>
    %647 = arith.mulf %631, %639 : vector<8x32xf32>
    %648 = arith.addf %646, %647 : vector<8x32xf32>
    %649 = math.tanh %648 : vector<8x32xf32>
    %650 = arith.mulf %645, %649 : vector<8x32xf32>
    %651 = vector.extract_strided_slice %625 {offsets = [0, 0], sizes = [8, 32], strides = [1, 1]} : vector<8x128xf32> to vector<8x32xf32>
    %652 = arith.negf %651 : vector<8x32xf32>
    %653 = math.exp %652 : vector<8x32xf32>
    %cst_210 = arith.constant 1.000000e+00 : f32
    %654 = vector.broadcast %cst_210 : f32 to vector<8x32xf32>
    %655 = arith.addf %654, %653 : vector<8x32xf32>
    %656 = arith.divf %654, %655 : vector<8x32xf32>
    %657 = vector.extract_strided_slice %625 {offsets = [0, 32], sizes = [8, 32], strides = [1, 1]} : vector<8x128xf32> to vector<8x32xf32>
    %658 = arith.negf %657 : vector<8x32xf32>
    %659 = math.exp %658 : vector<8x32xf32>
    %cst_211 = arith.constant 1.000000e+00 : f32
    %660 = vector.broadcast %cst_211 : f32 to vector<8x32xf32>
    %661 = arith.addf %660, %659 : vector<8x32xf32>
    %662 = arith.divf %660, %661 : vector<8x32xf32>
    %663 = vector.extract_strided_slice %625 {offsets = [0, 64], sizes = [8, 32], strides = [1, 1]} : vector<8x128xf32> to vector<8x32xf32>
    %664 = math.tanh %663 : vector<8x32xf32>
    %665 = vector.extract_strided_slice %625 {offsets = [0, 96], sizes = [8, 32], strides = [1, 1]} : vector<8x128xf32> to vector<8x32xf32>
    %666 = arith.negf %665 : vector<8x32xf32>
    %667 = math.exp %666 : vector<8x32xf32>
    %cst_212 = arith.constant 1.000000e+00 : f32
    %668 = vector.broadcast %cst_212 : f32 to vector<8x32xf32>
    %669 = arith.addf %668, %667 : vector<8x32xf32>
    %670 = arith.divf %668, %669 : vector<8x32xf32>
    %671 = arith.mulf %662, %613 : vector<8x32xf32>
    %672 = arith.mulf %656, %664 : vector<8x32xf32>
    %673 = arith.addf %671, %672 : vector<8x32xf32>
    %674 = math.tanh %673 : vector<8x32xf32>
    %675 = arith.mulf %670, %674 : vector<8x32xf32>
    %c2_213 = arith.constant 2 : index
    %c0_214 = arith.constant 0 : index
    %c0_215 = arith.constant 0 : index
    %676 = vector.load %arg11[%c2_213, %c0_214, %c0_215] : memref<8x8x256xf32, #tpu.memory_space<vmem>>, vector<1x8x256xf32>
    %677 = vector.shape_cast %676 : vector<1x8x256xf32> to vector<8x256xf32>
    %678 = vector.extract_strided_slice %677 {offsets = [0, 0], sizes = [8, 128], strides = [1, 1]} : vector<8x256xf32> to vector<8x128xf32>
    %cst_216 = arith.constant dense<0.000000e+00> : vector<8x128xf32>
    %679 = tpu.matmul %650, %553, %cst_216 {dimension_numbers = #tpu.dot_dimension_numbers<[1], [0], [0], [1], [0, 0, 1, 1], [], []>} : vector<8x32xf32>, vector<32x128xf32>, vector<8x128xf32> -> vector<8x128xf32>
    %680 = arith.addf %678, %679 : vector<8x128xf32>
    %c5_217 = arith.constant 5 : index
    %c0_218 = arith.constant 0 : index
    %c0_219 = arith.constant 0 : index
    %681 = vector.load %arg11[%c5_217, %c0_218, %c0_219] : memref<8x8x256xf32, #tpu.memory_space<vmem>>, vector<1x8x256xf32>
    %682 = vector.shape_cast %681 : vector<1x8x256xf32> to vector<8x256xf32>
    %683 = vector.extract_strided_slice %682 {offsets = [0, 128], sizes = [8, 128], strides = [1, 1]} : vector<8x256xf32> to vector<8x128xf32>
    %cst_220 = arith.constant dense<0.000000e+00> : vector<8x128xf32>
    %684 = tpu.matmul %675, %555, %cst_220 {dimension_numbers = #tpu.dot_dimension_numbers<[1], [0], [0], [1], [0, 0, 1, 1], [], []>} : vector<8x32xf32>, vector<32x128xf32>, vector<8x128xf32> -> vector<8x128xf32>
    %685 = arith.addf %683, %684 : vector<8x128xf32>
    %686 = vector.extract_strided_slice %680 {offsets = [0, 0], sizes = [8, 32], strides = [1, 1]} : vector<8x128xf32> to vector<8x32xf32>
    %687 = arith.negf %686 : vector<8x32xf32>
    %688 = math.exp %687 : vector<8x32xf32>
    %cst_221 = arith.constant 1.000000e+00 : f32
    %689 = vector.broadcast %cst_221 : f32 to vector<8x32xf32>
    %690 = arith.addf %689, %688 : vector<8x32xf32>
    %691 = arith.divf %689, %690 : vector<8x32xf32>
    %692 = vector.extract_strided_slice %680 {offsets = [0, 32], sizes = [8, 32], strides = [1, 1]} : vector<8x128xf32> to vector<8x32xf32>
    %693 = arith.negf %692 : vector<8x32xf32>
    %694 = math.exp %693 : vector<8x32xf32>
    %cst_222 = arith.constant 1.000000e+00 : f32
    %695 = vector.broadcast %cst_222 : f32 to vector<8x32xf32>
    %696 = arith.addf %695, %694 : vector<8x32xf32>
    %697 = arith.divf %695, %696 : vector<8x32xf32>
    %698 = vector.extract_strided_slice %680 {offsets = [0, 64], sizes = [8, 32], strides = [1, 1]} : vector<8x128xf32> to vector<8x32xf32>
    %699 = math.tanh %698 : vector<8x32xf32>
    %700 = vector.extract_strided_slice %680 {offsets = [0, 96], sizes = [8, 32], strides = [1, 1]} : vector<8x128xf32> to vector<8x32xf32>
    %701 = arith.negf %700 : vector<8x32xf32>
    %702 = math.exp %701 : vector<8x32xf32>
    %cst_223 = arith.constant 1.000000e+00 : f32
    %703 = vector.broadcast %cst_223 : f32 to vector<8x32xf32>
    %704 = arith.addf %703, %702 : vector<8x32xf32>
    %705 = arith.divf %703, %704 : vector<8x32xf32>
    %706 = arith.mulf %697, %648 : vector<8x32xf32>
    %707 = arith.mulf %691, %699 : vector<8x32xf32>
    %708 = arith.addf %706, %707 : vector<8x32xf32>
    %709 = math.tanh %708 : vector<8x32xf32>
    %710 = arith.mulf %705, %709 : vector<8x32xf32>
    %711 = vector.extract_strided_slice %685 {offsets = [0, 0], sizes = [8, 32], strides = [1, 1]} : vector<8x128xf32> to vector<8x32xf32>
    %712 = arith.negf %711 : vector<8x32xf32>
    %713 = math.exp %712 : vector<8x32xf32>
    %cst_224 = arith.constant 1.000000e+00 : f32
    %714 = vector.broadcast %cst_224 : f32 to vector<8x32xf32>
    %715 = arith.addf %714, %713 : vector<8x32xf32>
    %716 = arith.divf %714, %715 : vector<8x32xf32>
    %717 = vector.extract_strided_slice %685 {offsets = [0, 32], sizes = [8, 32], strides = [1, 1]} : vector<8x128xf32> to vector<8x32xf32>
    %718 = arith.negf %717 : vector<8x32xf32>
    %719 = math.exp %718 : vector<8x32xf32>
    %cst_225 = arith.constant 1.000000e+00 : f32
    %720 = vector.broadcast %cst_225 : f32 to vector<8x32xf32>
    %721 = arith.addf %720, %719 : vector<8x32xf32>
    %722 = arith.divf %720, %721 : vector<8x32xf32>
    %723 = vector.extract_strided_slice %685 {offsets = [0, 64], sizes = [8, 32], strides = [1, 1]} : vector<8x128xf32> to vector<8x32xf32>
    %724 = math.tanh %723 : vector<8x32xf32>
    %725 = vector.extract_strided_slice %685 {offsets = [0, 96], sizes = [8, 32], strides = [1, 1]} : vector<8x128xf32> to vector<8x32xf32>
    %726 = arith.negf %725 : vector<8x32xf32>
    %727 = math.exp %726 : vector<8x32xf32>
    %cst_226 = arith.constant 1.000000e+00 : f32
    %728 = vector.broadcast %cst_226 : f32 to vector<8x32xf32>
    %729 = arith.addf %728, %727 : vector<8x32xf32>
    %730 = arith.divf %728, %729 : vector<8x32xf32>
    %731 = arith.mulf %722, %673 : vector<8x32xf32>
    %732 = arith.mulf %716, %724 : vector<8x32xf32>
    %733 = arith.addf %731, %732 : vector<8x32xf32>
    %734 = math.tanh %733 : vector<8x32xf32>
    %735 = arith.mulf %730, %734 : vector<8x32xf32>
    %c3_227 = arith.constant 3 : index
    %c0_228 = arith.constant 0 : index
    %c0_229 = arith.constant 0 : index
    %736 = vector.load %arg11[%c3_227, %c0_228, %c0_229] : memref<8x8x256xf32, #tpu.memory_space<vmem>>, vector<1x8x256xf32>
    %737 = vector.shape_cast %736 : vector<1x8x256xf32> to vector<8x256xf32>
    %738 = vector.extract_strided_slice %737 {offsets = [0, 0], sizes = [8, 128], strides = [1, 1]} : vector<8x256xf32> to vector<8x128xf32>
    %cst_230 = arith.constant dense<0.000000e+00> : vector<8x128xf32>
    %739 = tpu.matmul %710, %553, %cst_230 {dimension_numbers = #tpu.dot_dimension_numbers<[1], [0], [0], [1], [0, 0, 1, 1], [], []>} : vector<8x32xf32>, vector<32x128xf32>, vector<8x128xf32> -> vector<8x128xf32>
    %740 = arith.addf %738, %739 : vector<8x128xf32>
    %c4_231 = arith.constant 4 : index
    %c0_232 = arith.constant 0 : index
    %c0_233 = arith.constant 0 : index
    %741 = vector.load %arg11[%c4_231, %c0_232, %c0_233] : memref<8x8x256xf32, #tpu.memory_space<vmem>>, vector<1x8x256xf32>
    %742 = vector.shape_cast %741 : vector<1x8x256xf32> to vector<8x256xf32>
    %743 = vector.extract_strided_slice %742 {offsets = [0, 128], sizes = [8, 128], strides = [1, 1]} : vector<8x256xf32> to vector<8x128xf32>
    %cst_234 = arith.constant dense<0.000000e+00> : vector<8x128xf32>
    %744 = tpu.matmul %735, %555, %cst_234 {dimension_numbers = #tpu.dot_dimension_numbers<[1], [0], [0], [1], [0, 0, 1, 1], [], []>} : vector<8x32xf32>, vector<32x128xf32>, vector<8x128xf32> -> vector<8x128xf32>
    %745 = arith.addf %743, %744 : vector<8x128xf32>
    %746 = vector.extract_strided_slice %740 {offsets = [0, 0], sizes = [8, 32], strides = [1, 1]} : vector<8x128xf32> to vector<8x32xf32>
    %747 = arith.negf %746 : vector<8x32xf32>
    %748 = math.exp %747 : vector<8x32xf32>
    %cst_235 = arith.constant 1.000000e+00 : f32
    %749 = vector.broadcast %cst_235 : f32 to vector<8x32xf32>
    %750 = arith.addf %749, %748 : vector<8x32xf32>
    %751 = arith.divf %749, %750 : vector<8x32xf32>
    %752 = vector.extract_strided_slice %740 {offsets = [0, 32], sizes = [8, 32], strides = [1, 1]} : vector<8x128xf32> to vector<8x32xf32>
    %753 = arith.negf %752 : vector<8x32xf32>
    %754 = math.exp %753 : vector<8x32xf32>
    %cst_236 = arith.constant 1.000000e+00 : f32
    %755 = vector.broadcast %cst_236 : f32 to vector<8x32xf32>
    %756 = arith.addf %755, %754 : vector<8x32xf32>
    %757 = arith.divf %755, %756 : vector<8x32xf32>
    %758 = vector.extract_strided_slice %740 {offsets = [0, 64], sizes = [8, 32], strides = [1, 1]} : vector<8x128xf32> to vector<8x32xf32>
    %759 = math.tanh %758 : vector<8x32xf32>
    %760 = vector.extract_strided_slice %740 {offsets = [0, 96], sizes = [8, 32], strides = [1, 1]} : vector<8x128xf32> to vector<8x32xf32>
    %761 = arith.negf %760 : vector<8x32xf32>
    %762 = math.exp %761 : vector<8x32xf32>
    %cst_237 = arith.constant 1.000000e+00 : f32
    %763 = vector.broadcast %cst_237 : f32 to vector<8x32xf32>
    %764 = arith.addf %763, %762 : vector<8x32xf32>
    %765 = arith.divf %763, %764 : vector<8x32xf32>
    %766 = arith.mulf %757, %708 : vector<8x32xf32>
    %767 = arith.mulf %751, %759 : vector<8x32xf32>
    %768 = arith.addf %766, %767 : vector<8x32xf32>
    %769 = math.tanh %768 : vector<8x32xf32>
    %770 = arith.mulf %765, %769 : vector<8x32xf32>
    %771 = vector.extract_strided_slice %745 {offsets = [0, 0], sizes = [8, 32], strides = [1, 1]} : vector<8x128xf32> to vector<8x32xf32>
    %772 = arith.negf %771 : vector<8x32xf32>
    %773 = math.exp %772 : vector<8x32xf32>
    %cst_238 = arith.constant 1.000000e+00 : f32
    %774 = vector.broadcast %cst_238 : f32 to vector<8x32xf32>
    %775 = arith.addf %774, %773 : vector<8x32xf32>
    %776 = arith.divf %774, %775 : vector<8x32xf32>
    %777 = vector.extract_strided_slice %745 {offsets = [0, 32], sizes = [8, 32], strides = [1, 1]} : vector<8x128xf32> to vector<8x32xf32>
    %778 = arith.negf %777 : vector<8x32xf32>
    %779 = math.exp %778 : vector<8x32xf32>
    %cst_239 = arith.constant 1.000000e+00 : f32
    %780 = vector.broadcast %cst_239 : f32 to vector<8x32xf32>
    %781 = arith.addf %780, %779 : vector<8x32xf32>
    %782 = arith.divf %780, %781 : vector<8x32xf32>
    %783 = vector.extract_strided_slice %745 {offsets = [0, 64], sizes = [8, 32], strides = [1, 1]} : vector<8x128xf32> to vector<8x32xf32>
    %784 = math.tanh %783 : vector<8x32xf32>
    %785 = vector.extract_strided_slice %745 {offsets = [0, 96], sizes = [8, 32], strides = [1, 1]} : vector<8x128xf32> to vector<8x32xf32>
    %786 = arith.negf %785 : vector<8x32xf32>
    %787 = math.exp %786 : vector<8x32xf32>
    %cst_240 = arith.constant 1.000000e+00 : f32
    %788 = vector.broadcast %cst_240 : f32 to vector<8x32xf32>
    %789 = arith.addf %788, %787 : vector<8x32xf32>
    %790 = arith.divf %788, %789 : vector<8x32xf32>
    %791 = arith.mulf %782, %733 : vector<8x32xf32>
    %792 = arith.mulf %776, %784 : vector<8x32xf32>
    %793 = arith.addf %791, %792 : vector<8x32xf32>
    %794 = math.tanh %793 : vector<8x32xf32>
    %795 = arith.mulf %790, %794 : vector<8x32xf32>
    %c4_241 = arith.constant 4 : index
    %c0_242 = arith.constant 0 : index
    %c0_243 = arith.constant 0 : index
    %796 = vector.load %arg11[%c4_241, %c0_242, %c0_243] : memref<8x8x256xf32, #tpu.memory_space<vmem>>, vector<1x8x256xf32>
    %797 = vector.shape_cast %796 : vector<1x8x256xf32> to vector<8x256xf32>
    %798 = vector.extract_strided_slice %797 {offsets = [0, 0], sizes = [8, 128], strides = [1, 1]} : vector<8x256xf32> to vector<8x128xf32>
    %cst_244 = arith.constant dense<0.000000e+00> : vector<8x128xf32>
    %799 = tpu.matmul %770, %553, %cst_244 {dimension_numbers = #tpu.dot_dimension_numbers<[1], [0], [0], [1], [0, 0, 1, 1], [], []>} : vector<8x32xf32>, vector<32x128xf32>, vector<8x128xf32> -> vector<8x128xf32>
    %800 = arith.addf %798, %799 : vector<8x128xf32>
    %c3_245 = arith.constant 3 : index
    %c0_246 = arith.constant 0 : index
    %c0_247 = arith.constant 0 : index
    %801 = vector.load %arg11[%c3_245, %c0_246, %c0_247] : memref<8x8x256xf32, #tpu.memory_space<vmem>>, vector<1x8x256xf32>
    %802 = vector.shape_cast %801 : vector<1x8x256xf32> to vector<8x256xf32>
    %803 = vector.extract_strided_slice %802 {offsets = [0, 128], sizes = [8, 128], strides = [1, 1]} : vector<8x256xf32> to vector<8x128xf32>
    %cst_248 = arith.constant dense<0.000000e+00> : vector<8x128xf32>
    %804 = tpu.matmul %795, %555, %cst_248 {dimension_numbers = #tpu.dot_dimension_numbers<[1], [0], [0], [1], [0, 0, 1, 1], [], []>} : vector<8x32xf32>, vector<32x128xf32>, vector<8x128xf32> -> vector<8x128xf32>
    %805 = arith.addf %803, %804 : vector<8x128xf32>
    %806 = vector.extract_strided_slice %800 {offsets = [0, 0], sizes = [8, 32], strides = [1, 1]} : vector<8x128xf32> to vector<8x32xf32>
    %807 = arith.negf %806 : vector<8x32xf32>
    %808 = math.exp %807 : vector<8x32xf32>
    %cst_249 = arith.constant 1.000000e+00 : f32
    %809 = vector.broadcast %cst_249 : f32 to vector<8x32xf32>
    %810 = arith.addf %809, %808 : vector<8x32xf32>
    %811 = arith.divf %809, %810 : vector<8x32xf32>
    %812 = vector.extract_strided_slice %800 {offsets = [0, 32], sizes = [8, 32], strides = [1, 1]} : vector<8x128xf32> to vector<8x32xf32>
    %813 = arith.negf %812 : vector<8x32xf32>
    %814 = math.exp %813 : vector<8x32xf32>
    %cst_250 = arith.constant 1.000000e+00 : f32
    %815 = vector.broadcast %cst_250 : f32 to vector<8x32xf32>
    %816 = arith.addf %815, %814 : vector<8x32xf32>
    %817 = arith.divf %815, %816 : vector<8x32xf32>
    %818 = vector.extract_strided_slice %800 {offsets = [0, 64], sizes = [8, 32], strides = [1, 1]} : vector<8x128xf32> to vector<8x32xf32>
    %819 = math.tanh %818 : vector<8x32xf32>
    %820 = vector.extract_strided_slice %800 {offsets = [0, 96], sizes = [8, 32], strides = [1, 1]} : vector<8x128xf32> to vector<8x32xf32>
    %821 = arith.negf %820 : vector<8x32xf32>
    %822 = math.exp %821 : vector<8x32xf32>
    %cst_251 = arith.constant 1.000000e+00 : f32
    %823 = vector.broadcast %cst_251 : f32 to vector<8x32xf32>
    %824 = arith.addf %823, %822 : vector<8x32xf32>
    %825 = arith.divf %823, %824 : vector<8x32xf32>
    %826 = arith.mulf %817, %768 : vector<8x32xf32>
    %827 = arith.mulf %811, %819 : vector<8x32xf32>
    %828 = arith.addf %826, %827 : vector<8x32xf32>
    %829 = math.tanh %828 : vector<8x32xf32>
    %830 = arith.mulf %825, %829 : vector<8x32xf32>
    %831 = vector.extract_strided_slice %805 {offsets = [0, 0], sizes = [8, 32], strides = [1, 1]} : vector<8x128xf32> to vector<8x32xf32>
    %832 = arith.negf %831 : vector<8x32xf32>
    %833 = math.exp %832 : vector<8x32xf32>
    %cst_252 = arith.constant 1.000000e+00 : f32
    %834 = vector.broadcast %cst_252 : f32 to vector<8x32xf32>
    %835 = arith.addf %834, %833 : vector<8x32xf32>
    %836 = arith.divf %834, %835 : vector<8x32xf32>
    %837 = vector.extract_strided_slice %805 {offsets = [0, 32], sizes = [8, 32], strides = [1, 1]} : vector<8x128xf32> to vector<8x32xf32>
    %838 = arith.negf %837 : vector<8x32xf32>
    %839 = math.exp %838 : vector<8x32xf32>
    %cst_253 = arith.constant 1.000000e+00 : f32
    %840 = vector.broadcast %cst_253 : f32 to vector<8x32xf32>
    %841 = arith.addf %840, %839 : vector<8x32xf32>
    %842 = arith.divf %840, %841 : vector<8x32xf32>
    %843 = vector.extract_strided_slice %805 {offsets = [0, 64], sizes = [8, 32], strides = [1, 1]} : vector<8x128xf32> to vector<8x32xf32>
    %844 = math.tanh %843 : vector<8x32xf32>
    %845 = vector.extract_strided_slice %805 {offsets = [0, 96], sizes = [8, 32], strides = [1, 1]} : vector<8x128xf32> to vector<8x32xf32>
    %846 = arith.negf %845 : vector<8x32xf32>
    %847 = math.exp %846 : vector<8x32xf32>
    %cst_254 = arith.constant 1.000000e+00 : f32
    %848 = vector.broadcast %cst_254 : f32 to vector<8x32xf32>
    %849 = arith.addf %848, %847 : vector<8x32xf32>
    %850 = arith.divf %848, %849 : vector<8x32xf32>
    %851 = arith.mulf %842, %793 : vector<8x32xf32>
    %852 = arith.mulf %836, %844 : vector<8x32xf32>
    %853 = arith.addf %851, %852 : vector<8x32xf32>
    %854 = math.tanh %853 : vector<8x32xf32>
    %855 = arith.mulf %850, %854 : vector<8x32xf32>
    %c5_255 = arith.constant 5 : index
    %c0_256 = arith.constant 0 : index
    %c0_257 = arith.constant 0 : index
    %856 = vector.load %arg11[%c5_255, %c0_256, %c0_257] : memref<8x8x256xf32, #tpu.memory_space<vmem>>, vector<1x8x256xf32>
    %857 = vector.shape_cast %856 : vector<1x8x256xf32> to vector<8x256xf32>
    %858 = vector.extract_strided_slice %857 {offsets = [0, 0], sizes = [8, 128], strides = [1, 1]} : vector<8x256xf32> to vector<8x128xf32>
    %cst_258 = arith.constant dense<0.000000e+00> : vector<8x128xf32>
    %859 = tpu.matmul %830, %553, %cst_258 {dimension_numbers = #tpu.dot_dimension_numbers<[1], [0], [0], [1], [0, 0, 1, 1], [], []>} : vector<8x32xf32>, vector<32x128xf32>, vector<8x128xf32> -> vector<8x128xf32>
    %860 = arith.addf %858, %859 : vector<8x128xf32>
    %c2_259 = arith.constant 2 : index
    %c0_260 = arith.constant 0 : index
    %c0_261 = arith.constant 0 : index
    %861 = vector.load %arg11[%c2_259, %c0_260, %c0_261] : memref<8x8x256xf32, #tpu.memory_space<vmem>>, vector<1x8x256xf32>
    %862 = vector.shape_cast %861 : vector<1x8x256xf32> to vector<8x256xf32>
    %863 = vector.extract_strided_slice %862 {offsets = [0, 128], sizes = [8, 128], strides = [1, 1]} : vector<8x256xf32> to vector<8x128xf32>
    %cst_262 = arith.constant dense<0.000000e+00> : vector<8x128xf32>
    %864 = tpu.matmul %855, %555, %cst_262 {dimension_numbers = #tpu.dot_dimension_numbers<[1], [0], [0], [1], [0, 0, 1, 1], [], []>} : vector<8x32xf32>, vector<32x128xf32>, vector<8x128xf32> -> vector<8x128xf32>
    %865 = arith.addf %863, %864 : vector<8x128xf32>
    %866 = vector.extract_strided_slice %860 {offsets = [0, 0], sizes = [8, 32], strides = [1, 1]} : vector<8x128xf32> to vector<8x32xf32>
    %867 = arith.negf %866 : vector<8x32xf32>
    %868 = math.exp %867 : vector<8x32xf32>
    %cst_263 = arith.constant 1.000000e+00 : f32
    %869 = vector.broadcast %cst_263 : f32 to vector<8x32xf32>
    %870 = arith.addf %869, %868 : vector<8x32xf32>
    %871 = arith.divf %869, %870 : vector<8x32xf32>
    %872 = vector.extract_strided_slice %860 {offsets = [0, 32], sizes = [8, 32], strides = [1, 1]} : vector<8x128xf32> to vector<8x32xf32>
    %873 = arith.negf %872 : vector<8x32xf32>
    %874 = math.exp %873 : vector<8x32xf32>
    %cst_264 = arith.constant 1.000000e+00 : f32
    %875 = vector.broadcast %cst_264 : f32 to vector<8x32xf32>
    %876 = arith.addf %875, %874 : vector<8x32xf32>
    %877 = arith.divf %875, %876 : vector<8x32xf32>
    %878 = vector.extract_strided_slice %860 {offsets = [0, 64], sizes = [8, 32], strides = [1, 1]} : vector<8x128xf32> to vector<8x32xf32>
    %879 = math.tanh %878 : vector<8x32xf32>
    %880 = vector.extract_strided_slice %860 {offsets = [0, 96], sizes = [8, 32], strides = [1, 1]} : vector<8x128xf32> to vector<8x32xf32>
    %881 = arith.negf %880 : vector<8x32xf32>
    %882 = math.exp %881 : vector<8x32xf32>
    %cst_265 = arith.constant 1.000000e+00 : f32
    %883 = vector.broadcast %cst_265 : f32 to vector<8x32xf32>
    %884 = arith.addf %883, %882 : vector<8x32xf32>
    %885 = arith.divf %883, %884 : vector<8x32xf32>
    %886 = arith.mulf %877, %828 : vector<8x32xf32>
    %887 = arith.mulf %871, %879 : vector<8x32xf32>
    %888 = arith.addf %886, %887 : vector<8x32xf32>
    %889 = math.tanh %888 : vector<8x32xf32>
    %890 = arith.mulf %885, %889 : vector<8x32xf32>
    %891 = vector.extract_strided_slice %865 {offsets = [0, 0], sizes = [8, 32], strides = [1, 1]} : vector<8x128xf32> to vector<8x32xf32>
    %892 = arith.negf %891 : vector<8x32xf32>
    %893 = math.exp %892 : vector<8x32xf32>
    %cst_266 = arith.constant 1.000000e+00 : f32
    %894 = vector.broadcast %cst_266 : f32 to vector<8x32xf32>
    %895 = arith.addf %894, %893 : vector<8x32xf32>
    %896 = arith.divf %894, %895 : vector<8x32xf32>
    %897 = vector.extract_strided_slice %865 {offsets = [0, 32], sizes = [8, 32], strides = [1, 1]} : vector<8x128xf32> to vector<8x32xf32>
    %898 = arith.negf %897 : vector<8x32xf32>
    %899 = math.exp %898 : vector<8x32xf32>
    %cst_267 = arith.constant 1.000000e+00 : f32
    %900 = vector.broadcast %cst_267 : f32 to vector<8x32xf32>
    %901 = arith.addf %900, %899 : vector<8x32xf32>
    %902 = arith.divf %900, %901 : vector<8x32xf32>
    %903 = vector.extract_strided_slice %865 {offsets = [0, 64], sizes = [8, 32], strides = [1, 1]} : vector<8x128xf32> to vector<8x32xf32>
    %904 = math.tanh %903 : vector<8x32xf32>
    %905 = vector.extract_strided_slice %865 {offsets = [0, 96], sizes = [8, 32], strides = [1, 1]} : vector<8x128xf32> to vector<8x32xf32>
    %906 = arith.negf %905 : vector<8x32xf32>
    %907 = math.exp %906 : vector<8x32xf32>
    %cst_268 = arith.constant 1.000000e+00 : f32
    %908 = vector.broadcast %cst_268 : f32 to vector<8x32xf32>
    %909 = arith.addf %908, %907 : vector<8x32xf32>
    %910 = arith.divf %908, %909 : vector<8x32xf32>
    %911 = arith.mulf %902, %853 : vector<8x32xf32>
    %912 = arith.mulf %896, %904 : vector<8x32xf32>
    %913 = arith.addf %911, %912 : vector<8x32xf32>
    %914 = math.tanh %913 : vector<8x32xf32>
    %915 = arith.mulf %910, %914 : vector<8x32xf32>
    %c6_269 = arith.constant 6 : index
    %c0_270 = arith.constant 0 : index
    %c0_271 = arith.constant 0 : index
    %916 = vector.load %arg11[%c6_269, %c0_270, %c0_271] : memref<8x8x256xf32, #tpu.memory_space<vmem>>, vector<1x8x256xf32>
    %917 = vector.shape_cast %916 : vector<1x8x256xf32> to vector<8x256xf32>
    %918 = vector.extract_strided_slice %917 {offsets = [0, 0], sizes = [8, 128], strides = [1, 1]} : vector<8x256xf32> to vector<8x128xf32>
    %cst_272 = arith.constant dense<0.000000e+00> : vector<8x128xf32>
    %919 = tpu.matmul %890, %553, %cst_272 {dimension_numbers = #tpu.dot_dimension_numbers<[1], [0], [0], [1], [0, 0, 1, 1], [], []>} : vector<8x32xf32>, vector<32x128xf32>, vector<8x128xf32> -> vector<8x128xf32>
    %920 = arith.addf %918, %919 : vector<8x128xf32>
    %c1_273 = arith.constant 1 : index
    %c0_274 = arith.constant 0 : index
    %c0_275 = arith.constant 0 : index
    %921 = vector.load %arg11[%c1_273, %c0_274, %c0_275] : memref<8x8x256xf32, #tpu.memory_space<vmem>>, vector<1x8x256xf32>
    %922 = vector.shape_cast %921 : vector<1x8x256xf32> to vector<8x256xf32>
    %923 = vector.extract_strided_slice %922 {offsets = [0, 128], sizes = [8, 128], strides = [1, 1]} : vector<8x256xf32> to vector<8x128xf32>
    %cst_276 = arith.constant dense<0.000000e+00> : vector<8x128xf32>
    %924 = tpu.matmul %915, %555, %cst_276 {dimension_numbers = #tpu.dot_dimension_numbers<[1], [0], [0], [1], [0, 0, 1, 1], [], []>} : vector<8x32xf32>, vector<32x128xf32>, vector<8x128xf32> -> vector<8x128xf32>
    %925 = arith.addf %923, %924 : vector<8x128xf32>
    %926 = vector.extract_strided_slice %920 {offsets = [0, 0], sizes = [8, 32], strides = [1, 1]} : vector<8x128xf32> to vector<8x32xf32>
    %927 = arith.negf %926 : vector<8x32xf32>
    %928 = math.exp %927 : vector<8x32xf32>
    %cst_277 = arith.constant 1.000000e+00 : f32
    %929 = vector.broadcast %cst_277 : f32 to vector<8x32xf32>
    %930 = arith.addf %929, %928 : vector<8x32xf32>
    %931 = arith.divf %929, %930 : vector<8x32xf32>
    %932 = vector.extract_strided_slice %920 {offsets = [0, 32], sizes = [8, 32], strides = [1, 1]} : vector<8x128xf32> to vector<8x32xf32>
    %933 = arith.negf %932 : vector<8x32xf32>
    %934 = math.exp %933 : vector<8x32xf32>
    %cst_278 = arith.constant 1.000000e+00 : f32
    %935 = vector.broadcast %cst_278 : f32 to vector<8x32xf32>
    %936 = arith.addf %935, %934 : vector<8x32xf32>
    %937 = arith.divf %935, %936 : vector<8x32xf32>
    %938 = vector.extract_strided_slice %920 {offsets = [0, 64], sizes = [8, 32], strides = [1, 1]} : vector<8x128xf32> to vector<8x32xf32>
    %939 = math.tanh %938 : vector<8x32xf32>
    %940 = vector.extract_strided_slice %920 {offsets = [0, 96], sizes = [8, 32], strides = [1, 1]} : vector<8x128xf32> to vector<8x32xf32>
    %941 = arith.negf %940 : vector<8x32xf32>
    %942 = math.exp %941 : vector<8x32xf32>
    %cst_279 = arith.constant 1.000000e+00 : f32
    %943 = vector.broadcast %cst_279 : f32 to vector<8x32xf32>
    %944 = arith.addf %943, %942 : vector<8x32xf32>
    %945 = arith.divf %943, %944 : vector<8x32xf32>
    %946 = arith.mulf %937, %888 : vector<8x32xf32>
    %947 = arith.mulf %931, %939 : vector<8x32xf32>
    %948 = arith.addf %946, %947 : vector<8x32xf32>
    %949 = math.tanh %948 : vector<8x32xf32>
    %950 = arith.mulf %945, %949 : vector<8x32xf32>
    %951 = vector.extract_strided_slice %925 {offsets = [0, 0], sizes = [8, 32], strides = [1, 1]} : vector<8x128xf32> to vector<8x32xf32>
    %952 = arith.negf %951 : vector<8x32xf32>
    %953 = math.exp %952 : vector<8x32xf32>
    %cst_280 = arith.constant 1.000000e+00 : f32
    %954 = vector.broadcast %cst_280 : f32 to vector<8x32xf32>
    %955 = arith.addf %954, %953 : vector<8x32xf32>
    %956 = arith.divf %954, %955 : vector<8x32xf32>
    %957 = vector.extract_strided_slice %925 {offsets = [0, 32], sizes = [8, 32], strides = [1, 1]} : vector<8x128xf32> to vector<8x32xf32>
    %958 = arith.negf %957 : vector<8x32xf32>
    %959 = math.exp %958 : vector<8x32xf32>
    %cst_281 = arith.constant 1.000000e+00 : f32
    %960 = vector.broadcast %cst_281 : f32 to vector<8x32xf32>
    %961 = arith.addf %960, %959 : vector<8x32xf32>
    %962 = arith.divf %960, %961 : vector<8x32xf32>
    %963 = vector.extract_strided_slice %925 {offsets = [0, 64], sizes = [8, 32], strides = [1, 1]} : vector<8x128xf32> to vector<8x32xf32>
    %964 = math.tanh %963 : vector<8x32xf32>
    %965 = vector.extract_strided_slice %925 {offsets = [0, 96], sizes = [8, 32], strides = [1, 1]} : vector<8x128xf32> to vector<8x32xf32>
    %966 = arith.negf %965 : vector<8x32xf32>
    %967 = math.exp %966 : vector<8x32xf32>
    %cst_282 = arith.constant 1.000000e+00 : f32
    %968 = vector.broadcast %cst_282 : f32 to vector<8x32xf32>
    %969 = arith.addf %968, %967 : vector<8x32xf32>
    %970 = arith.divf %968, %969 : vector<8x32xf32>
    %971 = arith.mulf %962, %913 : vector<8x32xf32>
    %972 = arith.mulf %956, %964 : vector<8x32xf32>
    %973 = arith.addf %971, %972 : vector<8x32xf32>
    %974 = math.tanh %973 : vector<8x32xf32>
    %975 = arith.mulf %970, %974 : vector<8x32xf32>
    %c7_283 = arith.constant 7 : index
    %c0_284 = arith.constant 0 : index
    %c0_285 = arith.constant 0 : index
    %976 = vector.load %arg11[%c7_283, %c0_284, %c0_285] : memref<8x8x256xf32, #tpu.memory_space<vmem>>, vector<1x8x256xf32>
    %977 = vector.shape_cast %976 : vector<1x8x256xf32> to vector<8x256xf32>
    %978 = vector.extract_strided_slice %977 {offsets = [0, 0], sizes = [8, 128], strides = [1, 1]} : vector<8x256xf32> to vector<8x128xf32>
    %cst_286 = arith.constant dense<0.000000e+00> : vector<8x128xf32>
    %979 = tpu.matmul %950, %553, %cst_286 {dimension_numbers = #tpu.dot_dimension_numbers<[1], [0], [0], [1], [0, 0, 1, 1], [], []>} : vector<8x32xf32>, vector<32x128xf32>, vector<8x128xf32> -> vector<8x128xf32>
    %980 = arith.addf %978, %979 : vector<8x128xf32>
    %c0_287 = arith.constant 0 : index
    %c0_288 = arith.constant 0 : index
    %c0_289 = arith.constant 0 : index
    %981 = vector.load %arg11[%c0_287, %c0_288, %c0_289] : memref<8x8x256xf32, #tpu.memory_space<vmem>>, vector<1x8x256xf32>
    %982 = vector.shape_cast %981 : vector<1x8x256xf32> to vector<8x256xf32>
    %983 = vector.extract_strided_slice %982 {offsets = [0, 128], sizes = [8, 128], strides = [1, 1]} : vector<8x256xf32> to vector<8x128xf32>
    %cst_290 = arith.constant dense<0.000000e+00> : vector<8x128xf32>
    %984 = tpu.matmul %975, %555, %cst_290 {dimension_numbers = #tpu.dot_dimension_numbers<[1], [0], [0], [1], [0, 0, 1, 1], [], []>} : vector<8x32xf32>, vector<32x128xf32>, vector<8x128xf32> -> vector<8x128xf32>
    %985 = arith.addf %983, %984 : vector<8x128xf32>
    %986 = vector.extract_strided_slice %980 {offsets = [0, 0], sizes = [8, 32], strides = [1, 1]} : vector<8x128xf32> to vector<8x32xf32>
    %987 = arith.negf %986 : vector<8x32xf32>
    %988 = math.exp %987 : vector<8x32xf32>
    %cst_291 = arith.constant 1.000000e+00 : f32
    %989 = vector.broadcast %cst_291 : f32 to vector<8x32xf32>
    %990 = arith.addf %989, %988 : vector<8x32xf32>
    %991 = arith.divf %989, %990 : vector<8x32xf32>
    %992 = vector.extract_strided_slice %980 {offsets = [0, 32], sizes = [8, 32], strides = [1, 1]} : vector<8x128xf32> to vector<8x32xf32>
    %993 = arith.negf %992 : vector<8x32xf32>
    %994 = math.exp %993 : vector<8x32xf32>
    %cst_292 = arith.constant 1.000000e+00 : f32
    %995 = vector.broadcast %cst_292 : f32 to vector<8x32xf32>
    %996 = arith.addf %995, %994 : vector<8x32xf32>
    %997 = arith.divf %995, %996 : vector<8x32xf32>
    %998 = vector.extract_strided_slice %980 {offsets = [0, 64], sizes = [8, 32], strides = [1, 1]} : vector<8x128xf32> to vector<8x32xf32>
    %999 = math.tanh %998 : vector<8x32xf32>
    %1000 = vector.extract_strided_slice %980 {offsets = [0, 96], sizes = [8, 32], strides = [1, 1]} : vector<8x128xf32> to vector<8x32xf32>
    %1001 = arith.negf %1000 : vector<8x32xf32>
    %1002 = math.exp %1001 : vector<8x32xf32>
    %cst_293 = arith.constant 1.000000e+00 : f32
    %1003 = vector.broadcast %cst_293 : f32 to vector<8x32xf32>
    %1004 = arith.addf %1003, %1002 : vector<8x32xf32>
    %1005 = arith.divf %1003, %1004 : vector<8x32xf32>
    %1006 = arith.mulf %997, %948 : vector<8x32xf32>
    %1007 = arith.mulf %991, %999 : vector<8x32xf32>
    %1008 = arith.addf %1006, %1007 : vector<8x32xf32>
    %1009 = math.tanh %1008 : vector<8x32xf32>
    %1010 = arith.mulf %1005, %1009 : vector<8x32xf32>
    %1011 = vector.extract_strided_slice %985 {offsets = [0, 0], sizes = [8, 32], strides = [1, 1]} : vector<8x128xf32> to vector<8x32xf32>
    %1012 = arith.negf %1011 : vector<8x32xf32>
    %1013 = math.exp %1012 : vector<8x32xf32>
    %cst_294 = arith.constant 1.000000e+00 : f32
    %1014 = vector.broadcast %cst_294 : f32 to vector<8x32xf32>
    %1015 = arith.addf %1014, %1013 : vector<8x32xf32>
    %1016 = arith.divf %1014, %1015 : vector<8x32xf32>
    %1017 = vector.extract_strided_slice %985 {offsets = [0, 32], sizes = [8, 32], strides = [1, 1]} : vector<8x128xf32> to vector<8x32xf32>
    %1018 = arith.negf %1017 : vector<8x32xf32>
    %1019 = math.exp %1018 : vector<8x32xf32>
    %cst_295 = arith.constant 1.000000e+00 : f32
    %1020 = vector.broadcast %cst_295 : f32 to vector<8x32xf32>
    %1021 = arith.addf %1020, %1019 : vector<8x32xf32>
    %1022 = arith.divf %1020, %1021 : vector<8x32xf32>
    %1023 = vector.extract_strided_slice %985 {offsets = [0, 64], sizes = [8, 32], strides = [1, 1]} : vector<8x128xf32> to vector<8x32xf32>
    %1024 = math.tanh %1023 : vector<8x32xf32>
    %1025 = vector.extract_strided_slice %985 {offsets = [0, 96], sizes = [8, 32], strides = [1, 1]} : vector<8x128xf32> to vector<8x32xf32>
    %1026 = arith.negf %1025 : vector<8x32xf32>
    %1027 = math.exp %1026 : vector<8x32xf32>
    %cst_296 = arith.constant 1.000000e+00 : f32
    %1028 = vector.broadcast %cst_296 : f32 to vector<8x32xf32>
    %1029 = arith.addf %1028, %1027 : vector<8x32xf32>
    %1030 = arith.divf %1028, %1029 : vector<8x32xf32>
    %1031 = arith.mulf %1022, %973 : vector<8x32xf32>
    %1032 = arith.mulf %1016, %1024 : vector<8x32xf32>
    %1033 = arith.addf %1031, %1032 : vector<8x32xf32>
    %1034 = math.tanh %1033 : vector<8x32xf32>
    %1035 = arith.mulf %1030, %1034 : vector<8x32xf32>
    %1036 = arith.addf %511, %536 : vector<8x32xf32>
    %1037 = arith.addf %509, %534 : vector<8x32xf32>
    %1038 = arith.addf %1010, %1035 : vector<8x32xf32>
    %1039 = arith.addf %1008, %1033 : vector<8x32xf32>
    %1040 = tpu.concatenate %1036, %1037, %1038, %1039 in 1 : vector<8x32xf32>, vector<8x32xf32>, vector<8x32xf32>, vector<8x32xf32> -> vector<8x128xf32>
    %1041 = math.tanh %1040 : vector<8x128xf32>
    %c0_297 = arith.constant 0 : index
    %c0_298 = arith.constant 0 : index
    %1042 = vector.load %arg8[%c0_297, %c0_298] : memref<128x32xf32, #tpu.memory_space<vmem>>, vector<128x32xf32>
    %cst_299 = arith.constant dense<0.000000e+00> : vector<8x32xf32>
    %1043 = tpu.matmul %1041, %1042, %cst_299 {dimension_numbers = #tpu.dot_dimension_numbers<[1], [0], [0], [1], [0, 0, 1, 1], [], []>} : vector<8x128xf32>, vector<128x32xf32>, vector<8x32xf32> -> vector<8x32xf32>
    %c0_300 = arith.constant 0 : index
    %c0_301 = arith.constant 0 : index
    %1044 = vector.load %arg9[%c0_300, %c0_301] : memref<1x32xf32, #tpu.memory_space<vmem>>, vector<1x32xf32>
    %1045 = vector.broadcast %1044 : vector<1x32xf32> to vector<8x32xf32>
    %1046 = arith.addf %1043, %1045 : vector<8x32xf32>
    %c0_302 = arith.constant 0 : index
    %c0_303 = arith.constant 0 : index
    %1047 = vector.load %arg10[%c0_302, %c0_303] : memref<8x32xf32, #tpu.memory_space<vmem>>, vector<8x32xf32>
    tpu.vector_store %arg10[%c0_302, %c0_303], %1046 {strides = array<i32>} : memref<8x32xf32, #tpu.memory_space<vmem>>, vector<8x32xf32>,
    return
  }
  func.func @transform_0(%arg0: i32) -> (i32, i32, i32) {
    %c0_i32 = arith.constant 0 : i32
    %c0_i32_0 = arith.constant 0 : i32
    %c0_i32_1 = arith.constant 0 : i32
    return %c0_i32, %arg0, %c0_i32_0 : i32, i32, i32
  }
  func.func @transform_1(%arg0: i32) -> (i32, i32) {
    %c0_i32 = arith.constant 0 : i32
    %c0_i32_0 = arith.constant 0 : i32
    %c0_i32_1 = arith.constant 0 : i32
    return %c0_i32, %c0_i32_0 : i32, i32
  }
  func.func @transform_2(%arg0: i32) -> (i32, i32, i32) {
    %c0_i32 = arith.constant 0 : i32
    %c0_i32_0 = arith.constant 0 : i32
    %c0_i32_1 = arith.constant 0 : i32
    %c0_i32_2 = arith.constant 0 : i32
    return %c0_i32, %c0_i32_0, %c0_i32_1 : i32, i32, i32
  }
  func.func @transform_3(%arg0: i32) -> (i32, i32) {
    %c0_i32 = arith.constant 0 : i32
    %c0_i32_0 = arith.constant 0 : i32
    %c0_i32_1 = arith.constant 0 : i32
    return %c0_i32, %c0_i32_0 : i32, i32
  }
  func.func @transform_4(%arg0: i32) -> (i32, i32) {
    %c0_i32 = arith.constant 0 : i32
    %c0_i32_0 = arith.constant 0 : i32
    %c0_i32_1 = arith.constant 0 : i32
    return %c0_i32, %c0_i32_0 : i32, i32
  }
  func.func @transform_5(%arg0: i32) -> (i32, i32, i32) {
    %c0_i32 = arith.constant 0 : i32
    %c0_i32_0 = arith.constant 0 : i32
    %c0_i32_1 = arith.constant 0 : i32
    %c0_i32_2 = arith.constant 0 : i32
    return %c0_i32, %c0_i32_0, %c0_i32_1 : i32, i32, i32
  }
  func.func @transform_6(%arg0: i32) -> (i32, i32) {
    %c0_i32 = arith.constant 0 : i32
    %c0_i32_0 = arith.constant 0 : i32
    %c0_i32_1 = arith.constant 0 : i32
    return %c0_i32, %c0_i32_0 : i32, i32
  }
  func.func @transform_7(%arg0: i32) -> (i32, i32) {
    %c0_i32 = arith.constant 0 : i32
    %c0_i32_0 = arith.constant 0 : i32
    %c0_i32_1 = arith.constant 0 : i32
    return %c0_i32, %c0_i32_0 : i32, i32
  }
  func.func @transform_8(%arg0: i32) -> (i32, i32) {
    %c0_i32 = arith.constant 0 : i32
    %c0_i32_0 = arith.constant 0 : i32
    %c0_i32_1 = arith.constant 0 : i32
    return %c0_i32, %c0_i32_0 : i32, i32
  }
  func.func @transform_9(%arg0: i32) -> (i32, i32) {
    %c0_i32 = arith.constant 0 : i32
    %c0_i32_0 = arith.constant 0 : i32
    return %arg0, %c0_i32 : i32, i32
  }
}

</mosaic_0001>

<bundles_post_ra>
// kernel: tpu_custom_call.1
= control target key start
LH: loop header
LB: loop body
LE: loop exit
PB: predicated region body
PF: predicated region fallthrough
CT: control target
= control target key end

     0   :  { %14 = vsyncpa [#allocation5], 0  ;;  %s3865_s0 = inlined_call_operand.hbm [shape: f32[8,8,16], index: 0, kind: input, shape index: {}]   ;;  %s3866_s1 = inlined_call_operand.vmem [shape: f32[16,256], index: 1, kind: input, shape index: {}]   ;;  %s3867_s2 = inlined_call_operand.hbm [shape: f32[2,32,128], index: 2, kind: input, shape index: {}]   ;;  %s3868_s3 = inlined_call_operand.vmem [shape: f32[1,256], index: 3, kind: input, shape index: {}]   ;;  %s3869_s4 = inlined_call_operand.vmem [shape: f32[64,256], index: 4, kind: input, shape index: {}]   ;;  %s3870_s5 = inlined_call_operand.hbm [shape: f32[2,32,128], index: 5, kind: input, shape index: {}]   ;;  %s3871_s6 = inlined_call_operand.vmem [shape: f32[1,256], index: 6, kind: input, shape index: {}]   ;;  %s3872_s7 = inlined_call_operand.vmem [shape: f32[128,32], index: 7, kind: input, shape index: {}]   ;;  %s3873_s8 = inlined_call_operand.vmem [shape: f32[1,32], index: 8, kind: input, shape index: {}]   ;;  %s3874_s9 = inlined_call_operand.hbm [shape: f32[8,32], index: 9, kind: output, shape index: {}]  }
   0x1   :  { %15 = vsyncpa [#allocation8], 0 }
   0x2   :  { %16 = vsyncpa [#allocation6], 0  ;;  %s36_s11 = sshll.u32 %s3867_s2, 4  ;;  %s3066_s12 = smov [#allocation7]   ;;  %s37_s11 = int_to_ptr.hbm [resolvable:$true] %s36_s11 }
   0x3   :  { %s38_s13 = sshll.u32 %s3066_s12, 4  ;;  %s21_s16 = sshll.u32 %s3865_s0, 4  ;;  %s39_s13 = int_to_ptr.vmem [resolvable:$true] %s38_s13  ;;  %s22_s16 = int_to_ptr.hbm [resolvable:$true] %s21_s16 }
   0x4   :  { %s3067_s17 = smov 128   ;;  %s3068_s18 = smov 8  }
   0x5   :  { %44 = dma.hbm_to_vmem [thread:$0]  %s37_s11, 1024, %s39_s13, [#allocation8], %s3067_s17, %s3067_s17, %s3068_s18  }
   0x6   :  { %s3069_s19 = smov [#allocation4]   ;;  %s53_s23 = sshll.u32 %s3870_s5, 4  ;;  %s54_s23 = int_to_ptr.hbm [resolvable:$true] %s53_s23 }
   0x7   :  { %s23_s20 = sshll.u32 %s3069_s19, 4  ;;  %s3070_s2 = smov [#allocation9]   ;;  %s24_s20 = int_to_ptr.vmem [resolvable:$true] %s23_s20 }
   0x8   :  { %29 = dma.hbm_to_vmem [thread:$0]  %s22_s16, 1024, %s24_s20, [#allocation5], %s3067_s17, %s3067_s17, %s3068_s18  }
   0x9   :  { %s55_s24 = sshll.u32 %s3070_s2, 4  ;;  %s56_s24 = int_to_ptr.vmem [resolvable:$true] %s55_s24 }
   0xa   :  { %61 = dma.hbm_to_vmem [thread:$0]  %s54_s23, 1024, %s56_s24, [#allocation8], %s3067_s17, %s3067_s17, %s3068_s18  }
   0xb   :  { %3060 = dma.done.wait [#allocation5], 1024  }
   0xc   :  { %3061 = vsyncadd [#allocation5], 4294966272 }
   0xd   :  { %3062 = dma.done.wait [#allocation8], 2048  }
   0xe   :  { %3063 = vsyncadd [#allocation8], 4294965248  ;;  %v3135_v0 = vld [vmem:[#allocation7 + $0x18] sm:$0xff]  ;;  %v3137_v1 = vld [vmem:[#allocation7 + $0x10] sm:$0xff]  ;;  %vm106_vm0 = vcmask 130048   ;;  %v3071_v10 = vmov 0.0  }
   0xf   :  { %v99_v2 = vld [vmem:[%s3866_s1 + $0x18] sm:$0xff]  ;;  %255 = vmatpush.msra.mxu2 %v3135_v0  ;;  %v97_v3 = vld [vmem:[%s3866_s1 + $0x8] sm:$0xff]  ;;  %v80_v5 = vld [vmem:[#allocation4] sm:$0xff]  ;;  %s3072_s11 = smov 64   ;;  %vm239_vm9 = vcmask 261120   ;;  %s2568_s5 = sshll.u32 %s3874_s9, 4  ;;  %s2569_s5 = int_to_ptr.hbm [resolvable:$true] %s2568_s5 }
  0x10   :  { %186 = vmatpush.msra.mxu1 %v99_v2  ;;  %v3146_v4 = vld [vmem:[#allocation7 + $0x8] sm:$0xff]  ;;  %v98_v6 = vld [vmem:[%s3866_s1 + $0x10] sm:$0xff]  ;;  %2682 = vtanh.f32 %v80_v5  ;;  %v96_v7 = vld [vmem:[%s3866_s1] sm:$0xff] }
  0x11   :  { %256 = vmatpush.msra.mxu2 %v3137_v1  ;;  %v3155_v8 = vld [vmem:[#allocation7] sm:$0xff]  ;;  %145 = vmatpush.msra.mxu0 %v98_v6  ;;  %v81_v9 = vld [vmem:[#allocation4 + $0x8] sm:$0xff]  ;;  %v82_v12 = vld [vmem:[#allocation4 + $0x10] sm:$0xff] }
  0x12   :  { %187 = vmatpush.msra.mxu1 %v97_v3  ;;  %2684 = vtanh.f32 %v81_v9  ;;  %v3168_v14 = vld [vmem:[#allocation7 + $0x38] sm:$0xff]  ;;  %v3170_v15 = vld [vmem:[#allocation7 + $0x30] sm:$0xff]  ;;  %v3179_v18 = vld [vmem:[#allocation7 + $0x28] sm:$0xff] }
  0x13   :  { %257 = vmatpush.msra.mxu2 %v3146_v4  ;;  %146 = vmatpush.msra.mxu0 %v96_v7  ;;  %2686 = vtanh.f32 %v82_v12  ;;  %v83_v16 = vld [vmem:[#allocation4 + $0x18] sm:$0xff]  ;;  %v3181_v19 = vld [vmem:[#allocation7 + $0x20] sm:$0xff]  ;;  %v85_v22 = vld [vmem:[#allocation4 + $0x28] sm:$0xff] }
  0x14   :  { %278 = vmatpush.msra.mxu3 %v3168_v14  ;;  %2688 = vtanh.f32 %v83_v16  ;;  %v84_v20 = vld [vmem:[#allocation4 + $0x20] sm:$0xff]  ;;  %v86_v24 = vld [vmem:[#allocation4 + $0x30] sm:$0xff]  ;;  %v87_v26 = vld [vmem:[#allocation4 + $0x38] sm:$0xff] }
  0x15   :  { %258 = vmatpush.msra.mxu2 %v3155_v8  ;;  %2690 = vtanh.f32 %v84_v20  ;;  %v100_v29 = vld [vmem:[%s3868_s3] sm:$0x3]  ;;  %s3073_s3 = smov 32  }
  0x16   :  { %259 = vmatmul.f32.vlgmr.msra.gmra.mxu2 %v3071_v10  ;;  %v2683_v11 = vpop.eup %2682  ;;  %279 = vmatpush.msra.mxu3 %v3170_v15  ;;  %2692 = vtanh.f32 %v85_v22  ;;  %v103_v30 = vperm.slane %v100_v29, 1  ;;  %v3208_v31 = vperm.slane %v100_v29, 0 }
  0x17   :  { %389 = vmatpush.msrb.mxu2 %v3135_v0  ;;  %2587 = vmatmul.msk.f32.vlgmr.msra.gmra.mxu1 %vm106_vm0, %v2683_v11  ;;  %2694 = vtanh.f32 %v86_v24 }
  0x18   :  { %2579 = vmatmul.msk.f32.vlgmr.msra.gmra.mxu0 %vm106_vm0, %v2683_v11  ;;  %v2685_v13 = vpop.eup %2684  ;;  %280 = vmatpush.msra.mxu3 %v3179_v18  ;;  %2696 = vtanh.f32 %v87_v26 }
  0x19   :  { %390 = vmatpush.msrb.mxu2 %v3137_v1  ;;  %v2687_v17 = vpop.eup %2686 }
  0x1a   :  { %281 = vmatpush.msra.mxu3 %v3181_v19  ;;  %v2689_v21 = vpop.eup %2688 }
  0x1b   :  { %391 = vmatpush.msrb.mxu2 %v3146_v4  ;;  %282 = vmatmul.f32.vlgmr.msra.gmra.mxu3 %v3071_v10  ;;  %v2691_v23 = vpop.eup %2690 }
  0x1c   :  { %416 = vmatpush.msrb.mxu3 %v3168_v14  ;;  %v2693_v25 = vpop.eup %2692 }
  0x1d   :  { %392 = vmatpush.msrb.mxu2 %v3155_v8  ;;  %v2695_v27 = vpop.eup %2694 }
  0x1e   :  { %417 = vmatpush.msrb.mxu3 %v3170_v15  ;;  %v2697_v28 = vpop.eup %2696 }
  0x1f   :  { %527 = vmatpush.msra.mxu2 %v3135_v0  ;;  %2588 = vmatmul.msk.f32.gmra.mxu1 %vm106_vm0, %v2685_v13 }
  0x20   :  { %2580 = vmatmul.msk.f32.gmra.mxu0 %vm106_vm0, %v2685_v13  ;;  %418 = vmatpush.msrb.mxu3 %v3179_v18 }
  0x21   :  { %528 = vmatpush.msra.mxu2 %v3137_v1 }
  0x22   :  { %419 = vmatpush.msrb.mxu3 %v3181_v19 }
  0x23   :  { %529 = vmatpush.msra.mxu2 %v3146_v4 }
  0x24   :  { %554 = vmatpush.msra.mxu3 %v3168_v14 }
  0x25   :  { %530 = vmatpush.msra.mxu2 %v3155_v8 }
  0x26   :  { %555 = vmatpush.msra.mxu3 %v3170_v15 }
  0x27   :  { %2589 = vmatmul.msk.f32.gmra.mxu1 %vm106_vm0, %v2687_v17 }
  0x28   :  { %2581 = vmatmul.msk.f32.gmra.mxu0 %vm106_vm0, %v2687_v17  ;;  %556 = vmatpush.msra.mxu3 %v3179_v18 }
  0x2a   :  { %557 = vmatpush.msra.mxu3 %v3181_v19 }
  0x2f   :  { %2590 = vmatmul.msk.f32.gmra.mxu1 %vm106_vm0, %v2689_v21 }
  0x30   :  { %2582 = vmatmul.msk.f32.gmra.mxu0 %vm106_vm0, %v2689_v21 }
  0x37   :  { %2591 = vmatmul.msk.f32.gmra.mxu1 %vm106_vm0, %v2691_v23 }
  0x38   :  { %2583 = vmatmul.msk.f32.gmra.mxu0 %vm106_vm0, %v2691_v23 }
  0x3f   :  { %2592 = vmatmul.msk.f32.gmra.mxu1 %vm106_vm0, %v2693_v25 }
  0x40   :  { %2584 = vmatmul.msk.f32.gmra.mxu0 %vm106_vm0, %v2693_v25 }
  0x47   :  { %2593 = vmatmul.msk.f32.gmra.mxu1 %vm106_vm0, %v2695_v27 }
  0x48   :  { %2585 = vmatmul.msk.f32.gmra.mxu0 %vm106_vm0, %v2695_v27 }
  0x4f   :  { %2594 = vmatmul.msk.f32.gmra.mxu1 %vm106_vm0, %v2697_v28 }
  0x50   :  { %2586 = vmatmul.msk.f32.gmra.mxu0 %vm106_vm0, %v2697_v28 }
  0x94   :  { %v189_v32 = vpop.f32.mrf.mxu1 }
  0x95   :  { %v148_v33 = vpop.f32.mrf.mxu0  ;;  %v3210_v34 = vadd.f32 %v189_v32, %v103_v30 }
  0x96   :  { %v149_v35 = vadd.f32 %v148_v33, %v3208_v31 }
  0x99   :  { %v260_v36 = vpop.f32.mrf.mxu2 }
  0x9a   :  { %v263_v37 = vadd.f32 %v260_v36, %v149_v35 }
  0x9c   :  { %2698 = vtanh.f32 %v263_v37  ;;  %v192_v38 = vpop.f32.mrf.mxu1  ;;  %v2595_v56 = vmul.f32 -1.442695, %v263_v37 }
  0x9d   :  { %v3213_v39 = vadd.f32 %v192_v38, %v103_v30 }
  0x9e   :  { %v283_v52 = vpop.f32.mrf.mxu3 }
  0xa2   :  { %v2699_v40 = vpop.eup %2698 }
  0xa3   :  { %309 = vrot.lane.b32.xlu1 %v2699_v40, %s3072_s11 }
  0xa4   :  { %v195_v41 = vpop.f32.mrf.mxu1 }
  0xa5   :  { %v3216_v42 = vadd.f32 %v195_v41, %v103_v30 }
  0xac   :  { %v198_v43 = vpop.f32.mrf.mxu1 }
  0xad   :  { %v3218_v44 = vadd.f32 %v198_v43, %v103_v30 }
  0xb4   :  { %v201_v45 = vpop.f32.mrf.mxu1 }
  0xb5   :  { %v3220_v46 = vadd.f32 %v201_v45, %v103_v30 }
  0xbc   :  { %v204_v47 = vpop.f32.mrf.mxu1 }
  0xbd   :  { %v3222_v48 = vadd.f32 %v204_v47, %v103_v30 }
  0xc4   :  { %v207_v49 = vpop.f32.mrf.mxu1 }
  0xc5   :  { %v3224_v50 = vadd.f32 %v207_v49, %v103_v30 }
  0xcc   :  { %v210_v51 = vpop.f32.mrf.mxu1 }
  0xcd   :  { %v211_v53 = vadd.f32 %v210_v51, %v103_v30 }
  0xcf   :  { %v286_v54 = vadd.f32 %v283_v52, %v211_v53  ;;  %v151_v53 = vpop.f32.mrf.mxu0 }
  0xd1   :  { %2700 = vtanh.f32 %v286_v54  ;;  %v2596_v12 = vmul.f32 -1.442695, %v286_v54  ;;  %v152_v54 = vadd.f32 %v151_v53, %v3208_v31 }
  0xd2   :  { %2702 = vpow2.f32 %v2595_v56 }
  0xd7   :  { %v2701_v55 = vpop.eup %2700 }
  0xd8   :  { %346 = vrot.lane.b32.xlu0 %v2701_v55, %s3072_s11  ;;  %v2703_v57 = vpop.eup %2702 }
  0xd9   :  { %v290_v58 = vadd.f32 1.0, %v2703_v57 }
  0xdb   :  { %2704 = vrcp.f32 %v290_v58  ;;  %vm296_vm1 = vweird.f32 %v290_v58  ;;  %v302_v63 = vand.u32 2147483648, %v290_v58  ;;  %v300_v3 = vand.u32 2147483647, %v290_v58 }
  0xdc   :  { %2706 = vpow2.f32 %v2596_v12 }
  0xdd   :  { %v303_v5 = vor.u32 1.1754944e-38, %v302_v63  ;;  %vm301_vm4 = vcmp.eq.f32.partialorder %v300_v3, 8.507059e+37 }
  0xe1   :  { %v2705_v59 = vpop.eup %2704 }
  0xe2   :  { %v292_v60 = vmul.f32 %v2705_v59, %v290_v58  ;;  %vm297_vm2 = vweird.f32 %v2705_v59  ;;  %v2707_v13 = vpop.eup %2706 }
  0xe3   :  { %vm298_vm3 = vmor %vm296_vm1, %vm297_vm2  ;;  %v327_v16 = vadd.f32 1.0, %v2707_v13 }
  0xe4   :  { %v293_v61 = vsub.f32 1.0, %v292_v60 }
  0xe5   :  { %2708 = vrcp.f32 %v327_v16  ;;  %v339_v24 = vand.u32 2147483648, %v327_v16  ;;  %vm333_vm6 = vweird.f32 %v327_v16  ;;  %v337_v25 = vand.u32 2147483647, %v327_v16 }
  0xe6   :  { %v294_v62 = vmul.f32 %v2705_v59, %v293_v61 }
  0xe7   :  { %v340_v27 = vor.u32 1.1754944e-38, %v339_v24  ;;  %vm338_vm8 = vcmp.eq.f32.partialorder %v337_v25, 8.507059e+37 }
  0xe8   :  { %v295_v2 = vadd.f32 %v2705_v59, %v294_v62 }
  0xea   :  { %v299_v6 = vsel %vm298_vm3, %v2705_v59, %v295_v2 }
  0xeb   :  { %v304_v9 = vsel %vm301_vm4, %v303_v5, %v299_v6  ;;  %v2709_v17 = vpop.eup %2708 }
  0xec   :  { %v329_v20 = vmul.f32 %v2709_v17, %v327_v16  ;;  %vm334_vm5 = vweird.f32 %v2709_v17  ;;  %v307_v32 = vmul.f32 0.0, %v304_v9 }
  0xed   :  { %vm335_vm7 = vmor %vm333_vm6, %vm334_vm5 }
  0xee   :  { %v330_v21 = vsub.f32 1.0, %v329_v20 }
  0xf0   :  { %v331_v22 = vmul.f32 %v2709_v17, %v330_v21 }
  0xf2   :  { %v332_v23 = vadd.f32 %v2709_v17, %v331_v22 }
  0xf4   :  { %v336_v26 = vsel %vm335_vm7, %v2709_v17, %v332_v23 }
  0xf5   :  { %v341_v29 = vsel %vm338_vm8, %v340_v27, %v336_v26 }
  0xf6   :  { %v344_v37 = vmul.f32 0.0, %v341_v29 }
 0x115   :  { %v310_v7 = vpop.permute.xlu1 %309 }
 0x116   :  { %v312_v11 = vmul.f32 %v310_v7, %v304_v9 }
 0x118   :  { %314 = vrot.lane.b32.xlu2 %v312_v11, %s3073_s3 }
 0x14a   :  { %v347_v28 = vpop.permute.xlu0 %346 }
 0x14b   :  { %v349_v30 = vmul.f32 %v347_v28, %v341_v29 }
 0x14d   :  { %351 = vrot.lane.b32.xlu0 %v349_v30, %s3073_s3 }
 0x172   :  { %v315_v33 = vpop.permute.xlu2 %314 }
 0x173   :  { %v3229_v35 = vadd.f32 %v315_v33, %v307_v32 }
 0x175   :  { %2710 = vtanh.f32 %v3229_v35 }
 0x17b   :  { %v2711_v36 = vpop.eup %2710 }
 0x17c   :  { %320 = vrot.lane.b32.xlu0 %v2711_v36, %s3072_s11 }
 0x1bf   :  { %v352_v38 = vpop.permute.xlu0 %351 }
 0x1c0   :  { %v3233_v40 = vadd.f32 %v352_v38, %v344_v37 }
 0x1c2   :  { %2712 = vtanh.f32 %v3233_v40 }
 0x1c8   :  { %v2713_v41 = vpop.eup %2712 }
 0x1c9   :  { %357 = vrot.lane.b32.xlu1 %v2713_v41, %s3072_s11 }
 0x1ee   :  { %v321_v43 = vpop.permute.xlu0 %320 }
 0x1ef   :  { %v323_v45 = vmul.f32 %v321_v43, %v304_v9 }
 0x1f1   :  { %362 = vrot.lane.b32.xlu1 %v323_v45, %s3073_s3 }
 0x23b   :  { %v358_v47 = vpop.permute.xlu1 %357 }
 0x23c   :  { %v3238_v49 = vmul.f32 %v358_v47, %v341_v29 }
 0x23e   :  { %400 = vrot.lane.b32.xlu2 %v3238_v49, %s3073_s3 }
 0x263   :  { %v363_v51 = vpop.permute.xlu1 %362 }
 0x264   :  { %365 = vst.msk [vmem:[#allocation3] sm:$0xff] %vm239_vm9, %v363_v51  ;;  %2597 = vmatmul.msk.f32.vlgmr.msrb.gmra.mxu2 %vm239_vm9, %v363_v51 }
 0x265   :  { %665 = vmatpush.msrb.mxu2 %v3135_v0 }
 0x267   :  { %666 = vmatpush.msrb.mxu2 %v3137_v1 }
 0x269   :  { %667 = vmatpush.msrb.mxu2 %v3146_v4 }
 0x26b   :  { %668 = vmatpush.msrb.mxu2 %v3155_v8 }
 0x298   :  { %v401_v52 = vpop.permute.xlu2 %400 }
 0x299   :  { %2598 = vmatmul.msk.f32.vlgmr.msrb.gmra.mxu3 %vm239_vm9, %v401_v52 }
 0x29a   :  { %692 = vmatpush.msrb.mxu3 %v3168_v14 }
 0x29c   :  { %693 = vmatpush.msrb.mxu3 %v3170_v15 }
 0x29e   :  { %694 = vmatpush.msrb.mxu3 %v3179_v18 }
 0x2a0   :  { %695 = vmatpush.msrb.mxu3 %v3181_v19 }
 0x2e7   :  { %v394_v55 = vpop.f32.mrf.mxu2 }
 0x2e8   :  { %v397_v56 = vadd.f32 %v394_v55, %v152_v54 }
 0x2ea   :  { %2714 = vtanh.f32 %v397_v56  ;;  %v2599_v62 = vmul.f32 -1.442695, %v397_v56 }
 0x2f0   :  { %v2715_v57 = vpop.eup %2714 }
 0x2f1   :  { %447 = vrot.lane.b32.xlu1 %v2715_v57, %s3072_s11 }
 0x31c   :  { %v421_v58 = vpop.f32.mrf.mxu3 }
 0x31d   :  { %v424_v59 = vadd.f32 %v421_v58, %v3224_v50 }
 0x31f   :  { %2716 = vtanh.f32 %v424_v59  ;;  %v2600_v61 = vmul.f32 -1.442695, %v424_v59 }
 0x321   :  { %2718 = vpow2.f32 %v2600_v61 }
 0x322   :  { %2720 = vpow2.f32 %v2599_v62 }
 0x325   :  { %v2717_v60 = vpop.eup %2716 }
 0x326   :  { %484 = vrot.lane.b32.xlu2 %v2717_v60, %s3072_s11  ;;  %v154_v60 = vpop.f32.mrf.mxu0 }
 0x327   :  { %v2719_v63 = vpop.eup %2718  ;;  %v155_v61 = vadd.f32 %v154_v60, %v3208_v31 }
 0x328   :  { %v465_v2 = vadd.f32 1.0, %v2719_v63  ;;  %v2721_v3 = vpop.eup %2720 }
 0x329   :  { %v428_v5 = vadd.f32 1.0, %v2721_v3 }
 0x32a   :  { %2722 = vrcp.f32 %v465_v2  ;;  %v477_v17 = vand.u32 2147483648, %v465_v2  ;;  %vm471_vm11 = vweird.f32 %v465_v2  ;;  %v475_v20 = vand.u32 2147483647, %v465_v2 }
 0x32b   :  { %2724 = vrcp.f32 %v428_v5  ;;  %v440_v28 = vand.u32 2147483648, %v428_v5  ;;  %vm434_vm15 = vweird.f32 %v428_v5  ;;  %v438_v29 = vand.u32 2147483647, %v428_v5 }
 0x32c   :  { %v478_v23 = vor.u32 1.1754944e-38, %v477_v17  ;;  %vm476_vm13 = vcmp.eq.f32.partialorder %v475_v20, 8.507059e+37 }
 0x32d   :  { %v441_v33 = vor.u32 1.1754944e-38, %v440_v28  ;;  %vm439_vm1 = vcmp.eq.f32.partialorder %v438_v29, 8.507059e+37 }
 0x330   :  { %v2723_v6 = vpop.eup %2722 }
 0x331   :  { %v467_v7 = vmul.f32 %v2723_v6, %v465_v2  ;;  %v2725_v11 = vpop.eup %2724  ;;  %vm472_vm10 = vweird.f32 %v2723_v6 }
 0x332   :  { %v430_v12 = vmul.f32 %v2725_v11, %v428_v5  ;;  %vm473_vm12 = vmor %vm471_vm11, %vm472_vm10  ;;  %vm435_vm14 = vweird.f32 %v2725_v11 }
 0x333   :  { %v468_v9 = vsub.f32 1.0, %v467_v7  ;;  %vm436_vm0 = vmor %vm434_vm15, %vm435_vm14 }
 0x334   :  { %v431_v13 = vsub.f32 1.0, %v430_v12 }
 0x335   :  { %v469_v50 = vmul.f32 %v2723_v6, %v468_v9 }
 0x336   :  { %v432_v21 = vmul.f32 %v2725_v11, %v431_v13 }
 0x337   :  { %v470_v16 = vadd.f32 %v2723_v6, %v469_v50 }
 0x338   :  { %v433_v26 = vadd.f32 %v2725_v11, %v432_v21 }
 0x339   :  { %v474_v22 = vsel %vm473_vm12, %v2723_v6, %v470_v16 }
 0x33a   :  { %v479_v25 = vsel %vm476_vm13, %v478_v23, %v474_v22  ;;  %v437_v30 = vsel %vm436_vm0, %v2725_v11, %v433_v26 }
 0x33b   :  { %v442_v36 = vsel %vm439_vm1, %v441_v33, %v437_v30  ;;  %v482_v38 = vmul.f32 %v479_v25, %v3233_v40 }
 0x33c   :  { %v445_v45 = vmul.f32 %v442_v36, %v3229_v35 }
 0x363   :  { %v448_v32 = vpop.permute.xlu1 %447 }
 0x364   :  { %v450_v37 = vmul.f32 %v448_v32, %v442_v36 }
 0x380   :  { %v485_v24 = vpop.permute.xlu2 %484 }
 0x381   :  { %v487_v27 = vmul.f32 %v485_v24, %v479_v25 }
 0x383   :  { %489 = vrot.lane.b32.xlu0 %v487_v27, %s3073_s3 }
 0x38b   :  { %452 = vrot.lane.b32.xlu0 %v450_v37, %s3073_s3 }
 0x3f5   :  { %v490_v41 = vpop.permute.xlu0 %489 }
 0x3f6   :  { %v3260_v43 = vadd.f32 %v490_v41, %v482_v38 }
 0x3f8   :  { %2726 = vtanh.f32 %v3260_v43 }
 0x3fd   :  { %v453_v47 = vpop.permute.xlu0 %452 }
 0x3fe   :  { %v2727_v51 = vpop.eup %2726  ;;  %v3264_v52 = vadd.f32 %v453_v47, %v445_v45 }
 0x3ff   :  { %495 = vrot.lane.b32.xlu2 %v2727_v51, %s3072_s11 }
 0x400   :  { %2728 = vtanh.f32 %v3264_v52 }
 0x406   :  { %v2729_v53 = vpop.eup %2728 }
 0x407   :  { %458 = vrot.lane.b32.xlu2 %v2729_v53, %s3072_s11 }
 0x459   :  { %v496_v54 = vpop.permute.xlu2 %495 }
 0x45a   :  { %v3269_v40 = vmul.f32 %v496_v54, %v479_v25 }
 0x45c   :  { %538 = vrot.lane.b32.xlu1 %v3269_v40, %s3073_s3 }
 0x461   :  { %v459_v55 = vpop.permute.xlu2 %458 }
 0x462   :  { %v461_v56 = vmul.f32 %v459_v55, %v442_v36 }
 0x464   :  { %500 = vrot.lane.b32.xlu0 %v461_v56, %s3073_s3 }
 0x4ce   :  { %v539_v35 = vpop.permute.xlu1 %538 }
 0x4cf   :  { %2602 = vmatmul.msk.f32.vlgmr.msra.gmra.mxu3 %vm239_vm9, %v539_v35 }
 0x4d0   :  { %828 = vmatpush.msra.mxu3 %v3168_v14 }
 0x4d2   :  { %829 = vmatpush.msra.mxu3 %v3170_v15 }
 0x4d4   :  { %830 = vmatpush.msra.mxu3 %v3179_v18 }
 0x4d6   :  { %v501_v57 = vpop.permute.xlu0 %500  ;;  %831 = vmatpush.msra.mxu3 %v3181_v19 }
 0x4d7   :  { %504 = vst.msk [vmem:[#allocation3 + $0x8] sm:$0xff] %vm239_vm9, %v501_v57  ;;  %2601 = vmatmul.msk.f32.vlgmr.msra.gmra.mxu2 %vm239_vm9, %v501_v57 }
 0x4d8   :  { %802 = vmatpush.msra.mxu2 %v3135_v0 }
 0x4da   :  { %803 = vmatpush.msra.mxu2 %v3137_v1 }
 0x4dc   :  { %804 = vmatpush.msra.mxu2 %v3146_v4 }
 0x4de   :  { %805 = vmatpush.msra.mxu2 %v3155_v8 }
 0x552   :  { %v559_v58 = vpop.f32.mrf.mxu3 }
 0x553   :  { %v562_v59 = vadd.f32 %v559_v58, %v3222_v48 }
 0x555   :  { %2730 = vtanh.f32 %v562_v59  ;;  %v2604_v5 = vmul.f32 -1.442695, %v562_v59 }
 0x55a   :  { %v532_v62 = vpop.f32.mrf.mxu2 }
 0x55b   :  { %v2731_v63 = vpop.eup %2730  ;;  %v535_v2 = vadd.f32 %v532_v62, %v155_v61 }
 0x55c   :  { %622 = vrot.lane.b32.xlu1 %v2731_v63, %s3072_s11  ;;  %v157_v63 = vpop.f32.mrf.mxu0 }
 0x55d   :  { %2732 = vtanh.f32 %v535_v2  ;;  %v2603_v6 = vmul.f32 -1.442695, %v535_v2  ;;  %v158_v2 = vadd.f32 %v157_v63, %v3208_v31 }
 0x55e   :  { %2734 = vpow2.f32 %v2604_v5 }
 0x55f   :  { %2736 = vpow2.f32 %v2603_v6 }
 0x563   :  { %v2733_v3 = vpop.eup %2732 }
 0x564   :  { %585 = vrot.lane.b32.xlu0 %v2733_v3, %s3072_s11  ;;  %v2735_v7 = vpop.eup %2734 }
 0x565   :  { %v603_v9 = vadd.f32 1.0, %v2735_v7  ;;  %v2737_v48 = vpop.eup %2736 }
 0x566   :  { %v566_v11 = vadd.f32 1.0, %v2737_v48 }
 0x567   :  { %2738 = vrcp.f32 %v603_v9  ;;  %v615_v23 = vand.u32 2147483648, %v603_v9  ;;  %vm609_vm3 = vweird.f32 %v603_v9  ;;  %v613_v24 = vand.u32 2147483647, %v603_v9 }
 0x568   :  { %2740 = vrcp.f32 %v566_v11  ;;  %v578_v33 = vand.u32 2147483648, %v566_v11  ;;  %vm572_vm7 = vweird.f32 %v566_v11  ;;  %v576_v36 = vand.u32 2147483647, %v566_v11 }
 0x569   :  { %v616_v27 = vor.u32 1.1754944e-38, %v615_v23  ;;  %vm614_vm5 = vcmp.eq.f32.partialorder %v613_v24, 8.507059e+37 }
 0x56a   :  { %v579_v38 = vor.u32 1.1754944e-38, %v578_v33  ;;  %vm577_vm10 = vcmp.eq.f32.partialorder %v576_v36, 8.507059e+37 }
 0x56d   :  { %v2739_v12 = vpop.eup %2738 }
 0x56e   :  { %v605_v50 = vmul.f32 %v2739_v12, %v603_v9  ;;  %v2741_v16 = vpop.eup %2740  ;;  %vm610_vm2 = vweird.f32 %v2739_v12 }
 0x56f   :  { %v568_v20 = vmul.f32 %v2741_v16, %v566_v11  ;;  %vm611_vm4 = vmor %vm609_vm3, %vm610_vm2  ;;  %vm573_vm6 = vweird.f32 %v2741_v16 }
 0x570   :  { %v606_v13 = vsub.f32 1.0, %v605_v50  ;;  %vm574_vm8 = vmor %vm572_vm7, %vm573_vm6 }
 0x571   :  { %v569_v22 = vsub.f32 1.0, %v568_v20 }
 0x572   :  { %v607_v17 = vmul.f32 %v2739_v12, %v606_v13 }
 0x573   :  { %v570_v26 = vmul.f32 %v2741_v16, %v569_v22 }
 0x574   :  { %v608_v21 = vadd.f32 %v2739_v12, %v607_v17 }
 0x575   :  { %v571_v32 = vadd.f32 %v2741_v16, %v570_v26 }
 0x576   :  { %v612_v25 = vsel %vm611_vm4, %v2739_v12, %v608_v21 }
 0x577   :  { %v617_v29 = vsel %vm614_vm5, %v616_v27, %v612_v25  ;;  %v575_v37 = vsel %vm574_vm8, %v2741_v16, %v571_v32 }
 0x578   :  { %v580_v45 = vsel %vm577_vm10, %v579_v38, %v575_v37  ;;  %v620_v51 = vmul.f32 %v617_v29, %v3260_v43 }
 0x579   :  { %v583_v55 = vmul.f32 %v580_v45, %v3264_v52 }
 0x5ce   :  { %v623_v28 = vpop.permute.xlu1 %622 }
 0x5cf   :  { %v625_v30 = vmul.f32 %v623_v28, %v617_v29 }
 0x5d1   :  { %627 = vrot.lane.b32.xlu2 %v625_v30, %s3073_s3 }
 0x5d6   :  { %v586_v41 = vpop.permute.xlu0 %585 }
 0x5d7   :  { %v588_v47 = vmul.f32 %v586_v41, %v580_v45 }
 0x5d9   :  { %590 = vrot.lane.b32.xlu2 %v588_v47, %s3073_s3 }
 0x62b   :  { %v628_v53 = vpop.permute.xlu2 %627 }
 0x62c   :  { %v3292_v54 = vadd.f32 %v628_v53, %v620_v51 }
 0x62e   :  { %2742 = vtanh.f32 %v3292_v54 }
 0x633   :  { %v591_v56 = vpop.permute.xlu2 %590 }
 0x634   :  { %v2743_v35 = vpop.eup %2742  ;;  %v3296_v57 = vadd.f32 %v591_v56, %v583_v55 }
 0x635   :  { %633 = vrot.lane.b32.xlu1 %v2743_v35, %s3072_s11 }
 0x636   :  { %2744 = vtanh.f32 %v3296_v57 }
 0x63c   :  { %v2745_v58 = vpop.eup %2744 }
 0x63d   :  { %596 = vrot.lane.b32.xlu1 %v2745_v58, %s3072_s11 }
 0x6a7   :  { %v634_v59 = vpop.permute.xlu1 %633 }
 0x6a8   :  { %v3301_v43 = vmul.f32 %v634_v59, %v617_v29 }
 0x6aa   :  { %676 = vrot.lane.b32.xlu0 %v3301_v43, %s3073_s3 }
 0x6af   :  { %v597_v60 = vpop.permute.xlu1 %596 }
 0x6b0   :  { %v599_v61 = vmul.f32 %v597_v60, %v580_v45 }
 0x6b2   :  { %638 = vrot.lane.b32.xlu2 %v599_v61, %s3073_s3 }
 0x70c   :  { %v639_v52 = vpop.permute.xlu2 %638 }
 0x70d   :  { %642 = vst.msk [vmem:[#allocation3 + $0x10] sm:$0xff] %vm239_vm9, %v639_v52  ;;  %2605 = vmatmul.msk.f32.vlgmr.msrb.gmra.mxu2 %vm239_vm9, %v639_v52 }
 0x70e   :  { %936 = vmatpush.msrb.mxu2 %v3135_v0 }
 0x710   :  { %937 = vmatpush.msrb.mxu2 %v3137_v1 }
 0x712   :  { %938 = vmatpush.msrb.mxu2 %v3146_v4 }
 0x714   :  { %939 = vmatpush.msrb.mxu2 %v3155_v8 }
 0x71c   :  { %v677_v62 = vpop.permute.xlu0 %676 }
 0x71d   :  { %2606 = vmatmul.msk.f32.vlgmr.msrb.gmra.mxu3 %vm239_vm9, %v677_v62 }
 0x71e   :  { %962 = vmatpush.msrb.mxu3 %v3168_v14 }
 0x720   :  { %963 = vmatpush.msrb.mxu3 %v3170_v15 }
 0x722   :  { %964 = vmatpush.msrb.mxu3 %v3179_v18 }
 0x724   :  { %965 = vmatpush.msrb.mxu3 %v3181_v19 }
 0x790   :  { %v670_v3 = vpop.f32.mrf.mxu2 }
 0x791   :  { %v673_v5 = vadd.f32 %v670_v3, %v158_v2 }
 0x793   :  { %2746 = vtanh.f32 %v673_v5  ;;  %v2607_v12 = vmul.f32 -1.442695, %v673_v5 }
 0x799   :  { %v2747_v6 = vpop.eup %2746 }
 0x79a   :  { %723 = vrot.lane.b32.xlu2 %v2747_v6, %s3072_s11 }
 0x7a0   :  { %v697_v7 = vpop.f32.mrf.mxu3 }
 0x7a1   :  { %v700_v9 = vadd.f32 %v697_v7, %v3220_v46 }
 0x7a3   :  { %2748 = vtanh.f32 %v700_v9  ;;  %v2608_v11 = vmul.f32 -1.442695, %v700_v9 }
 0x7a5   :  { %2750 = vpow2.f32 %v2608_v11  ;;  %v160_v11 = vpop.f32.mrf.mxu0 }
 0x7a6   :  { %2752 = vpow2.f32 %v2607_v12  ;;  %v161_v12 = vadd.f32 %v160_v11, %v3208_v31  ;;  %v2958_v11 = vld [vmem:[#allocation7 + $0x8] sm:$0xff] }
 0x7a9   :  { %v2749_v48 = vpop.eup %2748 }
 0x7aa   :  { %760 = vrot.lane.b32.xlu0 %v2749_v48, %s3072_s11 }
 0x7ab   :  { %v2751_v50 = vpop.eup %2750 }
 0x7ac   :  { %v741_v13 = vadd.f32 1.0, %v2751_v50  ;;  %v2753_v16 = vpop.eup %2752 }
 0x7ad   :  { %v704_v17 = vadd.f32 1.0, %v2753_v16 }
 0x7ae   :  { %2754 = vrcp.f32 %v741_v13  ;;  %v753_v27 = vand.u32 2147483648, %v741_v13  ;;  %vm747_vm12 = vweird.f32 %v741_v13  ;;  %v751_v28 = vand.u32 2147483647, %v741_v13 }
 0x7af   :  { %2756 = vrcp.f32 %v704_v17  ;;  %v716_v41 = vand.u32 2147483648, %v704_v17  ;;  %vm710_vm0 = vweird.f32 %v704_v17  ;;  %v714_v45 = vand.u32 2147483647, %v704_v17 }
 0x7b0   :  { %v754_v32 = vor.u32 1.1754944e-38, %v753_v27  ;;  %vm752_vm14 = vcmp.eq.f32.partialorder %v751_v28, 8.507059e+37 }
 0x7b1   :  { %v717_v53 = vor.u32 1.1754944e-38, %v716_v41  ;;  %vm715_vm2 = vcmp.eq.f32.partialorder %v714_v45, 8.507059e+37 }
 0x7b4   :  { %v2755_v20 = vpop.eup %2754 }
 0x7b5   :  { %v743_v21 = vmul.f32 %v2755_v20, %v741_v13  ;;  %v2757_v23 = vpop.eup %2756  ;;  %vm748_vm11 = vweird.f32 %v2755_v20 }
 0x7b6   :  { %v706_v24 = vmul.f32 %v2757_v23, %v704_v17  ;;  %vm749_vm13 = vmor %vm747_vm12, %vm748_vm11  ;;  %vm711_vm15 = vweird.f32 %v2757_v23 }
 0x7b7   :  { %v744_v22 = vsub.f32 1.0, %v743_v21  ;;  %vm712_vm1 = vmor %vm710_vm0, %vm711_vm15 }
 0x7b8   :  { %v707_v25 = vsub.f32 1.0, %v706_v24 }
 0x7b9   :  { %v745_v46 = vmul.f32 %v2755_v20, %v744_v22 }
 0x7ba   :  { %v708_v29 = vmul.f32 %v2757_v23, %v707_v25 }
 0x7bb   :  { %v746_v26 = vadd.f32 %v2755_v20, %v745_v46 }
 0x7bc   :  { %v709_v37 = vadd.f32 %v2757_v23, %v708_v29 }
 0x7bd   :  { %v750_v30 = vsel %vm749_vm13, %v2755_v20, %v746_v26 }
 0x7be   :  { %v755_v36 = vsel %vm752_vm14, %v754_v32, %v750_v30  ;;  %v713_v47 = vsel %vm712_vm1, %v2757_v23, %v709_v37 }
 0x7bf   :  { %v718_v55 = vsel %vm715_vm2, %v717_v53, %v713_v47  ;;  %v758_v35 = vmul.f32 %v755_v36, %v3292_v54 }
 0x7c0   :  { %v721_v60 = vmul.f32 %v718_v55, %v3296_v57 }
 0x7f4   :  { %v724_v51 = vpop.permute.xlu2 %723 }
 0x7f5   :  { %v726_v56 = vmul.f32 %v724_v51, %v718_v55 }
 0x81c   :  { %v761_v33 = vpop.permute.xlu0 %760 }
 0x81d   :  { %v763_v38 = vmul.f32 %v761_v33, %v755_v36 }
 0x81f   :  { %765 = vrot.lane.b32.xlu1 %v763_v38, %s3073_s3 }
 0x827   :  { %728 = vrot.lane.b32.xlu1 %v726_v56, %s3073_s3 }
 0x891   :  { %v766_v58 = vpop.permute.xlu1 %765 }
 0x892   :  { %v3324_v59 = vadd.f32 %v766_v58, %v758_v35 }
 0x894   :  { %2758 = vtanh.f32 %v3324_v59 }
 0x899   :  { %v729_v61 = vpop.permute.xlu1 %728 }
 0x89a   :  { %v2759_v52 = vpop.eup %2758  ;;  %v3328_v62 = vadd.f32 %v729_v61, %v721_v60 }
 0x89b   :  { %771 = vrot.lane.b32.xlu0 %v2759_v52, %s3072_s11 }
 0x89c   :  { %2760 = vtanh.f32 %v3328_v62 }
 0x8a2   :  { %v2761_v63 = vpop.eup %2760 }
 0x8a3   :  { %734 = vrot.lane.b32.xlu0 %v2761_v63, %s3072_s11 }
 0x90d   :  { %v772_v2 = vpop.permute.xlu0 %771 }
 0x90e   :  { %v3333_v54 = vmul.f32 %v772_v2, %v755_v36 }
 0x910   :  { %812 = vrot.lane.b32.xlu2 %v3333_v54, %s3073_s3 }
 0x915   :  { %v735_v3 = vpop.permute.xlu0 %734 }
 0x916   :  { %v737_v5 = vmul.f32 %v735_v3, %v718_v55 }
 0x918   :  { %776 = vrot.lane.b32.xlu1 %v737_v5, %s3073_s3 }
 0x96a   :  { %v813_v57 = vpop.permute.xlu2 %812 }
 0x96b   :  { %2610 = vmatmul.msk.f32.vlgmr.msra.gmra.mxu3 %vm239_vm9, %v813_v57 }
 0x96c   :  { %1096 = vmatpush.msra.mxu3 %v3168_v14 }
 0x96e   :  { %1097 = vmatpush.msra.mxu3 %v3170_v15 }
 0x970   :  { %1098 = vmatpush.msra.mxu3 %v3179_v18 }
 0x972   :  { %1099 = vmatpush.msra.mxu3 %v3181_v19 }
 0x98a   :  { %v777_v6 = vpop.permute.xlu1 %776 }
 0x98b   :  { %780 = vst.msk [vmem:[#allocation3 + $0x18] sm:$0xff] %vm239_vm9, %v777_v6  ;;  %2609 = vmatmul.msk.f32.vlgmr.msra.gmra.mxu2 %vm239_vm9, %v777_v6 }
 0x98c   :  { %1070 = vmatpush.msra.mxu2 %v3135_v0 }
 0x98e   :  { %1071 = vmatpush.msra.mxu2 %v3137_v1 }
 0x990   :  { %1072 = vmatpush.msra.mxu2 %v3146_v4 }
 0x992   :  { %1073 = vmatpush.msra.mxu2 %v3155_v8 }
 0x9ee   :  { %v833_v7 = vpop.f32.mrf.mxu3 }
 0x9ef   :  { %v836_v9 = vadd.f32 %v833_v7, %v3218_v44 }
 0x9f1   :  { %2762 = vtanh.f32 %v836_v9  ;;  %v2612_v1 = vmul.f32 -1.442695, %v836_v9  ;;  %v2956_v9 = vld [vmem:[#allocation7 + $0x18] sm:$0xff] }
 0x9f7   :  { %v2763_v48 = vpop.eup %2762 }
 0x9f8   :  { %896 = vrot.lane.b32.xlu2 %v2763_v48, %s3072_s11  ;;  %v2957_v48 = vld [vmem:[#allocation7 + $0x10] sm:$0xff] }
 0xa0e   :  { %v807_v50 = vpop.f32.mrf.mxu2 }
 0xa0f   :  { %v810_v13 = vadd.f32 %v807_v50, %v161_v12  ;;  %v2959_v12 = vld [vmem:[#allocation7] sm:$0xff] }
 0xa11   :  { %2764 = vtanh.f32 %v810_v13  ;;  %v2611_v28 = vmul.f32 -1.442695, %v810_v13 }
 0xa12   :  { %2766 = vpow2.f32 %v2612_v1 }
 0xa17   :  { %v2765_v0 = vpop.eup %2764 }
 0xa18   :  { %859 = vrot.lane.b32.xlu1 %v2765_v0, %s3072_s11  ;;  %v2767_v4 = vpop.eup %2766 }
 0xa19   :  { %v877_v8 = vadd.f32 1.0, %v2767_v4 }
 0xa1b   :  { %2768 = vrcp.f32 %v877_v8  ;;  %v889_v22 = vand.u32 2147483648, %v877_v8  ;;  %vm883_vm4 = vweird.f32 %v877_v8  ;;  %v887_v23 = vand.u32 2147483647, %v877_v8 }
 0xa1c   :  { %2770 = vpow2.f32 %v2611_v28 }
 0xa1d   :  { %v890_v46 = vor.u32 1.1754944e-38, %v889_v22  ;;  %vm888_vm6 = vcmp.eq.f32.partialorder %v887_v23, 8.507059e+37 }
 0xa21   :  { %v2769_v16 = vpop.eup %2768 }
 0xa22   :  { %v879_v44 = vmul.f32 %v2769_v16, %v877_v8  ;;  %vm884_vm3 = vweird.f32 %v2769_v16  ;;  %v2771_v29 = vpop.eup %2770 }
 0xa23   :  { %vm885_vm5 = vmor %vm883_vm4, %vm884_vm3  ;;  %v840_v30 = vadd.f32 1.0, %v2771_v29 }
 0xa24   :  { %v880_v17 = vsub.f32 1.0, %v879_v44 }
 0xa25   :  { %2772 = vrcp.f32 %v840_v30  ;;  %v852_v41 = vand.u32 2147483648, %v840_v30  ;;  %vm846_vm8 = vweird.f32 %v840_v30  ;;  %v850_v45 = vand.u32 2147483647, %v840_v30 }
 0xa26   :  { %v881_v20 = vmul.f32 %v2769_v16, %v880_v17 }
 0xa27   :  { %v853_v51 = vor.u32 1.1754944e-38, %v852_v41  ;;  %vm851_vm11 = vcmp.eq.f32.partialorder %v850_v45, 8.507059e+37 }
 0xa28   :  { %v882_v21 = vadd.f32 %v2769_v16, %v881_v20 }
 0xa2a   :  { %v886_v24 = vsel %vm885_vm5, %v2769_v16, %v882_v21 }
 0xa2b   :  { %v891_v26 = vsel %vm888_vm6, %v890_v46, %v886_v24  ;;  %v2773_v32 = vpop.eup %2772 }
 0xa2c   :  { %v842_v33 = vmul.f32 %v2773_v32, %v840_v30  ;;  %vm847_vm7 = vweird.f32 %v2773_v32  ;;  %v894_v35 = vmul.f32 %v891_v26, %v3324_v59 }
 0xa2d   :  { %vm848_vm10 = vmor %vm846_vm8, %vm847_vm7 }
 0xa2e   :  { %v843_v36 = vsub.f32 1.0, %v842_v33 }
 0xa30   :  { %v844_v37 = vmul.f32 %v2773_v32, %v843_v36 }
 0xa32   :  { %v845_v38 = vadd.f32 %v2773_v32, %v844_v37 }
 0xa34   :  { %v849_v47 = vsel %vm848_vm10, %v2773_v32, %v845_v38 }
 0xa35   :  { %v854_v55 = vsel %vm851_vm11, %v853_v51, %v849_v47 }
 0xa36   :  { %v857_v52 = vmul.f32 %v854_v55, %v3328_v62 }
 0xa52   :  { %v897_v25 = vpop.permute.xlu2 %896 }
 0xa53   :  { %v899_v27 = vmul.f32 %v897_v25, %v891_v26 }
 0xa55   :  { %901 = vrot.lane.b32.xlu0 %v899_v27, %s3073_s3 }
 0xa8a   :  { %v860_v53 = vpop.permute.xlu1 %859 }
 0xa8b   :  { %v862_v56 = vmul.f32 %v860_v53, %v854_v55 }
 0xa8d   :  { %864 = vrot.lane.b32.xlu0 %v862_v56, %s3073_s3 }
 0xac7   :  { %v902_v58 = vpop.permute.xlu0 %901 }
 0xac8   :  { %v3356_v60 = vadd.f32 %v902_v58, %v894_v35 }
 0xaca   :  { %2774 = vtanh.f32 %v3356_v60 }
 0xad0   :  { %v2775_v61 = vpop.eup %2774 }
 0xad1   :  { %907 = vrot.lane.b32.xlu2 %v2775_v61, %s3072_s11 }
 0xaff   :  { %v865_v63 = vpop.permute.xlu0 %864 }
 0xb00   :  { %v3361_v2 = vadd.f32 %v865_v63, %v857_v52 }
 0xb02   :  { %2776 = vtanh.f32 %v3361_v2 }
 0xb08   :  { %v2777_v3 = vpop.eup %2776 }
 0xb09   :  { %870 = vrot.lane.b32.xlu2 %v2777_v3, %s3072_s11 }
 0xb2b   :  { %v908_v5 = vpop.permute.xlu2 %907 }
 0xb2c   :  { %v3365_v59 = vmul.f32 %v908_v5, %v891_v26 }
 0xb2e   :  { %946 = vrot.lane.b32.xlu1 %v3365_v59, %s3073_s3 }
 0xb63   :  { %v871_v57 = vpop.permute.xlu2 %870 }
 0xb64   :  { %v873_v6 = vmul.f32 %v871_v57, %v854_v55 }
 0xb66   :  { %912 = vrot.lane.b32.xlu0 %v873_v6, %s3073_s3 }
 0xba0   :  { %v947_v7 = vpop.permute.xlu1 %946 }
 0xba1   :  { %2614 = vmatmul.msk.f32.vlgmr.msrb.gmra.mxu3 %vm239_vm9, %v947_v7 }
 0xba2   :  { %1230 = vmatpush.msrb.mxu3 %v3168_v14 }
 0xba4   :  { %1231 = vmatpush.msrb.mxu3 %v3170_v15 }
 0xba6   :  { %1232 = vmatpush.msrb.mxu3 %v3179_v18 }
 0xba8   :  { %1233 = vmatpush.msrb.mxu3 %v3181_v19  ;;  %v163_v19 = vpop.f32.mrf.mxu0 }
 0xba9   :  { %v164_v50 = vadd.f32 %v163_v19, %v3208_v31 }
 0xbd8   :  { %v3375_v62 = vpop.permute.xlu0 %912 }
 0xbd9   :  { %2613 = vmatmul.msk.f32.vlgmr.msrb.gmra.mxu2 %vm239_vm9, %v3375_v62 }
 0xbda   :  { %1204 = vmatpush.msrb.mxu2 %v2956_v9 }
 0xbdc   :  { %1205 = vmatpush.msrb.mxu2 %v2957_v48 }
 0xbde   :  { %1206 = vmatpush.msrb.mxu2 %v2958_v11 }
 0xbe0   :  { %1207 = vmatpush.msrb.mxu2 %v2959_v12 }
 0xc24   :  { %v967_v14 = vpop.f32.mrf.mxu3 }
 0xc25   :  { %v970_v15 = vadd.f32 %v967_v14, %v3216_v42 }
 0xc27   :  { %2778 = vtanh.f32 %v970_v15  ;;  %v2616_v4 = vmul.f32 -1.442695, %v970_v15  ;;  %v166_v15 = vpop.f32.mrf.mxu0 }
 0xc2d   :  { %v2779_v18 = vpop.eup %2778 }
 0xc2e   :  { %1030 = vrot.lane.b32.xlu1 %v2779_v18, %s3072_s11  ;;  %v167_v18 = vadd.f32 %v166_v15, %v3208_v31 }
 0xc5c   :  { %v941_v13 = vpop.f32.mrf.mxu2 }
 0xc5d   :  { %v944_v0 = vadd.f32 %v941_v13, %v164_v50 }
 0xc5f   :  { %2780 = vtanh.f32 %v944_v0  ;;  %v2615_v28 = vmul.f32 -1.442695, %v944_v0 }
 0xc60   :  { %2782 = vpow2.f32 %v2616_v4 }
 0xc65   :  { %v2781_v1 = vpop.eup %2780 }
 0xc66   :  { %993 = vrot.lane.b32.xlu0 %v2781_v1, %s3072_s11  ;;  %v2783_v8 = vpop.eup %2782 }
 0xc67   :  { %v1011_v16 = vadd.f32 1.0, %v2783_v8 }
 0xc69   :  { %2784 = vrcp.f32 %v1011_v16  ;;  %v1023_v22 = vand.u32 2147483648, %v1011_v16  ;;  %vm1017_vm13 = vweird.f32 %v1011_v16  ;;  %v1021_v23 = vand.u32 2147483647, %v1011_v16 }
 0xc6a   :  { %2786 = vpow2.f32 %v2615_v28 }
 0xc6b   :  { %v1024_v46 = vor.u32 1.1754944e-38, %v1023_v22  ;;  %vm1022_vm15 = vcmp.eq.f32.partialorder %v1021_v23, 8.507059e+37 }
 0xc6f   :  { %v2785_v44 = vpop.eup %2784 }
 0xc70   :  { %v1013_v42 = vmul.f32 %v2785_v44, %v1011_v16  ;;  %vm1018_vm12 = vweird.f32 %v2785_v44  ;;  %v2787_v29 = vpop.eup %2786 }
 0xc71   :  { %vm1019_vm14 = vmor %vm1017_vm13, %vm1018_vm12  ;;  %v974_v30 = vadd.f32 1.0, %v2787_v29 }
 0xc72   :  { %v1014_v17 = vsub.f32 1.0, %v1013_v42 }
 0xc73   :  { %2788 = vrcp.f32 %v974_v30  ;;  %v986_v41 = vand.u32 2147483648, %v974_v30  ;;  %vm980_vm1 = vweird.f32 %v974_v30  ;;  %v984_v45 = vand.u32 2147483647, %v974_v30 }
 0xc74   :  { %v1015_v20 = vmul.f32 %v2785_v44, %v1014_v17 }
 0xc75   :  { %v987_v51 = vor.u32 1.1754944e-38, %v986_v41  ;;  %vm985_vm3 = vcmp.eq.f32.partialorder %v984_v45, 8.507059e+37 }
 0xc76   :  { %v1016_v21 = vadd.f32 %v2785_v44, %v1015_v20 }
 0xc78   :  { %v1020_v24 = vsel %vm1019_vm14, %v2785_v44, %v1016_v21 }
 0xc79   :  { %v1025_v26 = vsel %vm1022_vm15, %v1024_v46, %v1020_v24  ;;  %v2789_v32 = vpop.eup %2788 }
 0xc7a   :  { %v976_v33 = vmul.f32 %v2789_v32, %v974_v30  ;;  %vm981_vm0 = vweird.f32 %v2789_v32  ;;  %v1028_v35 = vmul.f32 %v1025_v26, %v3356_v60 }
 0xc7b   :  { %vm982_vm2 = vmor %vm980_vm1, %vm981_vm0 }
 0xc7c   :  { %v977_v36 = vsub.f32 1.0, %v976_v33 }
 0xc7e   :  { %v978_v37 = vmul.f32 %v2789_v32, %v977_v36 }
 0xc80   :  { %v979_v38 = vadd.f32 %v2789_v32, %v978_v37 }
 0xc82   :  { %v983_v47 = vsel %vm982_vm2, %v2789_v32, %v979_v38 }
 0xc83   :  { %v988_v55 = vsel %vm985_vm3, %v987_v51, %v983_v47 }
 0xc84   :  { %v991_v63 = vmul.f32 %v988_v55, %v3361_v2 }
 0xca0   :  { %v1031_v25 = vpop.permute.xlu1 %1030 }
 0xca1   :  { %v1033_v27 = vmul.f32 %v1031_v25, %v1025_v26 }
 0xca3   :  { %1035 = vrot.lane.b32.xlu2 %v1033_v27, %s3073_s3 }
 0xcd8   :  { %v994_v53 = vpop.permute.xlu0 %993 }
 0xcd9   :  { %v996_v56 = vmul.f32 %v994_v53, %v988_v55 }
 0xcdb   :  { %998 = vrot.lane.b32.xlu2 %v996_v56, %s3073_s3 }
 0xcfd   :  { %v1036_v58 = vpop.permute.xlu2 %1035 }
 0xcfe   :  { %v3386_v61 = vadd.f32 %v1036_v58, %v1028_v35 }
 0xd00   :  { %2790 = vtanh.f32 %v3386_v61 }
 0xd06   :  { %v2791_v52 = vpop.eup %2790 }
 0xd07   :  { %1041 = vrot.lane.b32.xlu1 %v2791_v52, %s3072_s11 }
 0xd35   :  { %v999_v3 = vpop.permute.xlu2 %998 }
 0xd36   :  { %v3391_v5 = vadd.f32 %v999_v3, %v991_v63 }
 0xd38   :  { %2792 = vtanh.f32 %v3391_v5 }
 0xd3e   :  { %v2793_v57 = vpop.eup %2792 }
 0xd3f   :  { %1004 = vrot.lane.b32.xlu1 %v2793_v57, %s3072_s11 }
 0xd79   :  { %v1042_v6 = vpop.permute.xlu1 %1041 }
 0xd7a   :  { %v3395_v60 = vmul.f32 %v1042_v6, %v1025_v26 }
 0xd7c   :  { %1080 = vrot.lane.b32.xlu0 %v3395_v60, %s3073_s3 }
 0xdb1   :  { %v1005_v7 = vpop.permute.xlu1 %1004 }
 0xdb2   :  { %v1007_v9 = vmul.f32 %v1005_v7, %v988_v55 }
 0xdb4   :  { %1046 = vrot.lane.b32.xlu2 %v1007_v9, %s3073_s3 }
 0xdee   :  { %v1081_v48 = vpop.permute.xlu0 %1080 }
 0xdef   :  { %2618 = vmatmul.msk.f32.vlgmr.msra.gmra.mxu3 %vm239_vm9, %v1081_v48 }
 0xe0e   :  { %v3401_v2 = vpop.permute.xlu2 %1046 }
 0xe0f   :  { %2617 = vmatmul.msk.f32.vlgmr.msra.gmra.mxu2 %vm239_vm9, %v3401_v2 }
 0xe72   :  { %v1101_v11 = vpop.f32.mrf.mxu3 }
 0xe73   :  { %v1104_v12 = vadd.f32 %v1101_v11, %v3213_v39 }
 0xe75   :  { %2794 = vtanh.f32 %v1104_v12  ;;  %v2620_v0 = vmul.f32 -1.442695, %v1104_v12 }
 0xe7b   :  { %v2795_v14 = vpop.eup %2794 }
 0xe7c   :  { %1164 = vrot.lane.b32.xlu0 %v2795_v14, %s3072_s11  ;;  %v169_v14 = vpop.f32.mrf.mxu0 }
 0xe7d   :  { %v170_v15 = vadd.f32 %v169_v14, %v3208_v31  ;;  %v1338_v14 = vld [vmem:[%s3869_s4 + $0x38] sm:$0xff] }
 0xe92   :  { %v1075_v19 = vpop.f32.mrf.mxu2 }
 0xe93   :  { %v1078_v50 = vadd.f32 %v1075_v19, %v167_v18 }
 0xe95   :  { %2796 = vtanh.f32 %v1078_v50  ;;  %v2619_v1 = vmul.f32 -1.442695, %v1078_v50 }
 0xe96   :  { %2798 = vpow2.f32 %v2620_v0 }
 0xe97   :  { %2800 = vpow2.f32 %v2619_v1 }
 0xe9b   :  { %v2797_v13 = vpop.eup %2796 }
 0xe9c   :  { %1127 = vrot.lane.b32.xlu2 %v2797_v13, %s3072_s11  ;;  %v2799_v4 = vpop.eup %2798 }
 0xe9d   :  { %v1145_v8 = vadd.f32 1.0, %v2799_v4  ;;  %v2801_v39 = vpop.eup %2800 }
 0xe9e   :  { %v1108_v16 = vadd.f32 1.0, %v2801_v39 }
 0xe9f   :  { %2802 = vrcp.f32 %v1145_v8  ;;  %v1157_v46 = vand.u32 2147483648, %v1145_v8  ;;  %vm1151_vm5 = vweird.f32 %v1145_v8  ;;  %v1155_v25 = vand.u32 2147483647, %v1145_v8 }
 0xea0   :  { %2804 = vrcp.f32 %v1108_v16  ;;  %v1120_v36 = vand.u32 2147483648, %v1108_v16  ;;  %vm1114_vm10 = vweird.f32 %v1108_v16  ;;  %v1118_v37 = vand.u32 2147483647, %v1108_v16 }
 0xea1   :  { %v1158_v28 = vor.u32 1.1754944e-38, %v1157_v46  ;;  %vm1156_vm7 = vcmp.eq.f32.partialorder %v1155_v25, 8.507059e+37 }
 0xea2   :  { %v1121_v41 = vor.u32 1.1754944e-38, %v1120_v36  ;;  %vm1119_vm12 = vcmp.eq.f32.partialorder %v1118_v37, 8.507059e+37 }
 0xea5   :  { %v2803_v44 = vpop.eup %2802 }
 0xea6   :  { %v1147_v42 = vmul.f32 %v2803_v44, %v1145_v8  ;;  %v2805_v20 = vpop.eup %2804  ;;  %vm1152_vm4 = vweird.f32 %v2803_v44 }
 0xea7   :  { %v1110_v22 = vmul.f32 %v2805_v20, %v1108_v16  ;;  %vm1153_vm6 = vmor %vm1151_vm5, %vm1152_vm4  ;;  %vm1115_vm8 = vweird.f32 %v2805_v20  ;;  %vm371_vm5 = vcmask 523520  }
 0xea8   :  { %v1148_v17 = vsub.f32 1.0, %v1147_v42  ;;  %vm1116_vm11 = vmor %vm1114_vm10, %vm1115_vm8 }
 0xea9   :  { %v1111_v24 = vsub.f32 1.0, %v1110_v22 }
 0xeaa   :  { %v1149_v21 = vmul.f32 %v2803_v44, %v1148_v17 }
 0xeab   :  { %v1112_v27 = vmul.f32 %v2805_v20, %v1111_v24 }
 0xeac   :  { %v1150_v23 = vadd.f32 %v2803_v44, %v1149_v21 }
 0xead   :  { %v1113_v33 = vadd.f32 %v2805_v20, %v1112_v27 }
 0xeae   :  { %v1154_v26 = vsel %vm1153_vm6, %v2803_v44, %v1150_v23  ;;  %vm1353_vm6 = vcmask 523264  }
 0xeaf   :  { %v1159_v30 = vsel %vm1156_vm7, %v1158_v28, %v1154_v26  ;;  %v1117_v38 = vsel %vm1116_vm11, %v2805_v20, %v1113_v33 }
 0xeb0   :  { %v1122_v47 = vsel %vm1119_vm12, %v1121_v41, %v1117_v38  ;;  %v1162_v53 = vmul.f32 %v1159_v30, %v3386_v61 }
 0xeb1   :  { %v1125_v35 = vmul.f32 %v1122_v47, %v3391_v5 }
 0xeee   :  { %v1165_v29 = vpop.permute.xlu0 %1164 }
 0xeef   :  { %v1167_v32 = vmul.f32 %v1165_v29, %v1159_v30 }
 0xef1   :  { %1169 = vrot.lane.b32.xlu1 %v1167_v32, %s3073_s3 }
 0xef6   :  { %v1128_v45 = vpop.permute.xlu2 %1127 }
 0xef7   :  { %v1130_v51 = vmul.f32 %v1128_v45, %v1122_v47 }
 0xef9   :  { %1132 = vrot.lane.b32.xlu1 %v1130_v51, %s3073_s3 }
 0xf63   :  { %v1170_v55 = vpop.permute.xlu1 %1169 }
 0xf64   :  { %v3412_v56 = vadd.f32 %v1170_v55, %v1162_v53 }
 0xf66   :  { %2806 = vtanh.f32 %v3412_v56 }
 0xf6b   :  { %v1133_v58 = vpop.permute.xlu1 %1132 }
 0xf6c   :  { %v2807_v52 = vpop.eup %2806  ;;  %v3416_v63 = vadd.f32 %v1133_v58, %v1125_v35 }
 0xf6d   :  { %1175 = vrot.lane.b32.xlu0 %v2807_v52, %s3072_s11 }
 0xf6e   :  { %2808 = vtanh.f32 %v3416_v63 }
 0xf74   :  { %v2809_v3 = vpop.eup %2808 }
 0xf75   :  { %1138 = vrot.lane.b32.xlu0 %v2809_v3, %s3072_s11 }
 0xfdf   :  { %v1176_v57 = vpop.permute.xlu0 %1175 }
 0xfe0   :  { %v3421_v61 = vmul.f32 %v1176_v57, %v1159_v30  ;;  %v1340_v57 = vld [vmem:[%s3869_s4 + $0x48] sm:$0xff] }
 0xfe2   :  { %1214 = vrot.lane.b32.xlu2 %v3421_v61, %s3073_s3 }
 0xfe7   :  { %v1139_v6 = vpop.permute.xlu0 %1138 }
 0xfe8   :  { %v1141_v7 = vmul.f32 %v1139_v6, %v1122_v47  ;;  %v1343_v6 = vld [vmem:[%s3869_s4 + $0x60] sm:$0xff] }
 0xfea   :  { %1180 = vrot.lane.b32.xlu1 %v1141_v7, %s3073_s3  ;;  %v3484_v7 = vld [vmem:[#allocation9 + $0x18] sm:$0xff] }
 0xfeb   :  { %1499 = vmatpush.msra.mxu2 %v3484_v7 }
0x103c   :  { %v1215_v5 = vpop.permute.xlu2 %1214 }
0x103d   :  { %2622 = vmatmul.msk.f32.vlgmr.msrb.gmra.mxu3 %vm239_vm9, %v1215_v5  ;;  %v1341_v5 = vld [vmem:[%s3869_s4 + $0x50] sm:$0xff] }
0x105c   :  { %v3427_v9 = vpop.permute.xlu1 %1180 }
0x105d   :  { %2621 = vmatmul.msk.f32.vlgmr.msrb.gmra.mxu2 %vm239_vm9, %v3427_v9 }
0x10c0   :  { %v1235_v48 = vpop.f32.mrf.mxu3 }
0x10c1   :  { %v1238_v11 = vadd.f32 %v1235_v48, %v3210_v34  ;;  %v1339_v48 = vld [vmem:[%s3869_s4 + $0x40] sm:$0xff] }
0x10c3   :  { %2810 = vtanh.f32 %v1238_v11  ;;  %v2624_v13 = vmul.f32 -1.442695, %v1238_v11 }
0x10c9   :  { %v2811_v12 = vpop.eup %2810 }
0x10ca   :  { %1298 = vrot.lane.b32.xlu2 %v2811_v12, %s3072_s11 }
0x10e0   :  { %v1209_v18 = vpop.f32.mrf.mxu2 }
0x10e1   :  { %v1212_v19 = vadd.f32 %v1209_v18, %v170_v15  ;;  %v1337_v15 = vld [vmem:[%s3869_s4 + $0x30] sm:$0xff]  ;;  %v3506_v18 = vld [vmem:[#allocation9 + $0x8] sm:$0xff] }
0x10e3   :  { %2812 = vtanh.f32 %v1212_v19  ;;  %v2623_v23 = vmul.f32 -1.442695, %v1212_v19  ;;  %v1335_v19 = vld [vmem:[%s3869_s4 + $0x20] sm:$0xff] }
0x10e4   :  { %2814 = vpow2.f32 %v2624_v13  ;;  %v3514_v13 = vld [vmem:[#allocation9] sm:$0xff] }
0x10e9   :  { %v2813_v50 = vpop.eup %2812 }
0x10ea   :  { %1261 = vrot.lane.b32.xlu1 %v2813_v50, %s3072_s11  ;;  %v2815_v0 = vpop.eup %2814  ;;  %v1336_v50 = vld [vmem:[%s3869_s4 + $0x28] sm:$0xff] }
0x10eb   :  { %v1279_v1 = vadd.f32 1.0, %v2815_v0 }
0x10ed   :  { %2816 = vrcp.f32 %v1279_v1  ;;  %v1291_v44 = vand.u32 2147483648, %v1279_v1  ;;  %vm1285_vm14 = vweird.f32 %v1279_v1  ;;  %v1289_v31 = vand.u32 2147483647, %v1279_v1 }
0x10ee   :  { %2818 = vpow2.f32 %v2623_v23 }
0x10ef   :  { %v1292_v17 = vor.u32 1.1754944e-38, %v1291_v44  ;;  %vm1290_vm0 = vcmp.eq.f32.partialorder %v1289_v31, 8.507059e+37 }
0x10f3   :  { %v2817_v4 = vpop.eup %2816 }
0x10f4   :  { %v1281_v34 = vmul.f32 %v2817_v4, %v1279_v1  ;;  %vm1286_vm13 = vweird.f32 %v2817_v4  ;;  %v2819_v24 = vpop.eup %2818  ;;  %v1333_v1 = vld [vmem:[%s3869_s4 + $0x10] sm:$0xff] }
0x10f5   :  { %vm1287_vm15 = vmor %vm1285_vm14, %vm1286_vm13  ;;  %v1242_v46 = vadd.f32 1.0, %v2819_v24  ;;  %v3566_v24 = vld [vmem:[#allocation9 + $0x28] sm:$0xff] }
0x10f6   :  { %v1282_v8 = vsub.f32 1.0, %v1281_v34  ;;  %v1331_v34 = vld [vmem:[%s3869_s4] sm:$0xff] }
0x10f7   :  { %2820 = vrcp.f32 %v1242_v46  ;;  %v1254_v30 = vand.u32 2147483648, %v1242_v46  ;;  %vm1248_vm2 = vweird.f32 %v1242_v46  ;;  %v1252_v32 = vand.u32 2147483647, %v1242_v46 }
0x10f8   :  { %v1283_v39 = vmul.f32 %v2817_v4, %v1282_v8  ;;  %v1332_v8 = vld [vmem:[%s3869_s4 + $0x8] sm:$0xff] }
0x10f9   :  { %v1255_v36 = vor.u32 1.1754944e-38, %v1254_v30  ;;  %vm1253_vm4 = vcmp.eq.f32.partialorder %v1252_v32, 8.507059e+37 }
0x10fa   :  { %v1284_v16 = vadd.f32 %v2817_v4, %v1283_v39 }
0x10fc   :  { %v1288_v42 = vsel %vm1287_vm15, %v2817_v4, %v1284_v16  ;;  %v1334_v4 = vld [vmem:[%s3869_s4 + $0x18] sm:$0xff] }
0x10fd   :  { %v1293_v21 = vsel %vm1290_vm0, %v1292_v17, %v1288_v42  ;;  %v2821_v25 = vpop.eup %2820 }
0x10fe   :  { %v1244_v26 = vmul.f32 %v2821_v25, %v1242_v46  ;;  %vm1249_vm1 = vweird.f32 %v2821_v25  ;;  %v1296_v45 = vmul.f32 %v1293_v21, %v3412_v56  ;;  %v3568_v46 = vld [vmem:[#allocation9 + $0x20] sm:$0xff] }
0x10ff   :  { %vm1250_vm3 = vmor %vm1248_vm2, %vm1249_vm1 }
0x1100   :  { %v1245_v27 = vsub.f32 1.0, %v1244_v26 }
0x1102   :  { %v1246_v28 = vmul.f32 %v2821_v25, %v1245_v27  ;;  %v1347_v27 = vld [vmem:[%s3871_s6] sm:$0x3]  ;;  %s3074_s6 = smov 96  }
0x1104   :  { %v1247_v29 = vadd.f32 %v2821_v25, %v1246_v28  ;;  %v3589_v28 = vperm.slane %v1347_v27, 0 }
0x1106   :  { %v1251_v33 = vsel %vm1250_vm3, %v2821_v25, %v1247_v29 }
0x1107   :  { %v1256_v38 = vsel %vm1253_vm4, %v1255_v36, %v1251_v33 }
0x1108   :  { %v1259_v55 = vmul.f32 %v1256_v38, %v3416_v63 }
0x1124   :  { %v1299_v20 = vpop.permute.xlu2 %1298 }
0x1125   :  { %v1301_v22 = vmul.f32 %v1299_v20, %v1293_v21  ;;  %v3554_v20 = vld [vmem:[#allocation9 + $0x38] sm:$0xff] }
0x1126   :  { %1522 = vmatpush.msra.mxu3 %v3554_v20 }
0x1127   :  { %1303 = vrot.lane.b32.xlu0 %v1301_v22, %s3073_s3 }
0x115c   :  { %v1262_v37 = vpop.permute.xlu1 %1261 }
0x115d   :  { %v1264_v41 = vmul.f32 %v1262_v37, %v1256_v38 }
0x115f   :  { %1266 = vrot.lane.b32.xlu0 %v1264_v41, %s3073_s3 }
0x1199   :  { %v1304_v47 = vpop.permute.xlu0 %1303 }
0x119a   :  { %v1306_v51 = vadd.f32 %v1304_v47, %v1296_v45 }
0x119c   :  { %2822 = vtanh.f32 %v1306_v51 }
0x11a2   :  { %v2823_v53 = vpop.eup %2822 }
0x11a3   :  { %1309 = vrot.lane.b32.xlu2 %v2823_v53, %s3072_s11 }
0x11ab   :  { %1185 = vrot.lane.b32.xlu2 %v3421_v61, %s3072_s11  ;;  %v1345_v61 = vld [vmem:[%s3869_s4 + $0x70] sm:$0xff] }
0x11ac   :  { %1386 = vmatpush.msrb.mxu0 %v1345_v61 }
0x11ae   :  { %1387 = vmatpush.msrb.mxu0 %v1343_v6 }
0x11b0   :  { %1388 = vmatpush.msrb.mxu0 %v1341_v5 }
0x11b2   :  { %1389 = vmatpush.msrb.mxu0 %v1339_v48 }
0x11b3   :  { %917 = vrot.lane.b32.xlu2 %v3365_v59, %s3072_s11 }
0x11b4   :  { %1390 = vmatpush.msrb.mxu0 %v1337_v15 }
0x11b6   :  { %1391 = vmatpush.msrb.mxu0 %v1335_v19 }
0x11b8   :  { %1392 = vmatpush.msrb.mxu0 %v1333_v1 }
0x11ba   :  { %1393 = vmatpush.msrb.mxu0 %v1331_v34 }
0x11bb   :  { %506 = vrot.lane.b32.xlu2 %v3269_v40, %s3072_s11 }
0x11d1   :  { %v1267_v35 = vpop.permute.xlu0 %1266 }
0x11d2   :  { %v1269_v58 = vadd.f32 %v1267_v35, %v1259_v55 }
0x11d4   :  { %2824 = vtanh.f32 %v1269_v58  ;;  %v3446_v56 = vadd.f32 %v1306_v51, %v1269_v58 }
0x11da   :  { %v2825_v52 = vpop.eup %2824 }
0x11db   :  { %1272 = vrot.lane.b32.xlu0 %v2825_v52, %s3072_s11  ;;  %v3607_v52 = vperm.slane %v1347_v27, 1 }
0x11e3   :  { %782 = vrot.lane.b32.xlu0 %v3333_v54, %s3072_s11  ;;  %v1346_v54 = vld [vmem:[%s3869_s4 + $0x78] sm:$0xff] }
0x11e4   :  { %1427 = vmatpush.msrb.mxu1 %v1346_v54 }
0x11eb   :  { %367 = vrot.lane.b32.xlu0 %v3238_v49, %s3072_s11 }
0x11fd   :  { %v1310_v59 = vpop.permute.xlu2 %1309 }
0x11fe   :  { %v3453_v3 = vmul.f32 %v1310_v59, %v1293_v21  ;;  %v3556_v21 = vld [vmem:[#allocation9 + $0x30] sm:$0xff] }
0x11ff   :  { %1523 = vmatpush.msra.mxu3 %v3556_v21 }
0x1200   :  { %1319 = vrot.lane.b32.xlu1 %v3453_v3, %s3072_s11 }
0x1201   :  { %1524 = vmatpush.msra.mxu3 %v3566_v24 }
0x1203   :  { %1525 = vmatpush.msra.mxu3 %v3568_v46 }
0x1204   :  { %1526 = vmatmul.f32.vlgmr.msra.gmra.mxu3 %v3071_v10 }
0x1205   :  { %v1186_v40 = vpop.permute.xlu2 %1185  ;;  %1652 = vmatpush.msrb.mxu3 %v3554_v20 }
0x1206   :  { %1188 = vst.msk [vmem:[#allocation3 + $0x8] sm:$0xff] %vm371_vm5, %v1186_v40 }
0x1207   :  { %1653 = vmatpush.msrb.mxu3 %v3556_v21 }
0x1208   :  { %1051 = vrot.lane.b32.xlu1 %v3395_v60, %s3072_s11  ;;  %v1344_v60 = vld [vmem:[%s3869_s4 + $0x68] sm:$0xff] }
0x1209   :  { %1428 = vmatpush.msrb.mxu1 %v1344_v60  ;;  %1654 = vmatpush.msrb.mxu3 %v3566_v24 }
0x120b   :  { %1655 = vmatpush.msrb.mxu3 %v3568_v46 }
0x120d   :  { %v918_v63 = vpop.permute.xlu2 %917  ;;  %v1324_v42 = vld [vmem:[#allocation3 + $0x8] sm:$0xff]  ;;  %1782 = vmatpush.msra.mxu3 %v3554_v20 }
0x120e   :  { %920 = vst.msk [vmem:[#allocation3 + $0x18] sm:$0xff] %vm371_vm5, %v918_v63 }
0x120f   :  { %1783 = vmatpush.msra.mxu3 %v3556_v21 }
0x1210   :  { %644 = vrot.lane.b32.xlu1 %v3301_v43, %s3072_s11  ;;  %v1342_v43 = vld [vmem:[%s3869_s4 + $0x58] sm:$0xff] }
0x1211   :  { %1429 = vmatpush.msrb.mxu1 %v1342_v43  ;;  %1784 = vmatpush.msra.mxu3 %v3566_v24 }
0x1213   :  { %1430 = vmatpush.msrb.mxu1 %v1340_v57  ;;  %1785 = vmatpush.msra.mxu3 %v3568_v46 }
0x1215   :  { %v507_v49 = vpop.permute.xlu2 %506  ;;  %1431 = vmatpush.msrb.mxu1 %v1338_v14  ;;  %v1326_v22 = vld [vmem:[#allocation3 + $0x18] sm:$0xff] }
0x1216   :  { %510 = vst.msk [vmem:[#allocation3 + $0x30] sm:$0xff] %vm371_vm5, %v507_v49 }
0x1217   :  { %1183 = vst.msk [vmem:[#allocation3 + $0x30] sm:$0xff] %vm239_vm9, %v3427_v9  ;;  %v3490_v9 = vld [vmem:[#allocation9 + $0x10] sm:$0xff]  ;;  %1432 = vmatpush.msrb.mxu1 %v1336_v50 }
0x1218   :  { %1500 = vmatpush.msra.mxu2 %v3490_v9 }
0x1219   :  { %1433 = vmatpush.msrb.mxu1 %v1334_v4 }
0x121a   :  { %1501 = vmatpush.msra.mxu2 %v3506_v18 }
0x121b   :  { %1434 = vmatpush.msrb.mxu1 %v1332_v8 }
0x121c   :  { %1502 = vmatpush.msra.mxu2 %v3514_v13 }
0x121d   :  { %1503 = vmatmul.f32.vlgmr.msra.gmra.mxu2 %v3071_v10 }
0x121e   :  { %1624 = vmatpush.msrb.mxu2 %v3484_v7  ;;  %v1329_v25 = vld [vmem:[#allocation3 + $0x30] sm:$0xff] }
0x1220   :  { %1625 = vmatpush.msrb.mxu2 %v3490_v9 }
0x1222   :  { %1626 = vmatpush.msrb.mxu2 %v3506_v18 }
0x1224   :  { %1627 = vmatpush.msrb.mxu2 %v3514_v13 }
0x1226   :  { %1754 = vmatpush.msra.mxu2 %v3484_v7 }
0x1228   :  { %1755 = vmatpush.msra.mxu2 %v3490_v9 }
0x122a   :  { %1756 = vmatpush.msra.mxu2 %v3506_v18 }
0x122c   :  { %1757 = vmatpush.msra.mxu2 %v3514_v13 }
0x124d   :  { %v1273_v11 = vpop.permute.xlu0 %1272 }
0x124e   :  { %v3496_v12 = vmul.f32 %v1273_v11, %v1256_v38 }
0x1250   :  { %1314 = vrot.lane.b32.xlu1 %v3496_v12, %s3073_s3 }
0x1255   :  { %v783_v0 = vpop.permute.xlu0 %782 }
0x1256   :  { %786 = vst.msk [vmem:[#allocation3 + $0x20] sm:$0xff] %vm371_vm5, %v783_v0 }
0x1257   :  { %915 = vst.msk [vmem:[#allocation3 + $0x20] sm:$0xff] %vm239_vm9, %v3375_v62 }
0x125d   :  { %v368_v62 = vpop.permute.xlu0 %367 }
0x125e   :  { %372 = vst.msk [vmem:[#allocation3 + $0x38] sm:$0xff] %vm371_vm5, %v368_v62  ;;  %v1327_v23 = vld [vmem:[#allocation3 + $0x20] sm:$0xff] }
0x1272   :  { %v1320_v39 = vpop.permute.xlu1 %1319 }
0x1273   :  { %1322 = vst.msk [vmem:[#allocation3] sm:$0xff] %vm371_vm5, %v1320_v39 }
0x127a   :  { %v1052_v16 = vpop.permute.xlu1 %1051  ;;  %v1323_v44 = vld [vmem:[#allocation3] sm:$0xff] }
0x127b   :  { %1054 = vst.msk [vmem:[#allocation3 + $0x10] sm:$0xff] %vm371_vm5, %v1052_v16  ;;  %2625 = vmatmul.msk.f32.vlgmr.msrb.gmra.mxu0 %vm1353_vm6, %v1323_v44  ;;  %2633 = vmatmul.msk.f32.vlgmr.msrb.gmra.mxu1 %vm1353_vm6, %v1323_v44 }
0x1282   :  { %v645_v31 = vpop.permute.xlu1 %644  ;;  %v1325_v17 = vld [vmem:[#allocation3 + $0x10] sm:$0xff] }
0x1283   :  { %648 = vst.msk [vmem:[#allocation3 + $0x28] sm:$0xff] %vm371_vm5, %v645_v31  ;;  %2626 = vmatmul.msk.f32.gmra.mxu0 %vm1353_vm6, %v1324_v42  ;;  %2634 = vmatmul.msk.f32.gmra.mxu1 %vm1353_vm6, %v1324_v42 }
0x1284   :  { %1049 = vst.msk [vmem:[#allocation3 + $0x28] sm:$0xff] %vm239_vm9, %v3401_v2 }
0x1287   :  { %v1527_v63 = vpop.f32.mrf.mxu3 }
0x128b   :  { %2627 = vmatmul.msk.f32.gmra.mxu0 %vm1353_vm6, %v1325_v17  ;;  %2635 = vmatmul.msk.f32.gmra.mxu1 %vm1353_vm6, %v1325_v17  ;;  %v1328_v2 = vld [vmem:[#allocation3 + $0x28] sm:$0xff] }
0x1293   :  { %2628 = vmatmul.msk.f32.gmra.mxu0 %vm1353_vm6, %v1326_v22  ;;  %2636 = vmatmul.msk.f32.gmra.mxu1 %vm1353_vm6, %v1326_v22 }
0x129b   :  { %2629 = vmatmul.msk.f32.gmra.mxu0 %vm1353_vm6, %v1327_v23  ;;  %2637 = vmatmul.msk.f32.gmra.mxu1 %vm1353_vm6, %v1327_v23 }
0x12a0   :  { %v1504_v30 = vpop.f32.mrf.mxu2 }
0x12a3   :  { %2630 = vmatmul.msk.f32.gmra.mxu0 %vm1353_vm6, %v1328_v2  ;;  %2638 = vmatmul.msk.f32.gmra.mxu1 %vm1353_vm6, %v1328_v2 }
0x12ab   :  { %2631 = vmatmul.msk.f32.gmra.mxu0 %vm1353_vm6, %v1329_v25  ;;  %2639 = vmatmul.msk.f32.gmra.mxu1 %vm1353_vm6, %v1329_v25 }
0x12c2   :  { %v1315_v10 = vpop.permute.xlu1 %1314 }
0x12c3   :  { %1317 = vst.msk [vmem:[#allocation3 + $0x38] sm:$0xff] %vm239_vm9, %v1315_v10 }
0x12ca   :  { %v1330_v26 = vld [vmem:[#allocation3 + $0x38] sm:$0xff] }
0x12cb   :  { %2632 = vmatmul.msk.f32.gmra.mxu0 %vm1353_vm6, %v1330_v26  ;;  %2640 = vmatmul.msk.f32.gmra.mxu1 %vm1353_vm6, %v1330_v26 }
0x12f8   :  { %v1395_v29 = vpop.f32.mrf.mxu0  ;;  %v3592_v37 = vpop.f32.mrf.mxu1 }
0x12f9   :  { %v1396_v32 = vadd.f32 %v1395_v29, %v3589_v28 }
0x12fb   :  { %v1507_v33 = vadd.f32 %v1504_v30, %v1396_v32 }
0x12fd   :  { %2826 = vtanh.f32 %v1507_v33  ;;  %v2641_v51 = vmul.f32 -1.442695, %v1507_v33 }
0x12ff   :  { %2828 = vpow2.f32 %v2641_v51 }
0x1300   :  { %v3595_v38 = vpop.f32.mrf.mxu1 }
0x1303   :  { %v2827_v36 = vpop.eup %2826 }
0x1304   :  { %1553 = vrot.lane.b32.xlu2 %v2827_v36, %s3072_s11 }
0x1305   :  { %v2829_v55 = vpop.eup %2828 }
0x1306   :  { %v1534_v35 = vadd.f32 1.0, %v2829_v55 }
0x1308   :  { %v3597_v41 = vpop.f32.mrf.mxu1  ;;  %2830 = vrcp.f32 %v1534_v35  ;;  %v1546_v5 = vand.u32 2147483648, %v1534_v35  ;;  %vm1540_vm8 = vweird.f32 %v1534_v35  ;;  %v1544_v48 = vand.u32 2147483647, %v1534_v35 }
0x130a   :  { %v1547_v14 = vor.u32 1.1754944e-38, %v1546_v5  ;;  %vm1545_vm11 = vcmp.eq.f32.partialorder %v1544_v48, 8.507059e+37 }
0x130e   :  { %v2831_v59 = vpop.eup %2830 }
0x130f   :  { %v1536_v60 = vmul.f32 %v2831_v59, %v1534_v35  ;;  %vm1541_vm7 = vweird.f32 %v2831_v59 }
0x1310   :  { %v3599_v45 = vpop.f32.mrf.mxu1  ;;  %vm1542_vm10 = vmor %vm1540_vm8, %vm1541_vm7 }
0x1311   :  { %v1537_v43 = vsub.f32 1.0, %v1536_v60 }
0x1313   :  { %v1538_v61 = vmul.f32 %v2831_v59, %v1537_v43 }
0x1315   :  { %v1539_v6 = vadd.f32 %v2831_v59, %v1538_v61 }
0x1317   :  { %v1543_v11 = vsel %vm1542_vm10, %v2831_v59, %v1539_v6 }
0x1318   :  { %v3601_v47 = vpop.f32.mrf.mxu1  ;;  %v1548_v15 = vsel %vm1545_vm11, %v1547_v14, %v1543_v11 }
0x1319   :  { %v1551_v25 = vmul.f32 0.0, %v1548_v15 }
0x1320   :  { %v3603_v53 = vpop.f32.mrf.mxu1 }
0x1328   :  { %v3605_v58 = vpop.f32.mrf.mxu1 }
0x1329   :  { %v1455_v48 = vadd.f32 %v3605_v58, %v3607_v52 }
0x1348   :  { %v1457_v40 = vpop.f32.mrf.mxu1 }
0x1349   :  { %v1458_v49 = vadd.f32 %v1457_v40, %v3607_v52 }
0x134b   :  { %v1530_v54 = vadd.f32 %v1527_v63, %v1458_v49  ;;  %v1398_v63 = vpop.f32.mrf.mxu0 }
0x134c   :  { %v1399_v49 = vadd.f32 %v1398_v63, %v3589_v28 }
0x134d   :  { %2832 = vtanh.f32 %v1530_v54  ;;  %v2642_v0 = vmul.f32 -1.442695, %v1530_v54 }
0x134f   :  { %2834 = vpow2.f32 %v2642_v0 }
0x1353   :  { %v2833_v57 = vpop.eup %2832 }
0x1354   :  { %1590 = vrot.lane.b32.xlu0 %v2833_v57, %s3072_s11 }
0x1355   :  { %v2835_v1 = vpop.eup %2834 }
0x1356   :  { %v1571_v4 = vadd.f32 1.0, %v2835_v1 }
0x1358   :  { %2836 = vrcp.f32 %v1571_v4  ;;  %v1583_v44 = vand.u32 2147483648, %v1571_v4  ;;  %vm1577_vm13 = vweird.f32 %v1571_v4  ;;  %v1581_v31 = vand.u32 2147483647, %v1571_v4 }
0x135a   :  { %v1584_v17 = vor.u32 1.1754944e-38, %v1583_v44  ;;  %vm1582_vm15 = vcmp.eq.f32.partialorder %v1581_v31, 8.507059e+37 }
0x135e   :  { %v1554_v19 = vpop.permute.xlu2 %1553  ;;  %v2837_v34 = vpop.eup %2836 }
0x135f   :  { %v1556_v50 = vmul.f32 %v1554_v19, %v1548_v15  ;;  %v1573_v8 = vmul.f32 %v2837_v34, %v1571_v4  ;;  %vm1578_vm12 = vweird.f32 %v2837_v34 }
0x1360   :  { %vm1579_vm14 = vmor %vm1577_vm13, %vm1578_vm12 }
0x1361   :  { %1558 = vrot.lane.b32.xlu1 %v1556_v50, %s3073_s3  ;;  %v1574_v62 = vsub.f32 1.0, %v1573_v8 }
0x1363   :  { %v1575_v39 = vmul.f32 %v2837_v34, %v1574_v62 }
0x1365   :  { %v1576_v16 = vadd.f32 %v2837_v34, %v1575_v39 }
0x1367   :  { %v1580_v42 = vsel %vm1579_vm14, %v2837_v34, %v1576_v16 }
0x1368   :  { %v1585_v23 = vsel %vm1582_vm15, %v1584_v17, %v1580_v42 }
0x1369   :  { %v1588_v29 = vmul.f32 0.0, %v1585_v23 }
0x13c6   :  { %v1591_v22 = vpop.permute.xlu0 %1590 }
0x13c7   :  { %v1593_v2 = vmul.f32 %v1591_v22, %v1585_v23 }
0x13c9   :  { %1595 = vrot.lane.b32.xlu2 %v1593_v2, %s3073_s3 }
0x13d3   :  { %v1559_v10 = vpop.permute.xlu1 %1558 }
0x13d4   :  { %v3613_v26 = vadd.f32 %v1559_v10, %v1551_v25 }
0x13d6   :  { %2838 = vtanh.f32 %v3613_v26 }
0x13dc   :  { %v2839_v27 = vpop.eup %2838 }
0x13dd   :  { %1564 = vrot.lane.b32.xlu0 %v2839_v27, %s3072_s11 }
0x1423   :  { %v1596_v30 = vpop.permute.xlu2 %1595 }
0x1424   :  { %v3617_v32 = vadd.f32 %v1596_v30, %v1588_v29 }
0x1426   :  { %2840 = vtanh.f32 %v3617_v32 }
0x142c   :  { %v2841_v33 = vpop.eup %2840 }
0x142d   :  { %1601 = vrot.lane.b32.xlu1 %v2841_v33, %s3072_s11 }
0x144f   :  { %v1565_v36 = vpop.permute.xlu0 %1564 }
0x1450   :  { %v1567_v51 = vmul.f32 %v1565_v36, %v1548_v15 }
0x1452   :  { %1608 = vrot.lane.b32.xlu2 %v1567_v51, %s3073_s3 }
0x149f   :  { %v1602_v55 = vpop.permute.xlu1 %1601 }
0x14a0   :  { %v1604_v35 = vmul.f32 %v1602_v55, %v1585_v23 }
0x14a2   :  { %1636 = vrot.lane.b32.xlu0 %v1604_v35, %s3073_s3 }
0x14ac   :  { %v1609_v59 = vpop.permute.xlu2 %1608 }
0x14ad   :  { %2643 = vmatmul.msk.f32.vlgmr.msrb.gmra.mxu2 %vm239_vm9, %v1609_v59 }
0x14ae   :  { %1884 = vmatpush.msrb.mxu2 %v3484_v7 }
0x14b0   :  { %1885 = vmatpush.msrb.mxu2 %v3490_v9 }
0x14b2   :  { %1886 = vmatpush.msrb.mxu2 %v3506_v18 }
0x14b4   :  { %1887 = vmatpush.msrb.mxu2 %v3514_v13 }
0x1514   :  { %v1637_v40 = vpop.permute.xlu0 %1636 }
0x1515   :  { %2644 = vmatmul.msk.f32.vlgmr.msrb.gmra.mxu3 %vm239_vm9, %v1637_v40 }
0x1516   :  { %1912 = vmatpush.msrb.mxu3 %v3554_v20 }
0x1518   :  { %1913 = vmatpush.msrb.mxu3 %v3556_v21 }
0x151a   :  { %1914 = vmatpush.msrb.mxu3 %v3566_v24 }
0x151c   :  { %1915 = vmatpush.msrb.mxu3 %v3568_v46 }
0x1530   :  { %v1629_v54 = vpop.f32.mrf.mxu2 }
0x1531   :  { %v1632_v60 = vadd.f32 %v1629_v54, %v1399_v49 }
0x1533   :  { %2842 = vtanh.f32 %v1632_v60  ;;  %v2645_v57 = vmul.f32 -1.442695, %v1632_v60 }
0x1535   :  { %2844 = vpow2.f32 %v2645_v57 }
0x1539   :  { %v2843_v43 = vpop.eup %2842 }
0x153a   :  { %1683 = vrot.lane.b32.xlu1 %v2843_v43, %s3072_s11 }
0x153b   :  { %v2845_v61 = vpop.eup %2844 }
0x153c   :  { %v1664_v6 = vadd.f32 1.0, %v2845_v61 }
0x153e   :  { %2846 = vrcp.f32 %v1664_v6  ;;  %v1676_v4 = vand.u32 2147483648, %v1664_v6  ;;  %vm1670_vm1 = vweird.f32 %v1664_v6  ;;  %v1674_v34 = vand.u32 2147483647, %v1664_v6 }
0x1540   :  { %v1677_v62 = vor.u32 1.1754944e-38, %v1676_v4  ;;  %vm1675_vm3 = vcmp.eq.f32.partialorder %v1674_v34, 8.507059e+37 }
0x1544   :  { %v2847_v5 = vpop.eup %2846 }
0x1545   :  { %v1666_v15 = vmul.f32 %v2847_v5, %v1664_v6  ;;  %vm1671_vm0 = vweird.f32 %v2847_v5 }
0x1546   :  { %vm1672_vm2 = vmor %vm1670_vm1, %vm1671_vm0 }
0x1547   :  { %v1667_v19 = vsub.f32 1.0, %v1666_v15 }
0x1549   :  { %v1668_v0 = vmul.f32 %v2847_v5, %v1667_v19 }
0x154b   :  { %v1669_v1 = vadd.f32 %v2847_v5, %v1668_v0 }
0x154d   :  { %v1673_v8 = vsel %vm1672_vm2, %v2847_v5, %v1669_v1  ;;  %v1401_v5 = vpop.f32.mrf.mxu0 }
0x154e   :  { %v1678_v39 = vsel %vm1675_vm3, %v1677_v62, %v1673_v8 }
0x154f   :  { %v1681_v55 = vmul.f32 %v1678_v39, %v3613_v26 }
0x1598   :  { %v1657_v11 = vpop.f32.mrf.mxu3 }
0x1599   :  { %v1660_v14 = vadd.f32 %v1657_v11, %v1455_v48  ;;  %v1402_v48 = vadd.f32 %v1401_v5, %v3589_v28 }
0x159b   :  { %2848 = vtanh.f32 %v1660_v14  ;;  %v2646_v44 = vmul.f32 -1.442695, %v1660_v14 }
0x159d   :  { %2850 = vpow2.f32 %v2646_v44 }
0x15a1   :  { %v2849_v50 = vpop.eup %2848 }
0x15a2   :  { %1720 = vrot.lane.b32.xlu2 %v2849_v50, %s3072_s11  ;;  %v1452_v50 = vadd.f32 %v3603_v53, %v3607_v52 }
0x15a3   :  { %v2851_v31 = vpop.eup %2850 }
0x15a4   :  { %v1701_v42 = vadd.f32 1.0, %v2851_v31 }
0x15a6   :  { %2852 = vrcp.f32 %v1701_v42  ;;  %v1713_v10 = vand.u32 2147483648, %v1701_v42  ;;  %vm1707_vm5 = vweird.f32 %v1701_v42  ;;  %v1711_v27 = vand.u32 2147483647, %v1701_v42 }
0x15a8   :  { %v1714_v30 = vor.u32 1.1754944e-38, %v1713_v10  ;;  %vm1712_vm8 = vcmp.eq.f32.partialorder %v1711_v27, 8.507059e+37 }
0x15ac   :  { %v1684_v58 = vpop.permute.xlu1 %1683  ;;  %v2853_v17 = vpop.eup %2852 }
0x15ad   :  { %v1686_v16 = vmul.f32 %v1684_v58, %v1678_v39  ;;  %v1703_v22 = vmul.f32 %v2853_v17, %v1701_v42  ;;  %vm1708_vm4 = vweird.f32 %v2853_v17 }
0x15ae   :  { %vm1709_vm7 = vmor %vm1707_vm5, %vm1708_vm4 }
0x15af   :  { %1688 = vrot.lane.b32.xlu0 %v1686_v16, %s3073_s3  ;;  %v1704_v23 = vsub.f32 1.0, %v1703_v22 }
0x15b1   :  { %v1705_v2 = vmul.f32 %v2853_v17, %v1704_v23 }
0x15b3   :  { %v1706_v25 = vadd.f32 %v2853_v17, %v1705_v2 }
0x15b5   :  { %v1710_v29 = vsel %vm1709_vm7, %v2853_v17, %v1706_v25 }
0x15b6   :  { %v1715_v36 = vsel %vm1712_vm8, %v1714_v30, %v1710_v29 }
0x15b7   :  { %v1718_v63 = vmul.f32 %v1715_v36, %v3617_v32 }
0x15fc   :  { %v1721_v33 = vpop.permute.xlu2 %1720 }
0x15fd   :  { %v1723_v51 = vmul.f32 %v1721_v33, %v1715_v36 }
0x15ff   :  { %1725 = vrot.lane.b32.xlu1 %v1723_v51, %s3073_s3 }
0x1621   :  { %v1689_v35 = vpop.permute.xlu0 %1688 }
0x1622   :  { %v3641_v59 = vadd.f32 %v1689_v35, %v1681_v55 }
0x1624   :  { %2854 = vtanh.f32 %v3641_v59 }
0x162a   :  { %v2855_v40 = vpop.eup %2854 }
0x162b   :  { %1694 = vrot.lane.b32.xlu2 %v2855_v40, %s3072_s11 }
0x1671   :  { %v1726_v49 = vpop.permute.xlu1 %1725 }
0x1672   :  { %v3646_v54 = vadd.f32 %v1726_v49, %v1718_v63 }
0x1674   :  { %2856 = vtanh.f32 %v3646_v54 }
0x167a   :  { %v2857_v60 = vpop.eup %2856 }
0x167b   :  { %1731 = vrot.lane.b32.xlu0 %v2857_v60, %s3072_s11 }
0x1685   :  { %v1695_v43 = vpop.permute.xlu2 %1694 }
0x1686   :  { %v1697_v26 = vmul.f32 %v1695_v43, %v1678_v39 }
0x1688   :  { %1738 = vrot.lane.b32.xlu1 %v1697_v26, %s3073_s3 }
0x16ed   :  { %v1732_v57 = vpop.permute.xlu0 %1731 }
0x16ee   :  { %v1734_v61 = vmul.f32 %v1732_v57, %v1715_v36 }
0x16f0   :  { %1766 = vrot.lane.b32.xlu2 %v1734_v61, %s3073_s3 }
0x16fa   :  { %v1739_v6 = vpop.permute.xlu1 %1738 }
0x16fb   :  { %2647 = vmatmul.msk.f32.vlgmr.msra.gmra.mxu2 %vm239_vm9, %v1739_v6 }
0x16fc   :  { %2012 = vmatpush.msra.mxu2 %v3484_v7 }
0x16fe   :  { %2013 = vmatpush.msra.mxu2 %v3490_v9 }
0x1700   :  { %2014 = vmatpush.msra.mxu2 %v3506_v18 }
0x1702   :  { %2015 = vmatpush.msra.mxu2 %v3514_v13 }
0x174a   :  { %v1767_v32 = vpop.permute.xlu2 %1766 }
0x174b   :  { %2648 = vmatmul.msk.f32.vlgmr.msra.gmra.mxu3 %vm239_vm9, %v1767_v32 }
0x174c   :  { %2038 = vmatpush.msra.mxu3 %v3554_v20 }
0x174e   :  { %2039 = vmatpush.msra.mxu3 %v3556_v21 }
0x1750   :  { %2040 = vmatpush.msra.mxu3 %v3566_v24 }
0x1752   :  { %2041 = vmatpush.msra.mxu3 %v3568_v46 }
0x177e   :  { %v1759_v11 = vpop.f32.mrf.mxu2 }
0x177f   :  { %v1762_v14 = vadd.f32 %v1759_v11, %v1402_v48 }
0x1781   :  { %2858 = vtanh.f32 %v1762_v14  ;;  %v2649_v19 = vmul.f32 -1.442695, %v1762_v14 }
0x1783   :  { %2860 = vpow2.f32 %v2649_v19 }
0x1787   :  { %v2859_v15 = vpop.eup %2858 }
0x1788   :  { %1813 = vrot.lane.b32.xlu0 %v2859_v15, %s3072_s11 }
0x1789   :  { %v2861_v4 = vpop.eup %2860 }
0x178a   :  { %v1794_v8 = vadd.f32 1.0, %v2861_v4 }
0x178c   :  { %v1806_v31 = vand.u32 2147483648, %v1794_v8  ;;  %vm1800_vm11 = vweird.f32 %v1794_v8  ;;  %v1804_v42 = vand.u32 2147483647, %v1794_v8 }
0x178e   :  { %v1807_v17 = vor.u32 1.1754944e-38, %v1806_v31  ;;  %vm1805_vm13 = vcmp.eq.f32.partialorder %v1804_v42, 8.507059e+37 }
0x17ce   :  { %v1787_v0 = vpop.f32.mrf.mxu3 }
0x17cf   :  { %v1790_v1 = vadd.f32 %v1787_v0, %v1452_v50  ;;  %v1404_v0 = vpop.f32.mrf.mxu0 }
0x17d1   :  { %2862 = vtanh.f32 %v1790_v1  ;;  %v2650_v25 = vmul.f32 -1.442695, %v1790_v1  ;;  %v1405_v1 = vadd.f32 %v1404_v0, %v3589_v28 }
0x17d2   :  { %2864 = vrcp.f32 %v1794_v8 }
0x17d3   :  { %2866 = vpow2.f32 %v2650_v25 }
0x17d7   :  { %v2863_v34 = vpop.eup %2862 }
0x17d8   :  { %1850 = vrot.lane.b32.xlu1 %v2863_v34, %s3072_s11  ;;  %v2865_v62 = vpop.eup %2864 }
0x17d9   :  { %v1796_v39 = vmul.f32 %v2865_v62, %v1794_v8  ;;  %vm1801_vm10 = vweird.f32 %v2865_v62  ;;  %v2867_v10 = vpop.eup %2866 }
0x17da   :  { %vm1802_vm12 = vmor %vm1800_vm11, %vm1801_vm10  ;;  %v1831_v27 = vadd.f32 1.0, %v2867_v10 }
0x17db   :  { %v1797_v58 = vsub.f32 1.0, %v1796_v39 }
0x17dc   :  { %2868 = vrcp.f32 %v1831_v27  ;;  %v1843_v55 = vand.u32 2147483648, %v1831_v27  ;;  %vm1837_vm15 = vweird.f32 %v1831_v27  ;;  %v1841_v35 = vand.u32 2147483647, %v1831_v27 }
0x17dd   :  { %v1798_v16 = vmul.f32 %v2865_v62, %v1797_v58 }
0x17de   :  { %v1844_v63 = vor.u32 1.1754944e-38, %v1843_v55  ;;  %vm1842_vm1 = vcmp.eq.f32.partialorder %v1841_v35, 8.507059e+37 }
0x17df   :  { %v1799_v44 = vadd.f32 %v2865_v62, %v1798_v16 }
0x17e1   :  { %v1803_v53 = vsel %vm1802_vm12, %v2865_v62, %v1799_v44  ;;  %v1449_v44 = vadd.f32 %v3601_v47, %v3607_v52 }
0x17e2   :  { %v1808_v23 = vsel %vm1805_vm13, %v1807_v17, %v1803_v53  ;;  %v2869_v29 = vpop.eup %2868 }
0x17e3   :  { %v1833_v30 = vmul.f32 %v2869_v29, %v1831_v27  ;;  %vm1838_vm14 = vweird.f32 %v2869_v29  ;;  %v1811_v26 = vmul.f32 %v1808_v23, %v3641_v59 }
0x17e4   :  { %vm1839_vm0 = vmor %vm1837_vm15, %vm1838_vm14 }
0x17e5   :  { %v1834_v33 = vsub.f32 1.0, %v1833_v30 }
0x17e7   :  { %v1835_v36 = vmul.f32 %v2869_v29, %v1834_v33 }
0x17e9   :  { %v1836_v51 = vadd.f32 %v2869_v29, %v1835_v36 }
0x17eb   :  { %v1840_v40 = vsel %vm1839_vm0, %v2869_v29, %v1836_v51 }
0x17ec   :  { %v1845_v49 = vsel %vm1842_vm1, %v1844_v63, %v1840_v40 }
0x17ed   :  { %v1848_v32 = vmul.f32 %v1845_v49, %v3646_v54 }
0x17fa   :  { %v1814_v22 = vpop.permute.xlu0 %1813 }
0x17fb   :  { %v1816_v2 = vmul.f32 %v1814_v22, %v1808_v23 }
0x17fd   :  { %1818 = vrot.lane.b32.xlu2 %v1816_v2, %s3073_s3 }
0x184a   :  { %v1851_v60 = vpop.permute.xlu1 %1850 }
0x184b   :  { %v1853_v43 = vmul.f32 %v1851_v60, %v1845_v49 }
0x184d   :  { %1855 = vrot.lane.b32.xlu0 %v1853_v43, %s3073_s3 }
0x1857   :  { %v1819_v57 = vpop.permute.xlu2 %1818 }
0x1858   :  { %v3670_v61 = vadd.f32 %v1819_v57, %v1811_v26 }
0x185a   :  { %2870 = vtanh.f32 %v3670_v61 }
0x1860   :  { %v2871_v6 = vpop.eup %2870 }
0x1861   :  { %1824 = vrot.lane.b32.xlu1 %v2871_v6, %s3072_s11 }
0x18bf   :  { %v1856_v5 = vpop.permute.xlu0 %1855 }
0x18c0   :  { %v3675_v48 = vadd.f32 %v1856_v5, %v1848_v32 }
0x18c2   :  { %2872 = vtanh.f32 %v3675_v48 }
0x18c8   :  { %v2873_v11 = vpop.eup %2872 }
0x18c9   :  { %1861 = vrot.lane.b32.xlu2 %v2873_v11, %s3072_s11 }
0x18d3   :  { %v1825_v14 = vpop.permute.xlu1 %1824 }
0x18d4   :  { %v1827_v59 = vmul.f32 %v1825_v14, %v1808_v23 }
0x18d6   :  { %1868 = vrot.lane.b32.xlu0 %v1827_v59, %s3073_s3 }
0x1923   :  { %v1862_v15 = vpop.permute.xlu2 %1861 }
0x1924   :  { %v1864_v19 = vmul.f32 %v1862_v15, %v1845_v49 }
0x1926   :  { %1896 = vrot.lane.b32.xlu1 %v1864_v19, %s3073_s3 }
0x1948   :  { %v1869_v50 = vpop.permute.xlu0 %1868 }
0x1949   :  { %2651 = vmatmul.msk.f32.vlgmr.msrb.gmra.mxu2 %vm239_vm9, %v1869_v50 }
0x194a   :  { %2138 = vmatpush.msrb.mxu2 %v3484_v7 }
0x194c   :  { %2139 = vmatpush.msrb.mxu2 %v3490_v9 }
0x194e   :  { %2140 = vmatpush.msrb.mxu2 %v3506_v18 }
0x1950   :  { %2141 = vmatpush.msrb.mxu2 %v3514_v13 }
0x1998   :  { %v1897_v54 = vpop.permute.xlu1 %1896 }
0x1999   :  { %2652 = vmatmul.msk.f32.vlgmr.msrb.gmra.mxu3 %vm239_vm9, %v1897_v54 }
0x199a   :  { %2164 = vmatpush.msrb.mxu3 %v3554_v20 }
0x199c   :  { %2165 = vmatpush.msrb.mxu3 %v3556_v21 }
0x199e   :  { %2166 = vmatpush.msrb.mxu3 %v3566_v24 }
0x19a0   :  { %2167 = vmatpush.msrb.mxu3 %v3568_v46 }
0x19cc   :  { %v1889_v4 = vpop.f32.mrf.mxu2 }
0x19cd   :  { %v1892_v34 = vadd.f32 %v1889_v4, %v1405_v1 }
0x19cf   :  { %2874 = vtanh.f32 %v1892_v34  ;;  %v2653_v62 = vmul.f32 -1.442695, %v1892_v34 }
0x19d1   :  { %2876 = vpow2.f32 %v2653_v62 }
0x19d5   :  { %v2875_v8 = vpop.eup %2874 }
0x19d6   :  { %1943 = vrot.lane.b32.xlu2 %v2875_v8, %s3072_s11 }
0x19d7   :  { %v2877_v39 = vpop.eup %2876 }
0x19d8   :  { %v1924_v58 = vadd.f32 1.0, %v2877_v39  ;;  %v1407_v39 = vpop.f32.mrf.mxu0 }
0x19da   :  { %2878 = vrcp.f32 %v1924_v58  ;;  %v1936_v25 = vand.u32 2147483648, %v1924_v58  ;;  %vm1930_vm3 = vweird.f32 %v1924_v58  ;;  %v1934_v10 = vand.u32 2147483647, %v1924_v58 }
0x19dc   :  { %v1937_v29 = vor.u32 1.1754944e-38, %v1936_v25  ;;  %vm1935_vm5 = vcmp.eq.f32.partialorder %v1934_v10, 8.507059e+37 }
0x19e0   :  { %v2879_v16 = vpop.eup %2878 }
0x19e1   :  { %v1926_v53 = vmul.f32 %v2879_v16, %v1924_v58  ;;  %vm1931_vm2 = vweird.f32 %v2879_v16 }
0x19e2   :  { %vm1932_vm4 = vmor %vm1930_vm3, %vm1931_vm2 }
0x19e3   :  { %v1927_v17 = vsub.f32 1.0, %v1926_v53 }
0x19e5   :  { %v1928_v23 = vmul.f32 %v2879_v16, %v1927_v17 }
0x19e7   :  { %v1929_v2 = vadd.f32 %v2879_v16, %v1928_v23 }
0x19e9   :  { %v1933_v27 = vsel %vm1932_vm4, %v2879_v16, %v1929_v2 }
0x19ea   :  { %v1938_v47 = vsel %vm1935_vm5, %v1937_v29, %v1933_v27 }
0x19eb   :  { %v1941_v14 = vmul.f32 %v1938_v47, %v3670_v61 }
0x1a1c   :  { %v1917_v31 = vpop.f32.mrf.mxu3 }
0x1a1d   :  { %v1920_v42 = vadd.f32 %v1917_v31, %v1449_v44 }
0x1a1f   :  { %2880 = vtanh.f32 %v1920_v42  ;;  %v2654_v36 = vmul.f32 -1.442695, %v1920_v42  ;;  %v1446_v42 = vadd.f32 %v3599_v45, %v3607_v52 }
0x1a21   :  { %2882 = vpow2.f32 %v2654_v36 }
0x1a25   :  { %v2881_v22 = vpop.eup %2880 }
0x1a26   :  { %1980 = vrot.lane.b32.xlu0 %v2881_v22, %s3072_s11 }
0x1a27   :  { %v2883_v51 = vpop.eup %2882 }
0x1a28   :  { %v1961_v55 = vadd.f32 1.0, %v2883_v51 }
0x1a2a   :  { %2884 = vrcp.f32 %v1961_v55  ;;  %v1973_v43 = vand.u32 2147483648, %v1961_v55  ;;  %vm1967_vm8 = vweird.f32 %v1961_v55  ;;  %v1971_v26 = vand.u32 2147483647, %v1961_v55 }
0x1a2c   :  { %v1974_v6 = vor.u32 1.1754944e-38, %v1973_v43  ;;  %vm1972_vm11 = vcmp.eq.f32.partialorder %v1971_v26, 8.507059e+37 }
0x1a30   :  { %v1944_v30 = vpop.permute.xlu2 %1943  ;;  %v2885_v35 = vpop.eup %2884 }
0x1a31   :  { %v1946_v33 = vmul.f32 %v1944_v30, %v1938_v47  ;;  %v1963_v40 = vmul.f32 %v2885_v35, %v1961_v55  ;;  %vm1968_vm7 = vweird.f32 %v2885_v35 }
0x1a32   :  { %vm1969_vm10 = vmor %vm1967_vm8, %vm1968_vm7 }
0x1a33   :  { %1948 = vrot.lane.b32.xlu1 %v1946_v33, %s3073_s3  ;;  %v1964_v63 = vsub.f32 1.0, %v1963_v40 }
0x1a35   :  { %v1965_v49 = vmul.f32 %v2885_v35, %v1964_v63 }
0x1a37   :  { %v1966_v60 = vadd.f32 %v2885_v35, %v1965_v49 }
0x1a39   :  { %v1970_v57 = vsel %vm1969_vm10, %v2885_v35, %v1966_v60 }
0x1a3a   :  { %v1975_v5 = vsel %vm1972_vm11, %v1974_v6, %v1970_v57 }
0x1a3b   :  { %v1978_v50 = vmul.f32 %v1975_v5, %v3675_v48 }
0x1a98   :  { %v1981_v32 = vpop.permute.xlu0 %1980 }
0x1a99   :  { %v1983_v11 = vmul.f32 %v1981_v32, %v1975_v5 }
0x1a9b   :  { %1985 = vrot.lane.b32.xlu2 %v1983_v11, %s3073_s3 }
0x1aa5   :  { %v1949_v59 = vpop.permute.xlu1 %1948 }
0x1aa6   :  { %v3699_v15 = vadd.f32 %v1949_v59, %v1941_v14 }
0x1aa8   :  { %2886 = vtanh.f32 %v3699_v15 }
0x1aae   :  { %v2887_v19 = vpop.eup %2886 }
0x1aaf   :  { %1954 = vrot.lane.b32.xlu0 %v2887_v19, %s3072_s11 }
0x1af5   :  { %v1986_v54 = vpop.permute.xlu2 %1985 }
0x1af6   :  { %v3704_v0 = vadd.f32 %v1986_v54, %v1978_v50 }
0x1af8   :  { %2888 = vtanh.f32 %v3704_v0 }
0x1afe   :  { %v2889_v1 = vpop.eup %2888 }
0x1aff   :  { %1991 = vrot.lane.b32.xlu1 %v2889_v1, %s3072_s11 }
0x1b21   :  { %v1955_v4 = vpop.permute.xlu0 %1954 }
0x1b22   :  { %v1957_v61 = vmul.f32 %v1955_v4, %v1938_v47 }
0x1b24   :  { %1996 = vrot.lane.b32.xlu2 %v1957_v61, %s3073_s3 }
0x1b71   :  { %v1992_v34 = vpop.permute.xlu1 %1991 }
0x1b72   :  { %v1994_v8 = vmul.f32 %v1992_v34, %v1975_v5 }
0x1b74   :  { %2022 = vrot.lane.b32.xlu0 %v1994_v8, %s3073_s3 }
0x1b7e   :  { %v1997_v62 = vpop.permute.xlu2 %1996 }
0x1b7f   :  { %2655 = vmatmul.msk.f32.vlgmr.msra.gmra.mxu2 %vm239_vm9, %v1997_v62 }
0x1b80   :  { %2264 = vmatpush.msra.mxu2 %v3484_v7  ;;  %v1408_v7 = vadd.f32 %v1407_v39, %v3589_v28 }
0x1b82   :  { %2265 = vmatpush.msra.mxu2 %v3490_v9 }
0x1b84   :  { %2266 = vmatpush.msra.mxu2 %v3506_v18 }
0x1b86   :  { %2267 = vmatpush.msra.mxu2 %v3514_v13 }
0x1be6   :  { %v2023_v48 = vpop.permute.xlu0 %2022 }
0x1be7   :  { %2656 = vmatmul.msk.f32.vlgmr.msra.gmra.mxu3 %vm239_vm9, %v2023_v48 }
0x1be8   :  { %2290 = vmatpush.msra.mxu3 %v3554_v20 }
0x1bea   :  { %2291 = vmatpush.msra.mxu3 %v3556_v21 }
0x1bec   :  { %2292 = vmatpush.msra.mxu3 %v3566_v24 }
0x1bee   :  { %2293 = vmatpush.msra.mxu3 %v3568_v46 }
0x1c02   :  { %v2017_v58 = vpop.f32.mrf.mxu2 }
0x1c03   :  { %v2020_v9 = vadd.f32 %v2017_v58, %v1408_v7  ;;  %v2961_v7 = vld [vmem:[#allocation9 + $0x10] sm:$0xff]  ;;  %v2962_v58 = vld [vmem:[#allocation9 + $0x8] sm:$0xff] }
0x1c05   :  { %2890 = vtanh.f32 %v2020_v9  ;;  %v2657_v13 = vmul.f32 -1.442695, %v2020_v9  ;;  %v2963_v9 = vld [vmem:[#allocation9] sm:$0xff] }
0x1c07   :  { %2892 = vpow2.f32 %v2657_v13  ;;  %v1410_v13 = vpop.f32.mrf.mxu0 }
0x1c0b   :  { %v2891_v18 = vpop.eup %2890 }
0x1c0c   :  { %2069 = vrot.lane.b32.xlu1 %v2891_v18, %s3072_s11 }
0x1c0d   :  { %v2893_v16 = vpop.eup %2892 }
0x1c0e   :  { %v2050_v44 = vadd.f32 1.0, %v2893_v16  ;;  %v1411_v16 = vadd.f32 %v1410_v13, %v3589_v28 }
0x1c10   :  { %2894 = vrcp.f32 %v2050_v44  ;;  %v2062_v27 = vand.u32 2147483648, %v2050_v44  ;;  %vm2056_vm13 = vweird.f32 %v2050_v44  ;;  %v2060_v29 = vand.u32 2147483647, %v2050_v44 }
0x1c12   :  { %v2063_v47 = vor.u32 1.1754944e-38, %v2062_v27  ;;  %vm2061_vm15 = vcmp.eq.f32.partialorder %v2060_v29, 8.507059e+37 }
0x1c16   :  { %v2895_v31 = vpop.eup %2894 }
0x1c17   :  { %v2052_v22 = vmul.f32 %v2895_v31, %v2050_v44  ;;  %vm2057_vm12 = vweird.f32 %v2895_v31 }
0x1c18   :  { %vm2058_vm14 = vmor %vm2056_vm13, %vm2057_vm12 }
0x1c19   :  { %v2053_v23 = vsub.f32 1.0, %v2052_v22 }
0x1c1b   :  { %v2054_v25 = vmul.f32 %v2895_v31, %v2053_v23 }
0x1c1d   :  { %v2055_v10 = vadd.f32 %v2895_v31, %v2054_v25 }
0x1c1f   :  { %v2059_v30 = vsel %vm2058_vm14, %v2895_v31, %v2055_v10 }
0x1c20   :  { %v2064_v33 = vsel %vm2061_vm15, %v2063_v47, %v2059_v30 }
0x1c21   :  { %v2067_v59 = vmul.f32 %v2064_v33, %v3699_v15 }
0x1c6a   :  { %v2043_v53 = vpop.f32.mrf.mxu3 }
0x1c6b   :  { %v2046_v17 = vadd.f32 %v2043_v53, %v1446_v42 }
0x1c6d   :  { %2896 = vtanh.f32 %v2046_v17  ;;  %v2658_v51 = vmul.f32 -1.442695, %v2046_v17  ;;  %v1443_v17 = vadd.f32 %v3597_v41, %v3607_v52 }
0x1c6f   :  { %2898 = vpow2.f32 %v2658_v51 }
0x1c73   :  { %v2897_v2 = vpop.eup %2896 }
0x1c74   :  { %2106 = vrot.lane.b32.xlu2 %v2897_v2, %s3072_s11 }
0x1c75   :  { %v2899_v55 = vpop.eup %2898 }
0x1c76   :  { %v2087_v35 = vadd.f32 1.0, %v2899_v55 }
0x1c78   :  { %2900 = vrcp.f32 %v2087_v35  ;;  %v2099_v26 = vand.u32 2147483648, %v2087_v35  ;;  %vm2093_vm1 = vweird.f32 %v2087_v35  ;;  %v2097_v57 = vand.u32 2147483647, %v2087_v35 }
0x1c7a   :  { %v2100_v32 = vor.u32 1.1754944e-38, %v2099_v26  ;;  %vm2098_vm3 = vcmp.eq.f32.partialorder %v2097_v57, 8.507059e+37 }
0x1c7e   :  { %v2070_v45 = vpop.permute.xlu1 %2069  ;;  %v2901_v40 = vpop.eup %2900 }
0x1c7f   :  { %v2072_v36 = vmul.f32 %v2070_v45, %v2064_v33  ;;  %v2089_v63 = vmul.f32 %v2901_v40, %v2087_v35  ;;  %vm2094_vm0 = vweird.f32 %v2901_v40 }
0x1c80   :  { %vm2095_vm2 = vmor %vm2093_vm1, %vm2094_vm0 }
0x1c81   :  { %2074 = vrot.lane.b32.xlu0 %v2072_v36, %s3073_s3  ;;  %v2090_v49 = vsub.f32 1.0, %v2089_v63 }
0x1c83   :  { %v2091_v60 = vmul.f32 %v2901_v40, %v2090_v49 }
0x1c85   :  { %v2092_v43 = vadd.f32 %v2901_v40, %v2091_v60 }
0x1c87   :  { %v2096_v6 = vsel %vm2095_vm2, %v2901_v40, %v2092_v43 }
0x1c88   :  { %v2101_v11 = vsel %vm2098_vm3, %v2100_v32, %v2096_v6 }
0x1c89   :  { %v2104_v1 = vmul.f32 %v2101_v11, %v3704_v0  ;;  %v2960_v0 = vld [vmem:[#allocation9 + $0x18] sm:$0xff] }
0x1cce   :  { %v2107_v5 = vpop.permute.xlu2 %2106 }
0x1ccf   :  { %v2109_v14 = vmul.f32 %v2107_v5, %v2101_v11 }
0x1cd1   :  { %2111 = vrot.lane.b32.xlu1 %v2109_v14, %s3073_s3 }
0x1cf3   :  { %v2075_v19 = vpop.permute.xlu0 %2074 }
0x1cf4   :  { %v3728_v50 = vadd.f32 %v2075_v19, %v2067_v59 }
0x1cf6   :  { %2902 = vtanh.f32 %v3728_v50 }
0x1cfc   :  { %v2903_v54 = vpop.eup %2902 }
0x1cfd   :  { %2080 = vrot.lane.b32.xlu2 %v2903_v54, %s3072_s11 }
0x1d43   :  { %v2112_v4 = vpop.permute.xlu1 %2111 }
0x1d44   :  { %v3733_v61 = vadd.f32 %v2112_v4, %v2104_v1 }
0x1d46   :  { %2904 = vtanh.f32 %v3733_v61 }
0x1d4c   :  { %v2905_v34 = vpop.eup %2904 }
0x1d4d   :  { %2117 = vrot.lane.b32.xlu0 %v2905_v34, %s3072_s11 }
0x1d57   :  { %v2081_v8 = vpop.permute.xlu2 %2080 }
0x1d58   :  { %v2083_v15 = vmul.f32 %v2081_v8, %v2064_v33 }
0x1d5a   :  { %2122 = vrot.lane.b32.xlu1 %v2083_v15, %s3073_s3 }
0x1dbf   :  { %v2118_v62 = vpop.permute.xlu0 %2117 }
0x1dc0   :  { %v2120_v48 = vmul.f32 %v2118_v62, %v2101_v11 }
0x1dc2   :  { %2148 = vrot.lane.b32.xlu2 %v2120_v48, %s3073_s3 }
0x1dcc   :  { %v2123_v39 = vpop.permute.xlu1 %2122 }
0x1dcd   :  { %2659 = vmatmul.msk.f32.vlgmr.msrb.gmra.mxu2 %vm239_vm9, %v2123_v39 }
0x1dce   :  { %2390 = vmatpush.msrb.mxu2 %v2960_v0 }
0x1dd0   :  { %2391 = vmatpush.msrb.mxu2 %v2961_v7  ;;  %v1413_v7 = vpop.f32.mrf.mxu0 }
0x1dd2   :  { %2392 = vmatpush.msrb.mxu2 %v2962_v58  ;;  %v1414_v58 = vadd.f32 %v1413_v7, %v3589_v28 }
0x1dd4   :  { %2393 = vmatpush.msrb.mxu2 %v2963_v9 }
0x1e1c   :  { %v2149_v18 = vpop.permute.xlu2 %2148 }
0x1e1d   :  { %2660 = vmatmul.msk.f32.vlgmr.msrb.gmra.mxu3 %vm239_vm9, %v2149_v18 }
0x1e1e   :  { %2416 = vmatpush.msrb.mxu3 %v3554_v20 }
0x1e20   :  { %2417 = vmatpush.msrb.mxu3 %v3556_v21 }
0x1e22   :  { %2418 = vmatpush.msrb.mxu3 %v3566_v24 }
0x1e24   :  { %2419 = vmatpush.msrb.mxu3 %v3568_v46 }
0x1e50   :  { %v2143_v44 = vpop.f32.mrf.mxu2 }
0x1e51   :  { %v2146_v31 = vadd.f32 %v2143_v44, %v1411_v16 }
0x1e53   :  { %2906 = vtanh.f32 %v2146_v31  ;;  %v2661_v53 = vmul.f32 -1.442695, %v2146_v31 }
0x1e55   :  { %2908 = vpow2.f32 %v2661_v53  ;;  %v1440_v53 = vadd.f32 %v3595_v38, %v3607_v52 }
0x1e59   :  { %v2907_v42 = vpop.eup %2906 }
0x1e5a   :  { %2195 = vrot.lane.b32.xlu0 %v2907_v42, %s3072_s11 }
0x1e5b   :  { %v2909_v21 = vpop.eup %2908 }
0x1e5c   :  { %v2176_v46 = vadd.f32 1.0, %v2909_v21 }
0x1e5e   :  { %v2188_v29 = vand.u32 2147483648, %v2176_v46  ;;  %vm2182_vm5 = vweird.f32 %v2176_v46  ;;  %v2186_v30 = vand.u32 2147483647, %v2176_v46 }
0x1e60   :  { %v2189_v47 = vor.u32 1.1754944e-38, %v2188_v29  ;;  %vm2187_vm8 = vcmp.eq.f32.partialorder %v2186_v30, 8.507059e+37 }
0x1ea0   :  { %v2169_v20 = vpop.f32.mrf.mxu3 }
0x1ea1   :  { %v2172_v22 = vadd.f32 %v2169_v20, %v1443_v17 }
0x1ea3   :  { %2910 = vtanh.f32 %v2172_v22  ;;  %v2662_v51 = vmul.f32 -1.442695, %v2172_v22 }
0x1ea4   :  { %2912 = vrcp.f32 %v2176_v46 }
0x1ea5   :  { %2914 = vpow2.f32 %v2662_v51 }
0x1ea9   :  { %v2911_v24 = vpop.eup %2910 }
0x1eaa   :  { %2232 = vrot.lane.b32.xlu1 %v2911_v24, %s3072_s11  ;;  %v2913_v23 = vpop.eup %2912 }
0x1eab   :  { %v2178_v2 = vmul.f32 %v2913_v23, %v2176_v46  ;;  %vm2183_vm4 = vweird.f32 %v2913_v23  ;;  %v2915_v55 = vpop.eup %2914 }
0x1eac   :  { %vm2184_vm7 = vmor %vm2182_vm5, %vm2183_vm4  ;;  %v2213_v35 = vadd.f32 1.0, %v2915_v55 }
0x1ead   :  { %v2179_v25 = vsub.f32 1.0, %v2178_v2 }
0x1eae   :  { %2916 = vrcp.f32 %v2213_v35  ;;  %v2225_v26 = vand.u32 2147483648, %v2213_v35  ;;  %vm2219_vm11 = vweird.f32 %v2213_v35  ;;  %v2223_v57 = vand.u32 2147483647, %v2213_v35 }
0x1eaf   :  { %v2180_v10 = vmul.f32 %v2913_v23, %v2179_v25 }
0x1eb0   :  { %v2226_v32 = vor.u32 1.1754944e-38, %v2225_v26  ;;  %vm2224_vm13 = vcmp.eq.f32.partialorder %v2223_v57, 8.507059e+37 }
0x1eb1   :  { %v2181_v27 = vadd.f32 %v2913_v23, %v2180_v10 }
0x1eb3   :  { %v2185_v41 = vsel %vm2184_vm7, %v2913_v23, %v2181_v27 }
0x1eb4   :  { %v2190_v45 = vsel %vm2187_vm8, %v2189_v47, %v2185_v41  ;;  %v2917_v40 = vpop.eup %2916 }
0x1eb5   :  { %v2215_v63 = vmul.f32 %v2917_v40, %v2213_v35  ;;  %vm2220_vm10 = vweird.f32 %v2917_v40  ;;  %v2193_v59 = vmul.f32 %v2190_v45, %v3728_v50 }
0x1eb6   :  { %vm2221_vm12 = vmor %vm2219_vm11, %vm2220_vm10 }
0x1eb7   :  { %v2216_v49 = vsub.f32 1.0, %v2215_v63 }
0x1eb9   :  { %v2217_v60 = vmul.f32 %v2917_v40, %v2216_v49 }
0x1ebb   :  { %v2218_v43 = vadd.f32 %v2917_v40, %v2217_v60 }
0x1ebd   :  { %v2222_v6 = vsel %vm2221_vm12, %v2917_v40, %v2218_v43 }
0x1ebe   :  { %v2227_v5 = vsel %vm2224_vm13, %v2226_v32, %v2222_v6 }
0x1ebf   :  { %v2230_v4 = vmul.f32 %v2227_v5, %v3733_v61 }
0x1ecc   :  { %v2196_v33 = vpop.permute.xlu0 %2195 }
0x1ecd   :  { %v2198_v36 = vmul.f32 %v2196_v33, %v2190_v45 }
0x1ecf   :  { %2200 = vrot.lane.b32.xlu2 %v2198_v36, %s3073_s3 }
0x1f1c   :  { %v2233_v11 = vpop.permute.xlu1 %2232 }
0x1f1d   :  { %v2235_v14 = vmul.f32 %v2233_v11, %v2227_v5 }
0x1f1f   :  { %2237 = vrot.lane.b32.xlu0 %v2235_v14, %s3073_s3 }
0x1f29   :  { %v2201_v19 = vpop.permute.xlu2 %2200 }
0x1f2a   :  { %v3753_v54 = vadd.f32 %v2201_v19, %v2193_v59 }
0x1f2c   :  { %2918 = vtanh.f32 %v3753_v54 }
0x1f32   :  { %v2919_v1 = vpop.eup %2918 }
0x1f33   :  { %2206 = vrot.lane.b32.xlu1 %v2919_v1, %s3072_s11 }
0x1f91   :  { %v2238_v34 = vpop.permute.xlu0 %2237 }
0x1f92   :  { %v3758_v8 = vadd.f32 %v2238_v34, %v2230_v4 }
0x1f94   :  { %2920 = vtanh.f32 %v3758_v8 }
0x1f9a   :  { %v2921_v15 = vpop.eup %2920 }
0x1f9b   :  { %2243 = vrot.lane.b32.xlu2 %v2921_v15, %s3072_s11 }
0x1fa5   :  { %v2207_v62 = vpop.permute.xlu1 %2206 }
0x1fa6   :  { %v2209_v50 = vmul.f32 %v2207_v62, %v2190_v45 }
0x1fa8   :  { %2248 = vrot.lane.b32.xlu0 %v2209_v50, %s3073_s3  ;;  %v1416_v50 = vpop.f32.mrf.mxu0 }
0x1ff5   :  { %v2244_v48 = vpop.permute.xlu2 %2243 }
0x1ff6   :  { %v2246_v39 = vmul.f32 %v2244_v48, %v2227_v5  ;;  %v1417_v48 = vadd.f32 %v1416_v50, %v3589_v28 }
0x1ff8   :  { %2274 = vrot.lane.b32.xlu1 %v2246_v39, %s3073_s3 }
0x201a   :  { %v2249_v0 = vpop.permute.xlu0 %2248 }
0x201b   :  { %2663 = vmatmul.msk.f32.vlgmr.msra.gmra.mxu2 %vm239_vm9, %v2249_v0 }
0x206a   :  { %v2275_v61 = vpop.permute.xlu1 %2274 }
0x206b   :  { %2664 = vmatmul.msk.f32.vlgmr.msra.gmra.mxu3 %vm239_vm9, %v2275_v61 }
0x209e   :  { %v2269_v9 = vpop.f32.mrf.mxu2 }
0x209f   :  { %v2272_v18 = vadd.f32 %v2269_v9, %v1414_v58 }
0x20a1   :  { %2922 = vtanh.f32 %v2272_v18  ;;  %v2665_v16 = vmul.f32 -1.442695, %v2272_v18 }
0x20a3   :  { %2924 = vpow2.f32 %v2665_v16 }
0x20a7   :  { %v2923_v13 = vpop.eup %2922 }
0x20a8   :  { %2321 = vrot.lane.b32.xlu2 %v2923_v13, %s3072_s11  ;;  %v1437_v13 = vadd.f32 %v3592_v37, %v3607_v52 }
0x20a9   :  { %v2925_v44 = vpop.eup %2924 }
0x20aa   :  { %v2302_v31 = vadd.f32 1.0, %v2925_v44 }
0x20ac   :  { %2926 = vrcp.f32 %v2302_v31  ;;  %v2314_v2 = vand.u32 2147483648, %v2302_v31  ;;  %vm2308_vm15 = vweird.f32 %v2302_v31  ;;  %v2312_v25 = vand.u32 2147483647, %v2302_v31 }
0x20ae   :  { %v2315_v27 = vor.u32 1.1754944e-38, %v2314_v2  ;;  %vm2313_vm1 = vcmp.eq.f32.partialorder %v2312_v25, 8.507059e+37 }
0x20b2   :  { %v2927_v42 = vpop.eup %2926 }
0x20b3   :  { %v2304_v22 = vmul.f32 %v2927_v42, %v2302_v31  ;;  %vm2309_vm14 = vweird.f32 %v2927_v42 }
0x20b4   :  { %vm2310_vm0 = vmor %vm2308_vm15, %vm2309_vm14 }
0x20b5   :  { %v2305_v21 = vsub.f32 1.0, %v2304_v22 }
0x20b7   :  { %v2306_v46 = vmul.f32 %v2927_v42, %v2305_v21 }
0x20b9   :  { %v2307_v23 = vadd.f32 %v2927_v42, %v2306_v46 }
0x20bb   :  { %v2311_v10 = vsel %vm2310_vm0, %v2927_v42, %v2307_v23  ;;  %vm2517_vm0 = vcmask 785408  }
0x20bc   :  { %v2316_v38 = vsel %vm2313_vm1, %v2315_v27, %v2311_v10 }
0x20bd   :  { %v2319_v6 = vmul.f32 %v2316_v38, %v3753_v54 }
0x20ee   :  { %v2295_v17 = vpop.f32.mrf.mxu3 }
0x20ef   :  { %v2298_v20 = vadd.f32 %v2295_v17, %v1440_v53 }
0x20f1   :  { %2928 = vtanh.f32 %v2298_v20  ;;  %v2666_v41 = vmul.f32 -1.442695, %v2298_v20 }
0x20f3   :  { %2930 = vpow2.f32 %v2666_v41 }
0x20f7   :  { %v2929_v24 = vpop.eup %2928 }
0x20f8   :  { %2358 = vrot.lane.b32.xlu0 %v2929_v24, %s3072_s11 }
0x20f9   :  { %v2931_v47 = vpop.eup %2930 }
0x20fa   :  { %v2339_v33 = vadd.f32 1.0, %v2931_v47 }
0x20fc   :  { %2932 = vrcp.f32 %v2339_v33  ;;  %v2351_v40 = vand.u32 2147483648, %v2339_v33  ;;  %vm2345_vm3 = vweird.f32 %v2339_v33  ;;  %v2349_v63 = vand.u32 2147483647, %v2339_v33 }
0x20fe   :  { %v2352_v60 = vor.u32 1.1754944e-38, %v2351_v40  ;;  %vm2350_vm5 = vcmp.eq.f32.partialorder %v2349_v63, 8.507059e+37 }
0x2102   :  { %v2322_v29 = vpop.permute.xlu2 %2321  ;;  %v2933_v45 = vpop.eup %2932 }
0x2103   :  { %v2324_v30 = vmul.f32 %v2322_v29, %v2316_v38  ;;  %v2341_v36 = vmul.f32 %v2933_v45, %v2339_v33  ;;  %vm2346_vm2 = vweird.f32 %v2933_v45 }
0x2104   :  { %vm2347_vm4 = vmor %vm2345_vm3, %vm2346_vm2 }
0x2105   :  { %2326 = vrot.lane.b32.xlu1 %v2324_v30, %s3073_s3  ;;  %v2342_v51 = vsub.f32 1.0, %v2341_v36 }
0x2107   :  { %v2343_v55 = vmul.f32 %v2933_v45, %v2342_v51 }
0x2109   :  { %v2344_v35 = vadd.f32 %v2933_v45, %v2343_v55 }
0x210b   :  { %v2348_v49 = vsel %vm2347_vm4, %v2933_v45, %v2344_v35  ;;  %v2499_v35 = vadd.f32 %v3453_v3, %v3496_v12  ;;  %v2535_v12 = vld [vmem:[%s3872_s7 + $0x78] sm:$0xff] }
0x210c   :  { %v2353_v26 = vsel %vm2350_vm5, %v2352_v60, %v2348_v49  ;;  %2540 = vmatpush.msra.mxu0 %v2535_v12 }
0x210d   :  { %v2356_v14 = vmul.f32 %v2353_v26, %v3758_v8 }
0x216a   :  { %v2359_v43 = vpop.permute.xlu0 %2358 }
0x216b   :  { %v2361_v57 = vmul.f32 %v2359_v43, %v2353_v26 }
0x216d   :  { %2363 = vrot.lane.b32.xlu2 %v2361_v57, %s3073_s3 }
0x2177   :  { %v2327_v32 = vpop.permute.xlu1 %2326 }
0x2178   :  { %v3774_v5 = vadd.f32 %v2327_v32, %v2319_v6  ;;  %v2534_v32 = vld [vmem:[%s3872_s7 + $0x70] sm:$0xff] }
0x2179   :  { %2541 = vmatpush.msra.mxu0 %v2534_v32 }
0x217a   :  { %2934 = vtanh.f32 %v3774_v5 }
0x2180   :  { %v2935_v11 = vpop.eup %2934 }
0x2181   :  { %2332 = vrot.lane.b32.xlu0 %v2935_v11, %s3072_s11  ;;  %v2532_v11 = vld [vmem:[%s3872_s7 + $0x60] sm:$0xff] }
0x21c7   :  { %v2364_v59 = vpop.permute.xlu2 %2363 }
0x21c8   :  { %v3779_v19 = vadd.f32 %v2364_v59, %v2356_v14  ;;  %v2531_v14 = vld [vmem:[%s3872_s7 + $0x58] sm:$0xff]  ;;  %v2530_v59 = vld [vmem:[%s3872_s7 + $0x50] sm:$0xff] }
0x21ca   :  { %2936 = vtanh.f32 %v3779_v19 }
0x21d0   :  { %v2937_v1 = vpop.eup %2936 }
0x21d1   :  { %2369 = vrot.lane.b32.xlu1 %v2937_v1, %s3072_s11  ;;  %v2528_v1 = vld [vmem:[%s3872_s7 + $0x40] sm:$0xff] }
0x21f3   :  { %v2333_v4 = vpop.permute.xlu0 %2332 }
0x21f4   :  { %v2335_v54 = vmul.f32 %v2333_v4, %v2316_v38  ;;  %v2527_v4 = vld [vmem:[%s3872_s7 + $0x38] sm:$0xff] }
0x21f6   :  { %2374 = vrot.lane.b32.xlu2 %v2335_v54, %s3073_s3  ;;  %v2526_v54 = vld [vmem:[%s3872_s7 + $0x30] sm:$0xff] }
0x2243   :  { %v2370_v34 = vpop.permute.xlu1 %2369 }
0x2244   :  { %v2372_v15 = vmul.f32 %v2370_v34, %v2353_v26  ;;  %v2525_v34 = vld [vmem:[%s3872_s7 + $0x28] sm:$0xff] }
0x2246   :  { %2400 = vrot.lane.b32.xlu0 %v2372_v15, %s3073_s3  ;;  %v2524_v15 = vld [vmem:[%s3872_s7 + $0x20] sm:$0xff] }
0x2250   :  { %v2375_v62 = vpop.permute.xlu2 %2374 }
0x2251   :  { %2667 = vmatmul.msk.f32.vlgmr.msrb.gmra.mxu2 %vm239_vm9, %v2375_v62 }
0x22b8   :  { %v2401_v8 = vpop.permute.xlu0 %2400 }
0x22b9   :  { %2668 = vmatmul.msk.f32.vlgmr.msrb.gmra.mxu3 %vm239_vm9, %v2401_v8  ;;  %v2523_v8 = vld [vmem:[%s3872_s7 + $0x18] sm:$0xff] }
0x22d4   :  { %v2395_v39 = vpop.f32.mrf.mxu2 }
0x22d5   :  { %v2398_v0 = vadd.f32 %v2395_v39, %v1417_v48  ;;  %v2522_v48 = vld [vmem:[%s3872_s7 + $0x10] sm:$0xff] }
0x22d7   :  { %2938 = vtanh.f32 %v2398_v0  ;;  %v2669_v7 = vmul.f32 -1.442695, %v2398_v0 }
0x22d9   :  { %2940 = vpow2.f32 %v2669_v7  ;;  %v2521_v7 = vld [vmem:[%s3872_s7 + $0x8] sm:$0xff] }
0x22dd   :  { %v2939_v61 = vpop.eup %2938 }
0x22de   :  { %2447 = vrot.lane.b32.xlu1 %v2939_v61, %s3072_s11 }
0x22df   :  { %v2941_v58 = vpop.eup %2940 }
0x22e0   :  { %v2428_v9 = vadd.f32 1.0, %v2941_v58  ;;  %v2520_v58 = vld [vmem:[%s3872_s7] sm:$0xff] }
0x22e2   :  { %2942 = vrcp.f32 %v2428_v9  ;;  %v2440_v20 = vand.u32 2147483648, %v2428_v9  ;;  %vm2434_vm8 = vweird.f32 %v2428_v9  ;;  %v2438_v22 = vand.u32 2147483647, %v2428_v9 }
0x22e4   :  { %v2441_v24 = vor.u32 1.1754944e-38, %v2440_v20  ;;  %vm2439_vm11 = vcmp.eq.f32.partialorder %v2438_v22, 8.507059e+37 }
0x22e8   :  { %v2943_v18 = vpop.eup %2942 }
0x22e9   :  { %v2430_v31 = vmul.f32 %v2943_v18, %v2428_v9  ;;  %vm2435_vm7 = vweird.f32 %v2943_v18 }
0x22ea   :  { %vm2436_vm10 = vmor %vm2434_vm8, %vm2435_vm7 }
0x22eb   :  { %v2431_v28 = vsub.f32 1.0, %v2430_v31 }
0x22ed   :  { %v2432_v53 = vmul.f32 %v2943_v18, %v2431_v28 }
0x22ef   :  { %v2433_v17 = vadd.f32 %v2943_v18, %v2432_v53 }
0x22f1   :  { %v2437_v21 = vsel %vm2436_vm10, %v2943_v18, %v2433_v17 }
0x22f2   :  { %v3792_v37 = vsel %vm2439_vm11, %v2441_v24, %v2437_v21 }
0x22f3   :  { %v2445_v40 = vmul.f32 %v3792_v37, %v3774_v5  ;;  %v2533_v5 = vld [vmem:[%s3872_s7 + $0x68] sm:$0xff] }
0x22f4   :  { %2542 = vmatpush.msra.mxu0 %v2533_v5 }
0x22f6   :  { %2543 = vmatpush.msra.mxu0 %v2532_v11 }
0x22f8   :  { %2544 = vmatpush.msra.mxu0 %v2531_v14 }
0x22fa   :  { %2545 = vmatpush.msra.mxu0 %v2530_v59 }
0x233c   :  { %v2421_v16 = vpop.f32.mrf.mxu3 }
0x233d   :  { %v2424_v44 = vadd.f32 %v2421_v16, %v1437_v13 }
0x233f   :  { %2944 = vtanh.f32 %v2424_v44  ;;  %v2670_v23 = vmul.f32 -1.442695, %v2424_v44 }
0x2341   :  { %2946 = vpow2.f32 %v2670_v23 }
0x2345   :  { %v2945_v42 = vpop.eup %2944 }
0x2346   :  { %2484 = vrot.lane.b32.xlu2 %v2945_v42, %s3072_s11  ;;  %v2681_v42 = vld [vmem:[%s3873_s8] ss:$0 sm:$0xff] }
0x2347   :  { %v2947_v2 = vpop.eup %2946 }
0x2348   :  { %v2465_v25 = vadd.f32 1.0, %v2947_v2 }
0x234a   :  { %2948 = vrcp.f32 %v2465_v25  ;;  %v2477_v41 = vand.u32 2147483648, %v2465_v25  ;;  %vm2471_vm13 = vweird.f32 %v2465_v25  ;;  %v2475_v47 = vand.u32 2147483647, %v2465_v25 }
0x234c   :  { %v2478_v45 = vor.u32 1.1754944e-38, %v2477_v41  ;;  %vm2476_vm15 = vcmp.eq.f32.partialorder %v2475_v47, 8.507059e+37 }
0x2350   :  { %v2448_v46 = vpop.permute.xlu1 %2447  ;;  %v2949_v10 = vpop.eup %2948 }
0x2351   :  { %v2450_v52 = vmul.f32 %v2448_v46, %v3792_v37  ;;  %v2467_v27 = vmul.f32 %v2949_v10, %v2465_v25  ;;  %vm2472_vm12 = vweird.f32 %v2949_v10 }
0x2352   :  { %vm2473_vm14 = vmor %vm2471_vm13, %vm2472_vm12 }
0x2353   :  { %2452 = vrot.lane.b32.xlu0 %v2450_v52, %s3073_s3  ;;  %v2468_v29 = vsub.f32 1.0, %v2467_v27 }
0x2355   :  { %v2469_v38 = vmul.f32 %v2949_v10, %v2468_v29 }
0x2357   :  { %v2470_v30 = vadd.f32 %v2949_v10, %v2469_v38 }
0x2359   :  { %v2474_v33 = vsel %vm2473_vm14, %v2949_v10, %v2470_v30 }
0x235a   :  { %v2479_v51 = vsel %vm2476_vm15, %v2478_v45, %v2474_v33 }
0x235b   :  { %v2482_v43 = vmul.f32 %v2479_v51, %v3779_v19  ;;  %v2529_v19 = vld [vmem:[%s3872_s7 + $0x48] sm:$0xff]  ;;  %s3075_s7 = smov [#allocation10]  }
0x235c   :  { %2546 = vmatpush.msra.mxu0 %v2529_v19  ;;  %s2566_s0 = sshll.u32 %s3075_s7, 4  ;;  %s2567_s0 = int_to_ptr.vmem [resolvable:$true] %s2566_s0 }
0x235e   :  { %2547 = vmatpush.msra.mxu0 %v2528_v1 }
0x2360   :  { %2548 = vmatpush.msra.mxu0 %v2527_v4 }
0x2362   :  { %2549 = vmatpush.msra.mxu0 %v2526_v54 }
0x2364   :  { %2550 = vmatpush.msra.mxu0 %v2525_v34 }
0x2366   :  { %2551 = vmatpush.msra.mxu0 %v2524_v15 }
0x2368   :  { %2552 = vmatpush.msra.mxu0 %v2523_v8 }
0x236a   :  { %2553 = vmatpush.msra.mxu0 %v2522_v48 }
0x236c   :  { %2554 = vmatpush.msra.mxu0 %v2521_v7 }
0x236e   :  { %2555 = vmatpush.msra.mxu0 %v2520_v58 }
0x23a0   :  { %v2485_v36 = vpop.permute.xlu2 %2484 }
0x23a1   :  { %v2487_v55 = vmul.f32 %v2485_v36, %v2479_v51 }
0x23a3   :  { %2489 = vrot.lane.b32.xlu1 %v2487_v55, %s3073_s3 }
0x23ab   :  { %2504 = vrot.lane.b32.xlu1 %v2499_v35, %s3073_s3 }
0x23c5   :  { %v2453_v63 = vpop.permute.xlu0 %2452 }
0x23c6   :  { %v2455_v49 = vadd.f32 %v2453_v63, %v2445_v40 }
0x23c8   :  { %2950 = vtanh.f32 %v2455_v49 }
0x23ce   :  { %v2951_v60 = vpop.eup %2950 }
0x23cf   :  { %2458 = vrot.lane.b32.xlu2 %v2951_v60, %s3072_s11 }
0x2415   :  { %v2490_v26 = vpop.permute.xlu1 %2489 }
0x2416   :  { %v2492_v57 = vadd.f32 %v2490_v26, %v2482_v43 }
0x2418   :  { %2952 = vtanh.f32 %v2492_v57  ;;  %v2502_v3 = vadd.f32 %v2492_v57, %v2455_v49 }
0x241d   :  { %v2505_v9 = vpop.permute.xlu1 %2504 }
0x241e   :  { %v2953_v6 = vpop.eup %2952  ;;  %v2515_v18 = vsel %vm239_vm9, %v2505_v9, %v3446_v56 }
0x241f   :  { %2495 = vrot.lane.b32.xlu0 %v2953_v6, %s3072_s11 }
0x2427   :  { %2512 = vrot.lane.b32.xlu0 %v2502_v3, %s3072_s11 }
0x2429   :  { %v2459_v62 = vpop.permute.xlu2 %2458 }
0x242a   :  { %v2461_v39 = vmul.f32 %v2459_v62, %v3792_v37 }
0x2491   :  { %v2496_v50 = vpop.permute.xlu0 %2495 }
0x2492   :  { %v2498_v0 = vmul.f32 %v2496_v50, %v2479_v51 }
0x2494   :  { %v2501_v61 = vadd.f32 %v2498_v0, %v2461_v39 }
0x2496   :  { %2508 = vrot.lane.b32.xlu2 %v2501_v61, %s3074_s6 }
0x2499   :  { %v2513_v16 = vpop.permute.xlu0 %2512 }
0x24f0   :  { %v2509_v13 = vpop.permute.xlu2 %2508 }
0x24f1   :  { %v2516_v44 = vsel %vm1353_vm6, %v2515_v18, %v2509_v13 }
0x24f2   :  { %v2518_v31 = vsel %vm2517_vm0, %v2516_v44, %v2513_v16 }
0x24f3   :  { %2954 = vtanh.f32 %v2518_v31 }
0x24f9   :  { %v2955_v28 = vpop.eup %2954 }
0x24fa   :  { %2556 = vmatmul.f32.vlgmr.msra.gmra.mxu0 %v2955_v28 }
0x2577   :  { %v2557_v53 = vpop.f32.mrf.mxu0 }
0x2578   :  { %v2558_v56 = vadd.f32 %v2681_v42, %v2557_v53 }
0x257a   :  { %2560 = vst.msk [vmem:[#allocation10] sm:$0xff] %vm239_vm9, %v2558_v56 }
0x257b   :  { %2571 = dma.vmem_to_hbm [thread:$0]  %s2567_s0, 128, %s2569_s5, [#allocation6]  }
0x257c   :  { %3064 = dma.done.wait [#allocation6], 128  }
0x257d   :  { %3065 = vsyncadd [#allocation6], 4294967168 }
0x257e   :  { %2576 = vsyncpa [#allocation5], 1 }
0x257f   :  { %2577 = vsyncpa [#allocation8], 1 }
0x2580   :  { %2578 = vsyncpa [#allocation6], 1 }

</bundles_post_ra>
